<compile_context>
chip_gen: v6e
topology: v6e:2x2x1
jax: 0.10.0
libtpu: 0.0.40
codegen_flags: <defaults>
</compile_context>

<pallas_src>
import functools
import math

import jax
import jax.numpy as jnp
from jax import lax
from jax.experimental import pallas as pl
from jax.experimental.pallas import tpu as pltpu


_VMEM_LIMIT = 32 * 1024 * 1024  # safe scoped-VMEM request on v5e/v6e/v7x


# ------------------------- in-kernel building blocks -------------------------


def _attn_out(q, k, v, wo_heads, bo, heads):
    """Multi-head attention fused with the output projection.

    q: [Sq, D] f32 (1/sqrt(dh) already folded into the Q weights),
    k, v: [Sk, D] f32, wo_heads: [H, dh, D] bf16, bo: [1, D] f32.
    Returns [Sq, D] f32.  One softmax pass over all heads; the per-head
    context is accumulated straight into the output projection (no concat).
    """
    sq, d = q.shape
    dh = d // heads
    q16 = q.astype(jnp.bfloat16)        # casts hoisted out of the head loop
    k16 = k.astype(jnp.bfloat16)
    v16 = v.astype(jnp.bfloat16)
    # scores for all heads stacked on a leading head axis -> one softmax pass
    s = jnp.stack(
        [lax.dot_general(q16[:, h * dh:(h + 1) * dh],
                         k16[:, h * dh:(h + 1) * dh],
                         (((1,), (1,)), ((), ())),
                         preferred_element_type=jnp.float32)
         for h in range(heads)], axis=0)                    # [H, Sq, Sk] f32
    m = jnp.max(s, axis=-1, keepdims=True)
    e = jnp.exp(s - m)
    p16 = (e / jnp.sum(e, axis=-1, keepdims=True)).astype(jnp.bfloat16)
    out = bo                                                # [1, D] broadcasts
    for h in range(heads):
        ctx_h = jnp.dot(p16[h], v16[:, h * dh:(h + 1) * dh],
                        preferred_element_type=jnp.float32)  # [Sq, dh]
        out = out + jnp.dot(ctx_h.astype(jnp.bfloat16), wo_heads[h],
                            preferred_element_type=jnp.float32)  # [Sq, D]
    return out


def _self_attn_ln(h, wqkv, bqkv, wo_heads, bo, g, b_ln, heads, eps=1e-5):
    """LayerNorm(MHA(h, h, h) + h).  h: [S, D] f32."""
    d = h.shape[-1]
    qkv = jnp.dot(h.astype(jnp.bfloat16), wqkv,
                  preferred_element_type=jnp.float32) + bqkv    # [S, 3D] f32
    o = _attn_out(qkv[:, :d], qkv[:, d:2 * d], qkv[:, 2 * d:],
                  wo_heads, bo, heads)
    z = o + h                                                   # residual, f32
    mu = jnp.mean(z, axis=-1, keepdims=True)
    var = jnp.mean((z - mu) ** 2, axis=-1, keepdims=True)
    return (z - mu) * lax.rsqrt(var + eps) * g + b_ln


def _cross_attn_out(hq, hkv16, wq, bq, wkv, bkv, wo_heads, bo, heads):
    """MHA(key=hkv, value=hkv, query=hq) with fused KV projection."""
    d = hq.shape[-1]
    q = jnp.dot(hq.astype(jnp.bfloat16), wq,
                preferred_element_type=jnp.float32) + bq        # [Sq, D] f32
    kv = jnp.dot(hkv16, wkv,
                 preferred_element_type=jnp.float32) + bkv      # [Sk, 2D] f32
    return _attn_out(q, kv[:, :d], kv[:, d:], wo_heads, bo, heads)


def _resblock(h, w1, b1, w2, b2):
    """Linear -> ReLU -> Linear -> +residual.  h: [S, D] f32."""
    a = jnp.maximum(
        jnp.dot(h.astype(jnp.bfloat16), w1,
                preferred_element_type=jnp.float32) + b1, 0.0)
    return jnp.dot(a.astype(jnp.bfloat16), w2,
                   preferred_element_type=jnp.float32) + b2 + h


def _top_attn_head0(hq, x16, wq0, bq0, wk0, bk0):
    """Head-0 attention weights of attn2 (only thing the model returns)."""
    q0 = jnp.dot(hq.astype(jnp.bfloat16), wq0,
                 preferred_element_type=jnp.float32) + bq0      # [Sy, dh]
    k0 = jnp.dot(x16, wk0,
                 preferred_element_type=jnp.float32) + bk0      # [Sx, dh]
    s = lax.dot_general(q0.astype(jnp.bfloat16), k0.astype(jnp.bfloat16),
                        (((1,), (1,)), ((), ())),
                        preferred_element_type=jnp.float32)     # [Sy, Sx]
    m = jnp.max(s, axis=-1, keepdims=True)
    e = jnp.exp(s - m)
    return e / jnp.sum(e, axis=-1, keepdims=True)


# ----------------------------- the fused kernel -----------------------------


def _ranknet_kernel(x_ref, y_ref, *rest, treedef, heads, n_enc, n_rank):
    *param_refs, out_ref = rest
    p = jax.tree_util.tree_unflatten(treedef, list(param_refs))

    x16 = x_ref[0]                              # [Sx, D] bf16 (original x)
    h = x16.astype(jnp.float32)                 # encoder activation, f32

    # --- KeyphraseEncoder: n_enc x IdentLayer1 ---
    e = p["enc"]
    for l in range(n_enc):
        h = _self_attn_ln(h, e["wqkv"][l], e["bqkv"][l], e["wo"][l], e["bo"][l],
                          e["ln_g"][l], e["ln_b"][l], heads)
        h = _resblock(h, e["w1"][l], e["b1"][l], e["w2"][l], e["b2"][l])
    enc16 = h.astype(jnp.bfloat16)              # encoder output (cast once)

    # --- ranknet: n_rank x IdentLayer2 ---
    yv = y_ref[0].astype(jnp.float32)           # [Sy, D] f32
    r = p["rank"]
    for l in range(n_rank):
        y_ln = _self_attn_ln(yv, r["wqkv1"][l], r["bqkv1"][l], r["wo1"][l],
                             r["bo1"][l], r["ln_g"][l], r["ln_b"][l], heads)
        o = _cross_attn_out(y_ln, enc16, r["wq2"][l], r["bq2"][l],
                            r["wkv2"][l], r["bkv2"][l], r["wo2"][l],
                            r["bo2"][l], heads)
        yv = _resblock(o, r["w1"][l], r["b1"][l], r["w2"][l], r["b2"][l])

    # --- final: attn1 (self) + LayerNorm, then attn2 head-0 scores only ---
    f = p["final"]
    y_ln = _self_attn_ln(yv, f["wqkv1"][...], f["bqkv1"][...], f["wo1"][...],
                         f["bo1"][...], f["ln_g"][...], f["ln_b"][...], heads)
    top = _top_attn_head0(y_ln, x16, f["wq0"][...], f["bq0"][...],
                          f["wk0"][...], f["bk0"][...])
    out_ref[0] = top.astype(out_ref.dtype)


# ----------------------------- model forward -----------------------------


def ranknet_forward(params, x, y, head_count):
    B, Sx, D = x.shape
    Sy = y.shape[1]
    x16 = x.astype(jnp.bfloat16)
    y16 = y.astype(jnp.bfloat16)

    n_enc = params["enc"]["wqkv"].shape[0]
    n_rank = params["rank"]["wqkv1"].shape[0] if params["rank"] else 0

    flat, treedef = jax.tree_util.tree_flatten(params)

    def _const_spec(a):
        zeros = (0,) * a.ndim
        return pl.BlockSpec(a.shape, lambda b, _z=zeros: _z)

    kernel = functools.partial(_ranknet_kernel, treedef=treedef,
                               heads=head_count, n_enc=n_enc, n_rank=n_rank)

    top_attn = pl.pallas_call(
        kernel,
        out_shape=jax.ShapeDtypeStruct((B, Sy, Sx), jnp.float32),
        grid=(B,),
        in_specs=[pl.BlockSpec((1, Sx, D), lambda b: (b, 0, 0)),
                  pl.BlockSpec((1, Sy, D), lambda b: (b, 0, 0))]
                 + [_const_spec(a) for a in flat],
        out_specs=pl.BlockSpec((1, Sy, Sx), lambda b: (b, 0, 0)),
        compiler_params=pltpu.CompilerParams(
            dimension_semantics=("parallel",),
            vmem_limit_bytes=_VMEM_LIMIT),
    )(x16, y16, *flat)
    return top_attn


# ----------------------------- parameter init -----------------------------


def _init_lin(key, din, dout):
    w = jax.random.normal(key, (din, dout), jnp.float32) / math.sqrt(din)
    b = jnp.zeros((dout,), jnp.float32)
    return w, b


def _init_self_mha(key, D, heads):
    dh = D // heads
    qscale = 1.0 / math.sqrt(dh)        # attention scale folded into Q weights
    ks = jax.random.split(key, 4)
    wq, bq = _init_lin(ks[0], D, D)
    wk, bk = _init_lin(ks[1], D, D)
    wv, bv = _init_lin(ks[2], D, D)
    wo, bo = _init_lin(ks[3], D, D)
    return {
        "wqkv": jnp.concatenate([wq * qscale, wk, wv], axis=1).astype(jnp.bfloat16),
        "bqkv": jnp.concatenate([bq * qscale, bk, bv])[None, :].astype(jnp.float32),
        "wo": wo.reshape(heads, dh, D).astype(jnp.bfloat16),
        "bo": bo[None, :].astype(jnp.float32),
    }


def _init_cross_mha(key, D, heads):
    dh = D // heads
    qscale = 1.0 / math.sqrt(dh)
    ks = jax.random.split(key, 4)
    wq, bq = _init_lin(ks[0], D, D)
    wk, bk = _init_lin(ks[1], D, D)
    wv, bv = _init_lin(ks[2], D, D)
    wo, bo = _init_lin(ks[3], D, D)
    return {
        "wq": (wq * qscale).astype(jnp.bfloat16),
        "bq": (bq * qscale)[None, :].astype(jnp.float32),
        "wkv": jnp.concatenate([wk, wv], axis=1).astype(jnp.bfloat16),
        "bkv": jnp.concatenate([bk, bv])[None, :].astype(jnp.float32),
        "wo": wo.reshape(heads, dh, D).astype(jnp.bfloat16),
        "bo": bo[None, :].astype(jnp.float32),
    }


def _init_final_cross_head0(key, D, heads):
    # Only head 0 of Q/K is needed: attn2's context / output projection are
    # never used (the model returns top_attn only).
    dh = D // heads
    qscale = 1.0 / math.sqrt(dh)
    ks = jax.random.split(key, 4)
    wq, bq = _init_lin(ks[0], D, D)
    wk, bk = _init_lin(ks[1], D, D)
    return {
        "wq0": (wq[:, :dh] * qscale).astype(jnp.bfloat16),
        "bq0": (bq[:dh] * qscale)[None, :].astype(jnp.float32),
        "wk0": wk[:, :dh].astype(jnp.bfloat16),
        "bk0": bk[:dh][None, :].astype(jnp.float32),
    }


def _init_res(key, D):
    k1, k2 = jax.random.split(key)
    w1, b1 = _init_lin(k1, D, D)
    w2, b2 = _init_lin(k2, D, D)
    return {"w1": w1.astype(jnp.bfloat16), "b1": b1[None, :].astype(jnp.float32),
            "w2": w2.astype(jnp.bfloat16), "b2": b2[None, :].astype(jnp.float32)}


def _init_enc_layer(key, D, heads):
    k1, k2 = jax.random.split(key)
    m = _init_self_mha(k1, D, heads)
    r = _init_res(k2, D)
    return {"wqkv": m["wqkv"], "bqkv": m["bqkv"], "wo": m["wo"], "bo": m["bo"],
            "ln_g": jnp.ones((1, D), jnp.float32),
            "ln_b": jnp.zeros((1, D), jnp.float32),
            "w1": r["w1"], "b1": r["b1"], "w2": r["w2"], "b2": r["b2"]}


def _init_rank_layer(key, D, heads):
    k1, k2, k3 = jax.random.split(key, 3)
    m1 = _init_self_mha(k1, D, heads)
    m2 = _init_cross_mha(k2, D, heads)
    r = _init_res(k3, D)
    return {"wqkv1": m1["wqkv"], "bqkv1": m1["bqkv"], "wo1": m1["wo"], "bo1": m1["bo"],
            "ln_g": jnp.ones((1, D), jnp.float32),
            "ln_b": jnp.zeros((1, D), jnp.float32),
            "wq2": m2["wq"], "bq2": m2["bq"], "wkv2": m2["wkv"], "bkv2": m2["bkv"],
            "wo2": m2["wo"], "bo2": m2["bo"],
            "w1": r["w1"], "b1": r["b1"], "w2": r["w2"], "b2": r["b2"]}


def _stack_layers(layer_dicts):
    if not layer_dicts:
        return {}
    return jax.tree_util.tree_map(lambda *xs: jnp.stack(xs, axis=0), *layer_dicts)


def init_ranknet(key, D, heads, n):
    assert D % heads == 0
    keys = jax.random.split(key, 2 * n + 1)
    enc_layers = [_init_enc_layer(keys[i], D, heads) for i in range(n)]
    rank_layers = [_init_rank_layer(keys[n + i], D, heads) for i in range(n - 1)]
    attn1 = _init_self_mha(keys[2 * n - 1], D, heads)
    final = {"wqkv1": attn1["wqkv"], "bqkv1": attn1["bqkv"],
             "wo1": attn1["wo"], "bo1": attn1["bo"],
             "ln_g": jnp.ones((1, D), jnp.float32),
             "ln_b": jnp.zeros((1, D), jnp.float32)}
    final.update(_init_final_cross_head0(keys[2 * n], D, heads))
    return {"enc": _stack_layers(enc_layers),
            "rank": _stack_layers(rank_layers),
            "final": final}


# ----------------------------- main -----------------------------


if __name__ == "__main__":
    B, Sx, Sy, D, H, N_LAYERS = 2, 8, 8, 32, 4, 2
    root = jax.random.PRNGKey(0)
    kx, ky, kp = jax.random.split(root, 3)
    x = jax.random.normal(kx, (B, Sx, D), jnp.float32)
    y = jax.random.normal(ky, (B, Sy, D), jnp.float32)
    params = init_ranknet(kp, D, H, N_LAYERS)

    fwd = jax.jit(functools.partial(ranknet_forward, head_count=H))
    top_attn = fwd(params, x, y)
    jax.block_until_ready(top_attn)

    assert top_attn.shape == (B, Sy, Sx), top_attn.shape
    assert bool(jnp.all(jnp.isfinite(top_attn)))
    # exact softmax (f32): rows should sum to 1 tightly
    row_sums = jnp.sum(top_attn, axis=-1)
    assert jnp.allclose(row_sums, 1.0, atol=1e-3), row_sums
    print("KERNEL_OK")
</pallas_src>

<mosaic_0001>
module attributes {stable_mosaic.version = 11 : i64} {
  func.func @_ranknet_kernel(%arg0: i32, %arg1: memref<1x8x32xbf16, #tpu.memory_space<vmem>>, %arg2: memref<1x8x32xbf16, #tpu.memory_space<vmem>>, %arg3: memref<2x1x32xf32, #tpu.memory_space<vmem>>, %arg4: memref<2x1x32xf32, #tpu.memory_space<vmem>>, %arg5: memref<2x1x32xf32, #tpu.memory_space<vmem>>, %arg6: memref<2x1x96xf32, #tpu.memory_space<vmem>>, %arg7: memref<2x1x32xf32, #tpu.memory_space<vmem>>, %arg8: memref<2x1x32xf32, #tpu.memory_space<vmem>>, %arg9: memref<2x32x32xbf16, #tpu.memory_space<vmem>>, %arg10: memref<2x32x32xbf16, #tpu.memory_space<vmem>>, %arg11: memref<2x4x8x32xbf16, #tpu.memory_space<vmem>>, %arg12: memref<2x32x96xbf16, #tpu.memory_space<vmem>>, %arg13: memref<1x8xf32, #tpu.memory_space<vmem>>, %arg14: memref<1x32xf32, #tpu.memory_space<vmem>>, %arg15: memref<1x8xf32, #tpu.memory_space<vmem>>, %arg16: memref<1x96xf32, #tpu.memory_space<vmem>>, %arg17: memref<1x32xf32, #tpu.memory_space<vmem>>, %arg18: memref<1x32xf32, #tpu.memory_space<vmem>>, %arg19: memref<32x8xbf16, #tpu.memory_space<vmem>>, %arg20: memref<4x8x32xbf16, #tpu.memory_space<vmem>>, %arg21: memref<32x8xbf16, #tpu.memory_space<vmem>>, %arg22: memref<32x96xbf16, #tpu.memory_space<vmem>>, %arg23: memref<1x1x32xf32, #tpu.memory_space<vmem>>, %arg24: memref<1x1x32xf32, #tpu.memory_space<vmem>>, %arg25: memref<1x1x64xf32, #tpu.memory_space<vmem>>, %arg26: memref<1x1x32xf32, #tpu.memory_space<vmem>>, %arg27: memref<1x1x32xf32, #tpu.memory_space<vmem>>, %arg28: memref<1x1x32xf32, #tpu.memory_space<vmem>>, %arg29: memref<1x1x96xf32, #tpu.memory_space<vmem>>, %arg30: memref<1x1x32xf32, #tpu.memory_space<vmem>>, %arg31: memref<1x1x32xf32, #tpu.memory_space<vmem>>, %arg32: memref<1x32x32xbf16, #tpu.memory_space<vmem>>, %arg33: memref<1x32x32xbf16, #tpu.memory_space<vmem>>, %arg34: memref<1x32x64xbf16, #tpu.memory_space<vmem>>, %arg35: memref<1x4x8x32xbf16, #tpu.memory_space<vmem>>, %arg36: memref<1x4x8x32xbf16, #tpu.memory_space<vmem>>, %arg37: memref<1x32x32xbf16, #tpu.memory_space<vmem>>, %arg38: memref<1x32x96xbf16, #tpu.memory_space<vmem>>, %arg39: memref<1x8x8xf32, #tpu.memory_space<vmem>>) attributes {dimension_semantics = [#tpu.dimension_semantics<parallel>], iteration_bounds = array<i64: 2>, scalar_prefetch = 0 : i64, scratch_operands = 0 : i64, tpu.core_type = #tpu.core_type<tc>, window_params = [{transform_indices = @transform_0, window_bounds = array<i64: 1, 8, 32>}, {transform_indices = @transform_1, window_bounds = array<i64: 1, 8, 32>}, {pipeline_mode = #tpu.pipeline_mode<synchronous>, transform_indices = @transform_2, window_bounds = array<i64: 2, 1, 32>}, {pipeline_mode = #tpu.pipeline_mode<synchronous>, transform_indices = @transform_3, window_bounds = array<i64: 2, 1, 32>}, {pipeline_mode = #tpu.pipeline_mode<synchronous>, transform_indices = @transform_4, window_bounds = array<i64: 2, 1, 32>}, {pipeline_mode = #tpu.pipeline_mode<synchronous>, transform_indices = @transform_5, window_bounds = array<i64: 2, 1, 96>}, {pipeline_mode = #tpu.pipeline_mode<synchronous>, transform_indices = @transform_6, window_bounds = array<i64: 2, 1, 32>}, {pipeline_mode = #tpu.pipeline_mode<synchronous>, transform_indices = @transform_7, window_bounds = array<i64: 2, 1, 32>}, {pipeline_mode = #tpu.pipeline_mode<synchronous>, transform_indices = @transform_8, window_bounds = array<i64: 2, 32, 32>}, {pipeline_mode = #tpu.pipeline_mode<synchronous>, transform_indices = @transform_9, window_bounds = array<i64: 2, 32, 32>}, {pipeline_mode = #tpu.pipeline_mode<synchronous>, transform_indices = @transform_10, window_bounds = array<i64: 2, 4, 8, 32>}, {pipeline_mode = #tpu.pipeline_mode<synchronous>, transform_indices = @transform_11, window_bounds = array<i64: 2, 32, 96>}, {pipeline_mode = #tpu.pipeline_mode<synchronous>, transform_indices = @transform_12, window_bounds = array<i64: 1, 8>}, {pipeline_mode = #tpu.pipeline_mode<synchronous>, transform_indices = @transform_13, window_bounds = array<i64: 1, 32>}, {pipeline_mode = #tpu.pipeline_mode<synchronous>, transform_indices = @transform_14, window_bounds = array<i64: 1, 8>}, {pipeline_mode = #tpu.pipeline_mode<synchronous>, transform_indices = @transform_15, window_bounds = array<i64: 1, 96>}, {pipeline_mode = #tpu.pipeline_mode<synchronous>, transform_indices = @transform_16, window_bounds = array<i64: 1, 32>}, {pipeline_mode = #tpu.pipeline_mode<synchronous>, transform_indices = @transform_17, window_bounds = array<i64: 1, 32>}, {pipeline_mode = #tpu.pipeline_mode<synchronous>, transform_indices = @transform_18, window_bounds = array<i64: 32, 8>}, {pipeline_mode = #tpu.pipeline_mode<synchronous>, transform_indices = @transform_19, window_bounds = array<i64: 4, 8, 32>}, {pipeline_mode = #tpu.pipeline_mode<synchronous>, transform_indices = @transform_20, window_bounds = array<i64: 32, 8>}, {pipeline_mode = #tpu.pipeline_mode<synchronous>, transform_indices = @transform_21, window_bounds = array<i64: 32, 96>}, {pipeline_mode = #tpu.pipeline_mode<synchronous>, transform_indices = @transform_22, window_bounds = array<i64: 1, 1, 32>}, {pipeline_mode = #tpu.pipeline_mode<synchronous>, transform_indices = @transform_23, window_bounds = array<i64: 1, 1, 32>}, {pipeline_mode = #tpu.pipeline_mode<synchronous>, transform_indices = @transform_24, window_bounds = array<i64: 1, 1, 64>}, {pipeline_mode = #tpu.pipeline_mode<synchronous>, transform_indices = @transform_25, window_bounds = array<i64: 1, 1, 32>}, {pipeline_mode = #tpu.pipeline_mode<synchronous>, transform_indices = @transform_26, window_bounds = array<i64: 1, 1, 32>}, {pipeline_mode = #tpu.pipeline_mode<synchronous>, transform_indices = @transform_27, window_bounds = array<i64: 1, 1, 32>}, {pipeline_mode = #tpu.pipeline_mode<synchronous>, transform_indices = @transform_28, window_bounds = array<i64: 1, 1, 96>}, {pipeline_mode = #tpu.pipeline_mode<synchronous>, transform_indices = @transform_29, window_bounds = array<i64: 1, 1, 32>}, {pipeline_mode = #tpu.pipeline_mode<synchronous>, transform_indices = @transform_30, window_bounds = array<i64: 1, 1, 32>}, {pipeline_mode = #tpu.pipeline_mode<synchronous>, transform_indices = @transform_31, window_bounds = array<i64: 1, 32, 32>}, {pipeline_mode = #tpu.pipeline_mode<synchronous>, transform_indices = @transform_32, window_bounds = array<i64: 1, 32, 32>}, {pipeline_mode = #tpu.pipeline_mode<synchronous>, transform_indices = @transform_33, window_bounds = array<i64: 1, 32, 64>}, {pipeline_mode = #tpu.pipeline_mode<synchronous>, transform_indices = @transform_34, window_bounds = array<i64: 1, 4, 8, 32>}, {pipeline_mode = #tpu.pipeline_mode<synchronous>, transform_indices = @transform_35, window_bounds = array<i64: 1, 4, 8, 32>}, {pipeline_mode = #tpu.pipeline_mode<synchronous>, transform_indices = @transform_36, window_bounds = array<i64: 1, 32, 32>}, {pipeline_mode = #tpu.pipeline_mode<synchronous>, transform_indices = @transform_37, window_bounds = array<i64: 1, 32, 96>}, {transform_indices = @transform_38, window_bounds = array<i64: 1, 8, 8>}]} {
    %c0 = arith.constant 0 : index
    %c0_0 = arith.constant 0 : index
    %c0_1 = arith.constant 0 : index
    %0 = vector.load %arg1[%c0, %c0_0, %c0_1] : memref<1x8x32xbf16, #tpu.memory_space<vmem>>, vector<1x8x32xbf16>
    %1 = vector.shape_cast %0 : vector<1x8x32xbf16> to vector<8x32xbf16>
    %2 = arith.extf %1 : vector<8x32xbf16> to vector<8x32xf32>
    %c0_2 = arith.constant 0 : index
    %c0_3 = arith.constant 0 : index
    %c0_4 = arith.constant 0 : index
    %3 = vector.load %arg12[%c0_2, %c0_3, %c0_4] : memref<2x32x96xbf16, #tpu.memory_space<vmem>>, vector<1x32x96xbf16>
    %4 = vector.shape_cast %3 : vector<1x32x96xbf16> to vector<32x96xbf16>
    %c0_5 = arith.constant 0 : index
    %c0_6 = arith.constant 0 : index
    %c0_7 = arith.constant 0 : index
    %5 = vector.load %arg6[%c0_5, %c0_6, %c0_7] : memref<2x1x96xf32, #tpu.memory_space<vmem>>, vector<1x1x96xf32>
    %6 = vector.shape_cast %5 : vector<1x1x96xf32> to vector<1x96xf32>
    %c0_8 = arith.constant 0 : index
    %c0_9 = arith.constant 0 : index
    %c0_10 = arith.constant 0 : index
    %c0_11 = arith.constant 0 : index
    %7 = vector.load %arg11[%c0_8, %c0_9, %c0_10, %c0_11] : memref<2x4x8x32xbf16, #tpu.memory_space<vmem>>, vector<1x4x8x32xbf16>
    %8 = vector.shape_cast %7 : vector<1x4x8x32xbf16> to vector<4x8x32xbf16>
    %c0_12 = arith.constant 0 : index
    %c0_13 = arith.constant 0 : index
    %c0_14 = arith.constant 0 : index
    %9 = vector.load %arg5[%c0_12, %c0_13, %c0_14] : memref<2x1x32xf32, #tpu.memory_space<vmem>>, vector<1x1x32xf32>
    %10 = vector.shape_cast %9 : vector<1x1x32xf32> to vector<1x32xf32>
    %c0_15 = arith.constant 0 : index
    %c0_16 = arith.constant 0 : index
    %c0_17 = arith.constant 0 : index
    %11 = vector.load %arg8[%c0_15, %c0_16, %c0_17] : memref<2x1x32xf32, #tpu.memory_space<vmem>>, vector<1x1x32xf32>
    %12 = vector.shape_cast %11 : vector<1x1x32xf32> to vector<1x32xf32>
    %c0_18 = arith.constant 0 : index
    %c0_19 = arith.constant 0 : index
    %c0_20 = arith.constant 0 : index
    %13 = vector.load %arg7[%c0_18, %c0_19, %c0_20] : memref<2x1x32xf32, #tpu.memory_space<vmem>>, vector<1x1x32xf32>
    %14 = vector.shape_cast %13 : vector<1x1x32xf32> to vector<1x32xf32>
    %15 = arith.truncf %2 : vector<8x32xf32> to vector<8x32xbf16>
    %cst = arith.constant dense<0.000000e+00> : vector<8x96xf32>
    %16 = tpu.matmul %15, %4, %cst {dimension_numbers = #tpu.dot_dimension_numbers<[1], [0], [0], [1], [0, 0, 1, 1], [], []>} : vector<8x32xbf16>, vector<32x96xbf16>, vector<8x96xf32> -> vector<8x96xf32>
    %17 = vector.broadcast %6 : vector<1x96xf32> to vector<8x96xf32>
    %18 = arith.addf %16, %17 : vector<8x96xf32>
    %19 = vector.extract_strided_slice %18 {offsets = [0, 0], sizes = [8, 32], strides = [1, 1]} : vector<8x96xf32> to vector<8x32xf32>
    %20 = vector.extract_strided_slice %18 {offsets = [0, 32], sizes = [8, 32], strides = [1, 1]} : vector<8x96xf32> to vector<8x32xf32>
    %21 = vector.extract_strided_slice %18 {offsets = [0, 64], sizes = [8, 32], strides = [1, 1]} : vector<8x96xf32> to vector<8x32xf32>
    %22 = arith.truncf %19 : vector<8x32xf32> to vector<8x32xbf16>
    %23 = arith.truncf %20 : vector<8x32xf32> to vector<8x32xbf16>
    %24 = arith.truncf %21 : vector<8x32xf32> to vector<8x32xbf16>
    %25 = vector.extract_strided_slice %22 {offsets = [0, 0], sizes = [8, 8], strides = [1, 1]} : vector<8x32xbf16> to vector<8x8xbf16>
    %26 = vector.extract_strided_slice %23 {offsets = [0, 0], sizes = [8, 8], strides = [1, 1]} : vector<8x32xbf16> to vector<8x8xbf16>
    %cst_21 = arith.constant dense<0.000000e+00> : vector<8x8xf32>
    %27 = tpu.matmul %25, %26, %cst_21 {dimension_numbers = #tpu.dot_dimension_numbers<[1], [1], [0], [0], [0, 0, 1, 0], [], []>} : vector<8x8xbf16>, vector<8x8xbf16>, vector<8x8xf32> -> vector<8x8xf32>
    %28 = vector.extract_strided_slice %22 {offsets = [0, 8], sizes = [8, 8], strides = [1, 1]} : vector<8x32xbf16> to vector<8x8xbf16>
    %29 = vector.extract_strided_slice %23 {offsets = [0, 8], sizes = [8, 8], strides = [1, 1]} : vector<8x32xbf16> to vector<8x8xbf16>
    %cst_22 = arith.constant dense<0.000000e+00> : vector<8x8xf32>
    %30 = tpu.matmul %28, %29, %cst_22 {dimension_numbers = #tpu.dot_dimension_numbers<[1], [1], [0], [0], [0, 0, 1, 0], [], []>} : vector<8x8xbf16>, vector<8x8xbf16>, vector<8x8xf32> -> vector<8x8xf32>
    %31 = vector.extract_strided_slice %22 {offsets = [0, 16], sizes = [8, 8], strides = [1, 1]} : vector<8x32xbf16> to vector<8x8xbf16>
    %32 = vector.extract_strided_slice %23 {offsets = [0, 16], sizes = [8, 8], strides = [1, 1]} : vector<8x32xbf16> to vector<8x8xbf16>
    %cst_23 = arith.constant dense<0.000000e+00> : vector<8x8xf32>
    %33 = tpu.matmul %31, %32, %cst_23 {dimension_numbers = #tpu.dot_dimension_numbers<[1], [1], [0], [0], [0, 0, 1, 0], [], []>} : vector<8x8xbf16>, vector<8x8xbf16>, vector<8x8xf32> -> vector<8x8xf32>
    %34 = vector.extract_strided_slice %22 {offsets = [0, 24], sizes = [8, 8], strides = [1, 1]} : vector<8x32xbf16> to vector<8x8xbf16>
    %35 = vector.extract_strided_slice %23 {offsets = [0, 24], sizes = [8, 8], strides = [1, 1]} : vector<8x32xbf16> to vector<8x8xbf16>
    %cst_24 = arith.constant dense<0.000000e+00> : vector<8x8xf32>
    %36 = tpu.matmul %34, %35, %cst_24 {dimension_numbers = #tpu.dot_dimension_numbers<[1], [1], [0], [0], [0, 0, 1, 0], [], []>} : vector<8x8xbf16>, vector<8x8xbf16>, vector<8x8xf32> -> vector<8x8xf32>
    %37 = vector.shape_cast %27 : vector<8x8xf32> to vector<1x8x8xf32>
    %38 = vector.shape_cast %30 : vector<8x8xf32> to vector<1x8x8xf32>
    %39 = vector.shape_cast %33 : vector<8x8xf32> to vector<1x8x8xf32>
    %40 = vector.shape_cast %36 : vector<8x8xf32> to vector<1x8x8xf32>
    %41 = tpu.concatenate %37, %38, %39, %40 in 0 : vector<1x8x8xf32>, vector<1x8x8xf32>, vector<1x8x8xf32>, vector<1x8x8xf32> -> vector<4x8x8xf32>
    %cst_25 = arith.constant dense<0xFF800000> : vector<4x8xf32>
    %42 = vector.multi_reduction <maximumf>, %41, %cst_25 [2] : vector<4x8x8xf32> to vector<4x8xf32>
    %43 = vector.shape_cast %42 : vector<4x8xf32> to vector<4x8x1xf32>
    %44 = vector.broadcast %43 : vector<4x8x1xf32> to vector<4x8x8xf32>
    %45 = arith.subf %41, %44 : vector<4x8x8xf32>
    %46 = math.exp %45 : vector<4x8x8xf32>
    %cst_26 = arith.constant dense<0.000000e+00> : vector<4x8xf32>
    %47 = vector.multi_reduction <add>, %46, %cst_26 [2] : vector<4x8x8xf32> to vector<4x8xf32>
    %48 = vector.shape_cast %47 : vector<4x8xf32> to vector<4x8x1xf32>
    %49 = vector.broadcast %48 : vector<4x8x1xf32> to vector<4x8x8xf32>
    %50 = arith.divf %46, %49 : vector<4x8x8xf32>
    %51 = arith.truncf %50 : vector<4x8x8xf32> to vector<4x8x8xbf16>
    %52 = vector.extract_strided_slice %51 {offsets = [0, 0, 0], sizes = [1, 8, 8], strides = [1, 1, 1]} : vector<4x8x8xbf16> to vector<1x8x8xbf16>
    %53 = vector.shape_cast %52 : vector<1x8x8xbf16> to vector<8x8xbf16>
    %54 = vector.extract_strided_slice %24 {offsets = [0, 0], sizes = [8, 8], strides = [1, 1]} : vector<8x32xbf16> to vector<8x8xbf16>
    %cst_27 = arith.constant dense<0.000000e+00> : vector<8x8xf32>
    %55 = tpu.matmul %53, %54, %cst_27 {dimension_numbers = #tpu.dot_dimension_numbers<[1], [0], [0], [1], [0, 0, 1, 1], [], []>} : vector<8x8xbf16>, vector<8x8xbf16>, vector<8x8xf32> -> vector<8x8xf32>
    %56 = arith.truncf %55 : vector<8x8xf32> to vector<8x8xbf16>
    %57 = vector.extract_strided_slice %8 {offsets = [0, 0, 0], sizes = [1, 8, 32], strides = [1, 1, 1]} : vector<4x8x32xbf16> to vector<1x8x32xbf16>
    %58 = vector.shape_cast %57 : vector<1x8x32xbf16> to vector<8x32xbf16>
    %cst_28 = arith.constant dense<0.000000e+00> : vector<8x32xf32>
    %59 = tpu.matmul %56, %58, %cst_28 {dimension_numbers = #tpu.dot_dimension_numbers<[1], [0], [0], [1], [0, 0, 1, 1], [], []>} : vector<8x8xbf16>, vector<8x32xbf16>, vector<8x32xf32> -> vector<8x32xf32>
    %60 = vector.broadcast %10 : vector<1x32xf32> to vector<8x32xf32>
    %61 = arith.addf %60, %59 : vector<8x32xf32>
    %62 = vector.extract_strided_slice %51 {offsets = [1, 0, 0], sizes = [1, 8, 8], strides = [1, 1, 1]} : vector<4x8x8xbf16> to vector<1x8x8xbf16>
    %63 = vector.shape_cast %62 : vector<1x8x8xbf16> to vector<8x8xbf16>
    %64 = vector.extract_strided_slice %24 {offsets = [0, 8], sizes = [8, 8], strides = [1, 1]} : vector<8x32xbf16> to vector<8x8xbf16>
    %cst_29 = arith.constant dense<0.000000e+00> : vector<8x8xf32>
    %65 = tpu.matmul %63, %64, %cst_29 {dimension_numbers = #tpu.dot_dimension_numbers<[1], [0], [0], [1], [0, 0, 1, 1], [], []>} : vector<8x8xbf16>, vector<8x8xbf16>, vector<8x8xf32> -> vector<8x8xf32>
    %66 = arith.truncf %65 : vector<8x8xf32> to vector<8x8xbf16>
    %67 = vector.extract_strided_slice %8 {offsets = [1, 0, 0], sizes = [1, 8, 32], strides = [1, 1, 1]} : vector<4x8x32xbf16> to vector<1x8x32xbf16>
    %68 = vector.shape_cast %67 : vector<1x8x32xbf16> to vector<8x32xbf16>
    %cst_30 = arith.constant dense<0.000000e+00> : vector<8x32xf32>
    %69 = tpu.matmul %66, %68, %cst_30 {dimension_numbers = #tpu.dot_dimension_numbers<[1], [0], [0], [1], [0, 0, 1, 1], [], []>} : vector<8x8xbf16>, vector<8x32xbf16>, vector<8x32xf32> -> vector<8x32xf32>
    %70 = arith.addf %61, %69 : vector<8x32xf32>
    %71 = vector.extract_strided_slice %51 {offsets = [2, 0, 0], sizes = [1, 8, 8], strides = [1, 1, 1]} : vector<4x8x8xbf16> to vector<1x8x8xbf16>
    %72 = vector.shape_cast %71 : vector<1x8x8xbf16> to vector<8x8xbf16>
    %73 = vector.extract_strided_slice %24 {offsets = [0, 16], sizes = [8, 8], strides = [1, 1]} : vector<8x32xbf16> to vector<8x8xbf16>
    %cst_31 = arith.constant dense<0.000000e+00> : vector<8x8xf32>
    %74 = tpu.matmul %72, %73, %cst_31 {dimension_numbers = #tpu.dot_dimension_numbers<[1], [0], [0], [1], [0, 0, 1, 1], [], []>} : vector<8x8xbf16>, vector<8x8xbf16>, vector<8x8xf32> -> vector<8x8xf32>
    %75 = arith.truncf %74 : vector<8x8xf32> to vector<8x8xbf16>
    %76 = vector.extract_strided_slice %8 {offsets = [2, 0, 0], sizes = [1, 8, 32], strides = [1, 1, 1]} : vector<4x8x32xbf16> to vector<1x8x32xbf16>
    %77 = vector.shape_cast %76 : vector<1x8x32xbf16> to vector<8x32xbf16>
    %cst_32 = arith.constant dense<0.000000e+00> : vector<8x32xf32>
    %78 = tpu.matmul %75, %77, %cst_32 {dimension_numbers = #tpu.dot_dimension_numbers<[1], [0], [0], [1], [0, 0, 1, 1], [], []>} : vector<8x8xbf16>, vector<8x32xbf16>, vector<8x32xf32> -> vector<8x32xf32>
    %79 = arith.addf %70, %78 : vector<8x32xf32>
    %80 = vector.extract_strided_slice %51 {offsets = [3, 0, 0], sizes = [1, 8, 8], strides = [1, 1, 1]} : vector<4x8x8xbf16> to vector<1x8x8xbf16>
    %81 = vector.shape_cast %80 : vector<1x8x8xbf16> to vector<8x8xbf16>
    %82 = vector.extract_strided_slice %24 {offsets = [0, 24], sizes = [8, 8], strides = [1, 1]} : vector<8x32xbf16> to vector<8x8xbf16>
    %cst_33 = arith.constant dense<0.000000e+00> : vector<8x8xf32>
    %83 = tpu.matmul %81, %82, %cst_33 {dimension_numbers = #tpu.dot_dimension_numbers<[1], [0], [0], [1], [0, 0, 1, 1], [], []>} : vector<8x8xbf16>, vector<8x8xbf16>, vector<8x8xf32> -> vector<8x8xf32>
    %84 = arith.truncf %83 : vector<8x8xf32> to vector<8x8xbf16>
    %85 = vector.extract_strided_slice %8 {offsets = [3, 0, 0], sizes = [1, 8, 32], strides = [1, 1, 1]} : vector<4x8x32xbf16> to vector<1x8x32xbf16>
    %86 = vector.shape_cast %85 : vector<1x8x32xbf16> to vector<8x32xbf16>
    %cst_34 = arith.constant dense<0.000000e+00> : vector<8x32xf32>
    %87 = tpu.matmul %84, %86, %cst_34 {dimension_numbers = #tpu.dot_dimension_numbers<[1], [0], [0], [1], [0, 0, 1, 1], [], []>} : vector<8x8xbf16>, vector<8x32xbf16>, vector<8x32xf32> -> vector<8x32xf32>
    %88 = arith.addf %79, %87 : vector<8x32xf32>
    %89 = arith.addf %88, %2 : vector<8x32xf32>
    %cst_35 = arith.constant dense<0.000000e+00> : vector<8xf32>
    %90 = vector.multi_reduction <add>, %89, %cst_35 [1] : vector<8x32xf32> to vector<8xf32>
    %91 = vector.shape_cast %90 : vector<8xf32> to vector<8x1xf32>
    %cst_36 = arith.constant 3.200000e+01 : f32
    %92 = vector.broadcast %cst_36 : f32 to vector<8x1xf32>
    %93 = arith.divf %91, %92 : vector<8x1xf32>
    %94 = vector.broadcast %93 : vector<8x1xf32> to vector<8x32xf32>
    %95 = arith.subf %89, %94 : vector<8x32xf32>
    %96 = arith.mulf %95, %95 : vector<8x32xf32>
    %cst_37 = arith.constant dense<0.000000e+00> : vector<8xf32>
    %97 = vector.multi_reduction <add>, %96, %cst_37 [1] : vector<8x32xf32> to vector<8xf32>
    %98 = vector.shape_cast %97 : vector<8xf32> to vector<8x1xf32>
    %cst_38 = arith.constant 3.200000e+01 : f32
    %99 = vector.broadcast %cst_38 : f32 to vector<8x1xf32>
    %100 = arith.divf %98, %99 : vector<8x1xf32>
    %101 = vector.broadcast %93 : vector<8x1xf32> to vector<8x32xf32>
    %102 = arith.subf %89, %101 : vector<8x32xf32>
    %cst_39 = arith.constant 9.99999974E-6 : f32
    %103 = vector.broadcast %cst_39 : f32 to vector<8x1xf32>
    %104 = arith.addf %100, %103 : vector<8x1xf32>
    %105 = math.rsqrt %104 : vector<8x1xf32>
    %106 = vector.broadcast %105 : vector<8x1xf32> to vector<8x32xf32>
    %107 = arith.mulf %102, %106 : vector<8x32xf32>
    %108 = vector.broadcast %12 : vector<1x32xf32> to vector<8x32xf32>
    %109 = arith.mulf %107, %108 : vector<8x32xf32>
    %110 = vector.broadcast %14 : vector<1x32xf32> to vector<8x32xf32>
    %111 = arith.addf %109, %110 : vector<8x32xf32>
    %c0_40 = arith.constant 0 : index
    %c0_41 = arith.constant 0 : index
    %c0_42 = arith.constant 0 : index
    %112 = vector.load %arg9[%c0_40, %c0_41, %c0_42] : memref<2x32x32xbf16, #tpu.memory_space<vmem>>, vector<1x32x32xbf16>
    %113 = vector.shape_cast %112 : vector<1x32x32xbf16> to vector<32x32xbf16>
    %c0_43 = arith.constant 0 : index
    %c0_44 = arith.constant 0 : index
    %c0_45 = arith.constant 0 : index
    %114 = vector.load %arg3[%c0_43, %c0_44, %c0_45] : memref<2x1x32xf32, #tpu.memory_space<vmem>>, vector<1x1x32xf32>
    %115 = vector.shape_cast %114 : vector<1x1x32xf32> to vector<1x32xf32>
    %c0_46 = arith.constant 0 : index
    %c0_47 = arith.constant 0 : index
    %c0_48 = arith.constant 0 : index
    %116 = vector.load %arg10[%c0_46, %c0_47, %c0_48] : memref<2x32x32xbf16, #tpu.memory_space<vmem>>, vector<1x32x32xbf16>
    %117 = vector.shape_cast %116 : vector<1x32x32xbf16> to vector<32x32xbf16>
    %c0_49 = arith.constant 0 : index
    %c0_50 = arith.constant 0 : index
    %c0_51 = arith.constant 0 : index
    %118 = vector.load %arg4[%c0_49, %c0_50, %c0_51] : memref<2x1x32xf32, #tpu.memory_space<vmem>>, vector<1x1x32xf32>
    %119 = vector.shape_cast %118 : vector<1x1x32xf32> to vector<1x32xf32>
    %120 = arith.truncf %111 : vector<8x32xf32> to vector<8x32xbf16>
    %cst_52 = arith.constant dense<0.000000e+00> : vector<8x32xf32>
    %121 = tpu.matmul %120, %113, %cst_52 {dimension_numbers = #tpu.dot_dimension_numbers<[1], [0], [0], [1], [0, 0, 1, 1], [], []>} : vector<8x32xbf16>, vector<32x32xbf16>, vector<8x32xf32> -> vector<8x32xf32>
    %122 = vector.broadcast %115 : vector<1x32xf32> to vector<8x32xf32>
    %123 = arith.addf %121, %122 : vector<8x32xf32>
    %cst_53 = arith.constant 0.000000e+00 : f32
    %124 = vector.broadcast %cst_53 : f32 to vector<8x32xf32>
    %125 = arith.maximumf %123, %124 : vector<8x32xf32>
    %126 = arith.truncf %125 : vector<8x32xf32> to vector<8x32xbf16>
    %cst_54 = arith.constant dense<0.000000e+00> : vector<8x32xf32>
    %127 = tpu.matmul %126, %117, %cst_54 {dimension_numbers = #tpu.dot_dimension_numbers<[1], [0], [0], [1], [0, 0, 1, 1], [], []>} : vector<8x32xbf16>, vector<32x32xbf16>, vector<8x32xf32> -> vector<8x32xf32>
    %128 = vector.broadcast %119 : vector<1x32xf32> to vector<8x32xf32>
    %129 = arith.addf %127, %128 : vector<8x32xf32>
    %130 = arith.addf %129, %111 : vector<8x32xf32>
    %c1 = arith.constant 1 : index
    %c0_55 = arith.constant 0 : index
    %c0_56 = arith.constant 0 : index
    %131 = vector.load %arg12[%c1, %c0_55, %c0_56] : memref<2x32x96xbf16, #tpu.memory_space<vmem>>, vector<1x32x96xbf16>
    %132 = vector.shape_cast %131 : vector<1x32x96xbf16> to vector<32x96xbf16>
    %c1_57 = arith.constant 1 : index
    %c0_58 = arith.constant 0 : index
    %c0_59 = arith.constant 0 : index
    %133 = vector.load %arg6[%c1_57, %c0_58, %c0_59] : memref<2x1x96xf32, #tpu.memory_space<vmem>>, vector<1x1x96xf32>
    %134 = vector.shape_cast %133 : vector<1x1x96xf32> to vector<1x96xf32>
    %c1_60 = arith.constant 1 : index
    %c0_61 = arith.constant 0 : index
    %c0_62 = arith.constant 0 : index
    %c0_63 = arith.constant 0 : index
    %135 = vector.load %arg11[%c1_60, %c0_61, %c0_62, %c0_63] : memref<2x4x8x32xbf16, #tpu.memory_space<vmem>>, vector<1x4x8x32xbf16>
    %136 = vector.shape_cast %135 : vector<1x4x8x32xbf16> to vector<4x8x32xbf16>
    %c1_64 = arith.constant 1 : index
    %c0_65 = arith.constant 0 : index
    %c0_66 = arith.constant 0 : index
    %137 = vector.load %arg5[%c1_64, %c0_65, %c0_66] : memref<2x1x32xf32, #tpu.memory_space<vmem>>, vector<1x1x32xf32>
    %138 = vector.shape_cast %137 : vector<1x1x32xf32> to vector<1x32xf32>
    %c1_67 = arith.constant 1 : index
    %c0_68 = arith.constant 0 : index
    %c0_69 = arith.constant 0 : index
    %139 = vector.load %arg8[%c1_67, %c0_68, %c0_69] : memref<2x1x32xf32, #tpu.memory_space<vmem>>, vector<1x1x32xf32>
    %140 = vector.shape_cast %139 : vector<1x1x32xf32> to vector<1x32xf32>
    %c1_70 = arith.constant 1 : index
    %c0_71 = arith.constant 0 : index
    %c0_72 = arith.constant 0 : index
    %141 = vector.load %arg7[%c1_70, %c0_71, %c0_72] : memref<2x1x32xf32, #tpu.memory_space<vmem>>, vector<1x1x32xf32>
    %142 = vector.shape_cast %141 : vector<1x1x32xf32> to vector<1x32xf32>
    %143 = arith.truncf %130 : vector<8x32xf32> to vector<8x32xbf16>
    %cst_73 = arith.constant dense<0.000000e+00> : vector<8x96xf32>
    %144 = tpu.matmul %143, %132, %cst_73 {dimension_numbers = #tpu.dot_dimension_numbers<[1], [0], [0], [1], [0, 0, 1, 1], [], []>} : vector<8x32xbf16>, vector<32x96xbf16>, vector<8x96xf32> -> vector<8x96xf32>
    %145 = vector.broadcast %134 : vector<1x96xf32> to vector<8x96xf32>
    %146 = arith.addf %144, %145 : vector<8x96xf32>
    %147 = vector.extract_strided_slice %146 {offsets = [0, 0], sizes = [8, 32], strides = [1, 1]} : vector<8x96xf32> to vector<8x32xf32>
    %148 = vector.extract_strided_slice %146 {offsets = [0, 32], sizes = [8, 32], strides = [1, 1]} : vector<8x96xf32> to vector<8x32xf32>
    %149 = vector.extract_strided_slice %146 {offsets = [0, 64], sizes = [8, 32], strides = [1, 1]} : vector<8x96xf32> to vector<8x32xf32>
    %150 = arith.truncf %147 : vector<8x32xf32> to vector<8x32xbf16>
    %151 = arith.truncf %148 : vector<8x32xf32> to vector<8x32xbf16>
    %152 = arith.truncf %149 : vector<8x32xf32> to vector<8x32xbf16>
    %153 = vector.extract_strided_slice %150 {offsets = [0, 0], sizes = [8, 8], strides = [1, 1]} : vector<8x32xbf16> to vector<8x8xbf16>
    %154 = vector.extract_strided_slice %151 {offsets = [0, 0], sizes = [8, 8], strides = [1, 1]} : vector<8x32xbf16> to vector<8x8xbf16>
    %cst_74 = arith.constant dense<0.000000e+00> : vector<8x8xf32>
    %155 = tpu.matmul %153, %154, %cst_74 {dimension_numbers = #tpu.dot_dimension_numbers<[1], [1], [0], [0], [0, 0, 1, 0], [], []>} : vector<8x8xbf16>, vector<8x8xbf16>, vector<8x8xf32> -> vector<8x8xf32>
    %156 = vector.extract_strided_slice %150 {offsets = [0, 8], sizes = [8, 8], strides = [1, 1]} : vector<8x32xbf16> to vector<8x8xbf16>
    %157 = vector.extract_strided_slice %151 {offsets = [0, 8], sizes = [8, 8], strides = [1, 1]} : vector<8x32xbf16> to vector<8x8xbf16>
    %cst_75 = arith.constant dense<0.000000e+00> : vector<8x8xf32>
    %158 = tpu.matmul %156, %157, %cst_75 {dimension_numbers = #tpu.dot_dimension_numbers<[1], [1], [0], [0], [0, 0, 1, 0], [], []>} : vector<8x8xbf16>, vector<8x8xbf16>, vector<8x8xf32> -> vector<8x8xf32>
    %159 = vector.extract_strided_slice %150 {offsets = [0, 16], sizes = [8, 8], strides = [1, 1]} : vector<8x32xbf16> to vector<8x8xbf16>
    %160 = vector.extract_strided_slice %151 {offsets = [0, 16], sizes = [8, 8], strides = [1, 1]} : vector<8x32xbf16> to vector<8x8xbf16>
    %cst_76 = arith.constant dense<0.000000e+00> : vector<8x8xf32>
    %161 = tpu.matmul %159, %160, %cst_76 {dimension_numbers = #tpu.dot_dimension_numbers<[1], [1], [0], [0], [0, 0, 1, 0], [], []>} : vector<8x8xbf16>, vector<8x8xbf16>, vector<8x8xf32> -> vector<8x8xf32>
    %162 = vector.extract_strided_slice %150 {offsets = [0, 24], sizes = [8, 8], strides = [1, 1]} : vector<8x32xbf16> to vector<8x8xbf16>
    %163 = vector.extract_strided_slice %151 {offsets = [0, 24], sizes = [8, 8], strides = [1, 1]} : vector<8x32xbf16> to vector<8x8xbf16>
    %cst_77 = arith.constant dense<0.000000e+00> : vector<8x8xf32>
    %164 = tpu.matmul %162, %163, %cst_77 {dimension_numbers = #tpu.dot_dimension_numbers<[1], [1], [0], [0], [0, 0, 1, 0], [], []>} : vector<8x8xbf16>, vector<8x8xbf16>, vector<8x8xf32> -> vector<8x8xf32>
    %165 = vector.shape_cast %155 : vector<8x8xf32> to vector<1x8x8xf32>
    %166 = vector.shape_cast %158 : vector<8x8xf32> to vector<1x8x8xf32>
    %167 = vector.shape_cast %161 : vector<8x8xf32> to vector<1x8x8xf32>
    %168 = vector.shape_cast %164 : vector<8x8xf32> to vector<1x8x8xf32>
    %169 = tpu.concatenate %165, %166, %167, %168 in 0 : vector<1x8x8xf32>, vector<1x8x8xf32>, vector<1x8x8xf32>, vector<1x8x8xf32> -> vector<4x8x8xf32>
    %cst_78 = arith.constant dense<0xFF800000> : vector<4x8xf32>
    %170 = vector.multi_reduction <maximumf>, %169, %cst_78 [2] : vector<4x8x8xf32> to vector<4x8xf32>
    %171 = vector.shape_cast %170 : vector<4x8xf32> to vector<4x8x1xf32>
    %172 = vector.broadcast %171 : vector<4x8x1xf32> to vector<4x8x8xf32>
    %173 = arith.subf %169, %172 : vector<4x8x8xf32>
    %174 = math.exp %173 : vector<4x8x8xf32>
    %cst_79 = arith.constant dense<0.000000e+00> : vector<4x8xf32>
    %175 = vector.multi_reduction <add>, %174, %cst_79 [2] : vector<4x8x8xf32> to vector<4x8xf32>
    %176 = vector.shape_cast %175 : vector<4x8xf32> to vector<4x8x1xf32>
    %177 = vector.broadcast %176 : vector<4x8x1xf32> to vector<4x8x8xf32>
    %178 = arith.divf %174, %177 : vector<4x8x8xf32>
    %179 = arith.truncf %178 : vector<4x8x8xf32> to vector<4x8x8xbf16>
    %180 = vector.extract_strided_slice %179 {offsets = [0, 0, 0], sizes = [1, 8, 8], strides = [1, 1, 1]} : vector<4x8x8xbf16> to vector<1x8x8xbf16>
    %181 = vector.shape_cast %180 : vector<1x8x8xbf16> to vector<8x8xbf16>
    %182 = vector.extract_strided_slice %152 {offsets = [0, 0], sizes = [8, 8], strides = [1, 1]} : vector<8x32xbf16> to vector<8x8xbf16>
    %cst_80 = arith.constant dense<0.000000e+00> : vector<8x8xf32>
    %183 = tpu.matmul %181, %182, %cst_80 {dimension_numbers = #tpu.dot_dimension_numbers<[1], [0], [0], [1], [0, 0, 1, 1], [], []>} : vector<8x8xbf16>, vector<8x8xbf16>, vector<8x8xf32> -> vector<8x8xf32>
    %184 = arith.truncf %183 : vector<8x8xf32> to vector<8x8xbf16>
    %185 = vector.extract_strided_slice %136 {offsets = [0, 0, 0], sizes = [1, 8, 32], strides = [1, 1, 1]} : vector<4x8x32xbf16> to vector<1x8x32xbf16>
    %186 = vector.shape_cast %185 : vector<1x8x32xbf16> to vector<8x32xbf16>
    %cst_81 = arith.constant dense<0.000000e+00> : vector<8x32xf32>
    %187 = tpu.matmul %184, %186, %cst_81 {dimension_numbers = #tpu.dot_dimension_numbers<[1], [0], [0], [1], [0, 0, 1, 1], [], []>} : vector<8x8xbf16>, vector<8x32xbf16>, vector<8x32xf32> -> vector<8x32xf32>
    %188 = vector.broadcast %138 : vector<1x32xf32> to vector<8x32xf32>
    %189 = arith.addf %188, %187 : vector<8x32xf32>
    %190 = vector.extract_strided_slice %179 {offsets = [1, 0, 0], sizes = [1, 8, 8], strides = [1, 1, 1]} : vector<4x8x8xbf16> to vector<1x8x8xbf16>
    %191 = vector.shape_cast %190 : vector<1x8x8xbf16> to vector<8x8xbf16>
    %192 = vector.extract_strided_slice %152 {offsets = [0, 8], sizes = [8, 8], strides = [1, 1]} : vector<8x32xbf16> to vector<8x8xbf16>
    %cst_82 = arith.constant dense<0.000000e+00> : vector<8x8xf32>
    %193 = tpu.matmul %191, %192, %cst_82 {dimension_numbers = #tpu.dot_dimension_numbers<[1], [0], [0], [1], [0, 0, 1, 1], [], []>} : vector<8x8xbf16>, vector<8x8xbf16>, vector<8x8xf32> -> vector<8x8xf32>
    %194 = arith.truncf %193 : vector<8x8xf32> to vector<8x8xbf16>
    %195 = vector.extract_strided_slice %136 {offsets = [1, 0, 0], sizes = [1, 8, 32], strides = [1, 1, 1]} : vector<4x8x32xbf16> to vector<1x8x32xbf16>
    %196 = vector.shape_cast %195 : vector<1x8x32xbf16> to vector<8x32xbf16>
    %cst_83 = arith.constant dense<0.000000e+00> : vector<8x32xf32>
    %197 = tpu.matmul %194, %196, %cst_83 {dimension_numbers = #tpu.dot_dimension_numbers<[1], [0], [0], [1], [0, 0, 1, 1], [], []>} : vector<8x8xbf16>, vector<8x32xbf16>, vector<8x32xf32> -> vector<8x32xf32>
    %198 = arith.addf %189, %197 : vector<8x32xf32>
    %199 = vector.extract_strided_slice %179 {offsets = [2, 0, 0], sizes = [1, 8, 8], strides = [1, 1, 1]} : vector<4x8x8xbf16> to vector<1x8x8xbf16>
    %200 = vector.shape_cast %199 : vector<1x8x8xbf16> to vector<8x8xbf16>
    %201 = vector.extract_strided_slice %152 {offsets = [0, 16], sizes = [8, 8], strides = [1, 1]} : vector<8x32xbf16> to vector<8x8xbf16>
    %cst_84 = arith.constant dense<0.000000e+00> : vector<8x8xf32>
    %202 = tpu.matmul %200, %201, %cst_84 {dimension_numbers = #tpu.dot_dimension_numbers<[1], [0], [0], [1], [0, 0, 1, 1], [], []>} : vector<8x8xbf16>, vector<8x8xbf16>, vector<8x8xf32> -> vector<8x8xf32>
    %203 = arith.truncf %202 : vector<8x8xf32> to vector<8x8xbf16>
    %204 = vector.extract_strided_slice %136 {offsets = [2, 0, 0], sizes = [1, 8, 32], strides = [1, 1, 1]} : vector<4x8x32xbf16> to vector<1x8x32xbf16>
    %205 = vector.shape_cast %204 : vector<1x8x32xbf16> to vector<8x32xbf16>
    %cst_85 = arith.constant dense<0.000000e+00> : vector<8x32xf32>
    %206 = tpu.matmul %203, %205, %cst_85 {dimension_numbers = #tpu.dot_dimension_numbers<[1], [0], [0], [1], [0, 0, 1, 1], [], []>} : vector<8x8xbf16>, vector<8x32xbf16>, vector<8x32xf32> -> vector<8x32xf32>
    %207 = arith.addf %198, %206 : vector<8x32xf32>
    %208 = vector.extract_strided_slice %179 {offsets = [3, 0, 0], sizes = [1, 8, 8], strides = [1, 1, 1]} : vector<4x8x8xbf16> to vector<1x8x8xbf16>
    %209 = vector.shape_cast %208 : vector<1x8x8xbf16> to vector<8x8xbf16>
    %210 = vector.extract_strided_slice %152 {offsets = [0, 24], sizes = [8, 8], strides = [1, 1]} : vector<8x32xbf16> to vector<8x8xbf16>
    %cst_86 = arith.constant dense<0.000000e+00> : vector<8x8xf32>
    %211 = tpu.matmul %209, %210, %cst_86 {dimension_numbers = #tpu.dot_dimension_numbers<[1], [0], [0], [1], [0, 0, 1, 1], [], []>} : vector<8x8xbf16>, vector<8x8xbf16>, vector<8x8xf32> -> vector<8x8xf32>
    %212 = arith.truncf %211 : vector<8x8xf32> to vector<8x8xbf16>
    %213 = vector.extract_strided_slice %136 {offsets = [3, 0, 0], sizes = [1, 8, 32], strides = [1, 1, 1]} : vector<4x8x32xbf16> to vector<1x8x32xbf16>
    %214 = vector.shape_cast %213 : vector<1x8x32xbf16> to vector<8x32xbf16>
    %cst_87 = arith.constant dense<0.000000e+00> : vector<8x32xf32>
    %215 = tpu.matmul %212, %214, %cst_87 {dimension_numbers = #tpu.dot_dimension_numbers<[1], [0], [0], [1], [0, 0, 1, 1], [], []>} : vector<8x8xbf16>, vector<8x32xbf16>, vector<8x32xf32> -> vector<8x32xf32>
    %216 = arith.addf %207, %215 : vector<8x32xf32>
    %217 = arith.addf %216, %130 : vector<8x32xf32>
    %cst_88 = arith.constant dense<0.000000e+00> : vector<8xf32>
    %218 = vector.multi_reduction <add>, %217, %cst_88 [1] : vector<8x32xf32> to vector<8xf32>
    %219 = vector.shape_cast %218 : vector<8xf32> to vector<8x1xf32>
    %cst_89 = arith.constant 3.200000e+01 : f32
    %220 = vector.broadcast %cst_89 : f32 to vector<8x1xf32>
    %221 = arith.divf %219, %220 : vector<8x1xf32>
    %222 = vector.broadcast %221 : vector<8x1xf32> to vector<8x32xf32>
    %223 = arith.subf %217, %222 : vector<8x32xf32>
    %224 = arith.mulf %223, %223 : vector<8x32xf32>
    %cst_90 = arith.constant dense<0.000000e+00> : vector<8xf32>
    %225 = vector.multi_reduction <add>, %224, %cst_90 [1] : vector<8x32xf32> to vector<8xf32>
    %226 = vector.shape_cast %225 : vector<8xf32> to vector<8x1xf32>
    %cst_91 = arith.constant 3.200000e+01 : f32
    %227 = vector.broadcast %cst_91 : f32 to vector<8x1xf32>
    %228 = arith.divf %226, %227 : vector<8x1xf32>
    %229 = vector.broadcast %221 : vector<8x1xf32> to vector<8x32xf32>
    %230 = arith.subf %217, %229 : vector<8x32xf32>
    %cst_92 = arith.constant 9.99999974E-6 : f32
    %231 = vector.broadcast %cst_92 : f32 to vector<8x1xf32>
    %232 = arith.addf %228, %231 : vector<8x1xf32>
    %233 = math.rsqrt %232 : vector<8x1xf32>
    %234 = vector.broadcast %233 : vector<8x1xf32> to vector<8x32xf32>
    %235 = arith.mulf %230, %234 : vector<8x32xf32>
    %236 = vector.broadcast %140 : vector<1x32xf32> to vector<8x32xf32>
    %237 = arith.mulf %235, %236 : vector<8x32xf32>
    %238 = vector.broadcast %142 : vector<1x32xf32> to vector<8x32xf32>
    %239 = arith.addf %237, %238 : vector<8x32xf32>
    %c1_93 = arith.constant 1 : index
    %c0_94 = arith.constant 0 : index
    %c0_95 = arith.constant 0 : index
    %240 = vector.load %arg9[%c1_93, %c0_94, %c0_95] : memref<2x32x32xbf16, #tpu.memory_space<vmem>>, vector<1x32x32xbf16>
    %241 = vector.shape_cast %240 : vector<1x32x32xbf16> to vector<32x32xbf16>
    %c1_96 = arith.constant 1 : index
    %c0_97 = arith.constant 0 : index
    %c0_98 = arith.constant 0 : index
    %242 = vector.load %arg3[%c1_96, %c0_97, %c0_98] : memref<2x1x32xf32, #tpu.memory_space<vmem>>, vector<1x1x32xf32>
    %243 = vector.shape_cast %242 : vector<1x1x32xf32> to vector<1x32xf32>
    %c1_99 = arith.constant 1 : index
    %c0_100 = arith.constant 0 : index
    %c0_101 = arith.constant 0 : index
    %244 = vector.load %arg10[%c1_99, %c0_100, %c0_101] : memref<2x32x32xbf16, #tpu.memory_space<vmem>>, vector<1x32x32xbf16>
    %245 = vector.shape_cast %244 : vector<1x32x32xbf16> to vector<32x32xbf16>
    %c1_102 = arith.constant 1 : index
    %c0_103 = arith.constant 0 : index
    %c0_104 = arith.constant 0 : index
    %246 = vector.load %arg4[%c1_102, %c0_103, %c0_104] : memref<2x1x32xf32, #tpu.memory_space<vmem>>, vector<1x1x32xf32>
    %247 = vector.shape_cast %246 : vector<1x1x32xf32> to vector<1x32xf32>
    %248 = arith.truncf %239 : vector<8x32xf32> to vector<8x32xbf16>
    %cst_105 = arith.constant dense<0.000000e+00> : vector<8x32xf32>
    %249 = tpu.matmul %248, %241, %cst_105 {dimension_numbers = #tpu.dot_dimension_numbers<[1], [0], [0], [1], [0, 0, 1, 1], [], []>} : vector<8x32xbf16>, vector<32x32xbf16>, vector<8x32xf32> -> vector<8x32xf32>
    %250 = vector.broadcast %243 : vector<1x32xf32> to vector<8x32xf32>
    %251 = arith.addf %249, %250 : vector<8x32xf32>
    %cst_106 = arith.constant 0.000000e+00 : f32
    %252 = vector.broadcast %cst_106 : f32 to vector<8x32xf32>
    %253 = arith.maximumf %251, %252 : vector<8x32xf32>
    %254 = arith.truncf %253 : vector<8x32xf32> to vector<8x32xbf16>
    %cst_107 = arith.constant dense<0.000000e+00> : vector<8x32xf32>
    %255 = tpu.matmul %254, %245, %cst_107 {dimension_numbers = #tpu.dot_dimension_numbers<[1], [0], [0], [1], [0, 0, 1, 1], [], []>} : vector<8x32xbf16>, vector<32x32xbf16>, vector<8x32xf32> -> vector<8x32xf32>
    %256 = vector.broadcast %247 : vector<1x32xf32> to vector<8x32xf32>
    %257 = arith.addf %255, %256 : vector<8x32xf32>
    %258 = arith.addf %257, %239 : vector<8x32xf32>
    %259 = arith.truncf %258 : vector<8x32xf32> to vector<8x32xbf16>
    %c0_108 = arith.constant 0 : index
    %c0_109 = arith.constant 0 : index
    %c0_110 = arith.constant 0 : index
    %260 = vector.load %arg2[%c0_108, %c0_109, %c0_110] : memref<1x8x32xbf16, #tpu.memory_space<vmem>>, vector<1x8x32xbf16>
    %261 = vector.shape_cast %260 : vector<1x8x32xbf16> to vector<8x32xbf16>
    %262 = arith.extf %261 : vector<8x32xbf16> to vector<8x32xf32>
    %c0_111 = arith.constant 0 : index
    %c0_112 = arith.constant 0 : index
    %c0_113 = arith.constant 0 : index
    %263 = vector.load %arg38[%c0_111, %c0_112, %c0_113] : memref<1x32x96xbf16, #tpu.memory_space<vmem>>, vector<1x32x96xbf16>
    %264 = vector.shape_cast %263 : vector<1x32x96xbf16> to vector<32x96xbf16>
    %c0_114 = arith.constant 0 : index
    %c0_115 = arith.constant 0 : index
    %c0_116 = arith.constant 0 : index
    %265 = vector.load %arg29[%c0_114, %c0_115, %c0_116] : memref<1x1x96xf32, #tpu.memory_space<vmem>>, vector<1x1x96xf32>
    %266 = vector.shape_cast %265 : vector<1x1x96xf32> to vector<1x96xf32>
    %c0_117 = arith.constant 0 : index
    %c0_118 = arith.constant 0 : index
    %c0_119 = arith.constant 0 : index
    %c0_120 = arith.constant 0 : index
    %267 = vector.load %arg35[%c0_117, %c0_118, %c0_119, %c0_120] : memref<1x4x8x32xbf16, #tpu.memory_space<vmem>>, vector<1x4x8x32xbf16>
    %268 = vector.shape_cast %267 : vector<1x4x8x32xbf16> to vector<4x8x32xbf16>
    %c0_121 = arith.constant 0 : index
    %c0_122 = arith.constant 0 : index
    %c0_123 = arith.constant 0 : index
    %269 = vector.load %arg26[%c0_121, %c0_122, %c0_123] : memref<1x1x32xf32, #tpu.memory_space<vmem>>, vector<1x1x32xf32>
    %270 = vector.shape_cast %269 : vector<1x1x32xf32> to vector<1x32xf32>
    %c0_124 = arith.constant 0 : index
    %c0_125 = arith.constant 0 : index
    %c0_126 = arith.constant 0 : index
    %271 = vector.load %arg31[%c0_124, %c0_125, %c0_126] : memref<1x1x32xf32, #tpu.memory_space<vmem>>, vector<1x1x32xf32>
    %272 = vector.shape_cast %271 : vector<1x1x32xf32> to vector<1x32xf32>
    %c0_127 = arith.constant 0 : index
    %c0_128 = arith.constant 0 : index
    %c0_129 = arith.constant 0 : index
    %273 = vector.load %arg30[%c0_127, %c0_128, %c0_129] : memref<1x1x32xf32, #tpu.memory_space<vmem>>, vector<1x1x32xf32>
    %274 = vector.shape_cast %273 : vector<1x1x32xf32> to vector<1x32xf32>
    %275 = arith.truncf %262 : vector<8x32xf32> to vector<8x32xbf16>
    %cst_130 = arith.constant dense<0.000000e+00> : vector<8x96xf32>
    %276 = tpu.matmul %275, %264, %cst_130 {dimension_numbers = #tpu.dot_dimension_numbers<[1], [0], [0], [1], [0, 0, 1, 1], [], []>} : vector<8x32xbf16>, vector<32x96xbf16>, vector<8x96xf32> -> vector<8x96xf32>
    %277 = vector.broadcast %266 : vector<1x96xf32> to vector<8x96xf32>
    %278 = arith.addf %276, %277 : vector<8x96xf32>
    %279 = vector.extract_strided_slice %278 {offsets = [0, 0], sizes = [8, 32], strides = [1, 1]} : vector<8x96xf32> to vector<8x32xf32>
    %280 = vector.extract_strided_slice %278 {offsets = [0, 32], sizes = [8, 32], strides = [1, 1]} : vector<8x96xf32> to vector<8x32xf32>
    %281 = vector.extract_strided_slice %278 {offsets = [0, 64], sizes = [8, 32], strides = [1, 1]} : vector<8x96xf32> to vector<8x32xf32>
    %282 = arith.truncf %279 : vector<8x32xf32> to vector<8x32xbf16>
    %283 = arith.truncf %280 : vector<8x32xf32> to vector<8x32xbf16>
    %284 = arith.truncf %281 : vector<8x32xf32> to vector<8x32xbf16>
    %285 = vector.extract_strided_slice %282 {offsets = [0, 0], sizes = [8, 8], strides = [1, 1]} : vector<8x32xbf16> to vector<8x8xbf16>
    %286 = vector.extract_strided_slice %283 {offsets = [0, 0], sizes = [8, 8], strides = [1, 1]} : vector<8x32xbf16> to vector<8x8xbf16>
    %cst_131 = arith.constant dense<0.000000e+00> : vector<8x8xf32>
    %287 = tpu.matmul %285, %286, %cst_131 {dimension_numbers = #tpu.dot_dimension_numbers<[1], [1], [0], [0], [0, 0, 1, 0], [], []>} : vector<8x8xbf16>, vector<8x8xbf16>, vector<8x8xf32> -> vector<8x8xf32>
    %288 = vector.extract_strided_slice %282 {offsets = [0, 8], sizes = [8, 8], strides = [1, 1]} : vector<8x32xbf16> to vector<8x8xbf16>
    %289 = vector.extract_strided_slice %283 {offsets = [0, 8], sizes = [8, 8], strides = [1, 1]} : vector<8x32xbf16> to vector<8x8xbf16>
    %cst_132 = arith.constant dense<0.000000e+00> : vector<8x8xf32>
    %290 = tpu.matmul %288, %289, %cst_132 {dimension_numbers = #tpu.dot_dimension_numbers<[1], [1], [0], [0], [0, 0, 1, 0], [], []>} : vector<8x8xbf16>, vector<8x8xbf16>, vector<8x8xf32> -> vector<8x8xf32>
    %291 = vector.extract_strided_slice %282 {offsets = [0, 16], sizes = [8, 8], strides = [1, 1]} : vector<8x32xbf16> to vector<8x8xbf16>
    %292 = vector.extract_strided_slice %283 {offsets = [0, 16], sizes = [8, 8], strides = [1, 1]} : vector<8x32xbf16> to vector<8x8xbf16>
    %cst_133 = arith.constant dense<0.000000e+00> : vector<8x8xf32>
    %293 = tpu.matmul %291, %292, %cst_133 {dimension_numbers = #tpu.dot_dimension_numbers<[1], [1], [0], [0], [0, 0, 1, 0], [], []>} : vector<8x8xbf16>, vector<8x8xbf16>, vector<8x8xf32> -> vector<8x8xf32>
    %294 = vector.extract_strided_slice %282 {offsets = [0, 24], sizes = [8, 8], strides = [1, 1]} : vector<8x32xbf16> to vector<8x8xbf16>
    %295 = vector.extract_strided_slice %283 {offsets = [0, 24], sizes = [8, 8], strides = [1, 1]} : vector<8x32xbf16> to vector<8x8xbf16>
    %cst_134 = arith.constant dense<0.000000e+00> : vector<8x8xf32>
    %296 = tpu.matmul %294, %295, %cst_134 {dimension_numbers = #tpu.dot_dimension_numbers<[1], [1], [0], [0], [0, 0, 1, 0], [], []>} : vector<8x8xbf16>, vector<8x8xbf16>, vector<8x8xf32> -> vector<8x8xf32>
    %297 = vector.shape_cast %287 : vector<8x8xf32> to vector<1x8x8xf32>
    %298 = vector.shape_cast %290 : vector<8x8xf32> to vector<1x8x8xf32>
    %299 = vector.shape_cast %293 : vector<8x8xf32> to vector<1x8x8xf32>
    %300 = vector.shape_cast %296 : vector<8x8xf32> to vector<1x8x8xf32>
    %301 = tpu.concatenate %297, %298, %299, %300 in 0 : vector<1x8x8xf32>, vector<1x8x8xf32>, vector<1x8x8xf32>, vector<1x8x8xf32> -> vector<4x8x8xf32>
    %cst_135 = arith.constant dense<0xFF800000> : vector<4x8xf32>
    %302 = vector.multi_reduction <maximumf>, %301, %cst_135 [2] : vector<4x8x8xf32> to vector<4x8xf32>
    %303 = vector.shape_cast %302 : vector<4x8xf32> to vector<4x8x1xf32>
    %304 = vector.broadcast %303 : vector<4x8x1xf32> to vector<4x8x8xf32>
    %305 = arith.subf %301, %304 : vector<4x8x8xf32>
    %306 = math.exp %305 : vector<4x8x8xf32>
    %cst_136 = arith.constant dense<0.000000e+00> : vector<4x8xf32>
    %307 = vector.multi_reduction <add>, %306, %cst_136 [2] : vector<4x8x8xf32> to vector<4x8xf32>
    %308 = vector.shape_cast %307 : vector<4x8xf32> to vector<4x8x1xf32>
    %309 = vector.broadcast %308 : vector<4x8x1xf32> to vector<4x8x8xf32>
    %310 = arith.divf %306, %309 : vector<4x8x8xf32>
    %311 = arith.truncf %310 : vector<4x8x8xf32> to vector<4x8x8xbf16>
    %312 = vector.extract_strided_slice %311 {offsets = [0, 0, 0], sizes = [1, 8, 8], strides = [1, 1, 1]} : vector<4x8x8xbf16> to vector<1x8x8xbf16>
    %313 = vector.shape_cast %312 : vector<1x8x8xbf16> to vector<8x8xbf16>
    %314 = vector.extract_strided_slice %284 {offsets = [0, 0], sizes = [8, 8], strides = [1, 1]} : vector<8x32xbf16> to vector<8x8xbf16>
    %cst_137 = arith.constant dense<0.000000e+00> : vector<8x8xf32>
    %315 = tpu.matmul %313, %314, %cst_137 {dimension_numbers = #tpu.dot_dimension_numbers<[1], [0], [0], [1], [0, 0, 1, 1], [], []>} : vector<8x8xbf16>, vector<8x8xbf16>, vector<8x8xf32> -> vector<8x8xf32>
    %316 = arith.truncf %315 : vector<8x8xf32> to vector<8x8xbf16>
    %317 = vector.extract_strided_slice %268 {offsets = [0, 0, 0], sizes = [1, 8, 32], strides = [1, 1, 1]} : vector<4x8x32xbf16> to vector<1x8x32xbf16>
    %318 = vector.shape_cast %317 : vector<1x8x32xbf16> to vector<8x32xbf16>
    %cst_138 = arith.constant dense<0.000000e+00> : vector<8x32xf32>
    %319 = tpu.matmul %316, %318, %cst_138 {dimension_numbers = #tpu.dot_dimension_numbers<[1], [0], [0], [1], [0, 0, 1, 1], [], []>} : vector<8x8xbf16>, vector<8x32xbf16>, vector<8x32xf32> -> vector<8x32xf32>
    %320 = vector.broadcast %270 : vector<1x32xf32> to vector<8x32xf32>
    %321 = arith.addf %320, %319 : vector<8x32xf32>
    %322 = vector.extract_strided_slice %311 {offsets = [1, 0, 0], sizes = [1, 8, 8], strides = [1, 1, 1]} : vector<4x8x8xbf16> to vector<1x8x8xbf16>
    %323 = vector.shape_cast %322 : vector<1x8x8xbf16> to vector<8x8xbf16>
    %324 = vector.extract_strided_slice %284 {offsets = [0, 8], sizes = [8, 8], strides = [1, 1]} : vector<8x32xbf16> to vector<8x8xbf16>
    %cst_139 = arith.constant dense<0.000000e+00> : vector<8x8xf32>
    %325 = tpu.matmul %323, %324, %cst_139 {dimension_numbers = #tpu.dot_dimension_numbers<[1], [0], [0], [1], [0, 0, 1, 1], [], []>} : vector<8x8xbf16>, vector<8x8xbf16>, vector<8x8xf32> -> vector<8x8xf32>
    %326 = arith.truncf %325 : vector<8x8xf32> to vector<8x8xbf16>
    %327 = vector.extract_strided_slice %268 {offsets = [1, 0, 0], sizes = [1, 8, 32], strides = [1, 1, 1]} : vector<4x8x32xbf16> to vector<1x8x32xbf16>
    %328 = vector.shape_cast %327 : vector<1x8x32xbf16> to vector<8x32xbf16>
    %cst_140 = arith.constant dense<0.000000e+00> : vector<8x32xf32>
    %329 = tpu.matmul %326, %328, %cst_140 {dimension_numbers = #tpu.dot_dimension_numbers<[1], [0], [0], [1], [0, 0, 1, 1], [], []>} : vector<8x8xbf16>, vector<8x32xbf16>, vector<8x32xf32> -> vector<8x32xf32>
    %330 = arith.addf %321, %329 : vector<8x32xf32>
    %331 = vector.extract_strided_slice %311 {offsets = [2, 0, 0], sizes = [1, 8, 8], strides = [1, 1, 1]} : vector<4x8x8xbf16> to vector<1x8x8xbf16>
    %332 = vector.shape_cast %331 : vector<1x8x8xbf16> to vector<8x8xbf16>
    %333 = vector.extract_strided_slice %284 {offsets = [0, 16], sizes = [8, 8], strides = [1, 1]} : vector<8x32xbf16> to vector<8x8xbf16>
    %cst_141 = arith.constant dense<0.000000e+00> : vector<8x8xf32>
    %334 = tpu.matmul %332, %333, %cst_141 {dimension_numbers = #tpu.dot_dimension_numbers<[1], [0], [0], [1], [0, 0, 1, 1], [], []>} : vector<8x8xbf16>, vector<8x8xbf16>, vector<8x8xf32> -> vector<8x8xf32>
    %335 = arith.truncf %334 : vector<8x8xf32> to vector<8x8xbf16>
    %336 = vector.extract_strided_slice %268 {offsets = [2, 0, 0], sizes = [1, 8, 32], strides = [1, 1, 1]} : vector<4x8x32xbf16> to vector<1x8x32xbf16>
    %337 = vector.shape_cast %336 : vector<1x8x32xbf16> to vector<8x32xbf16>
    %cst_142 = arith.constant dense<0.000000e+00> : vector<8x32xf32>
    %338 = tpu.matmul %335, %337, %cst_142 {dimension_numbers = #tpu.dot_dimension_numbers<[1], [0], [0], [1], [0, 0, 1, 1], [], []>} : vector<8x8xbf16>, vector<8x32xbf16>, vector<8x32xf32> -> vector<8x32xf32>
    %339 = arith.addf %330, %338 : vector<8x32xf32>
    %340 = vector.extract_strided_slice %311 {offsets = [3, 0, 0], sizes = [1, 8, 8], strides = [1, 1, 1]} : vector<4x8x8xbf16> to vector<1x8x8xbf16>
    %341 = vector.shape_cast %340 : vector<1x8x8xbf16> to vector<8x8xbf16>
    %342 = vector.extract_strided_slice %284 {offsets = [0, 24], sizes = [8, 8], strides = [1, 1]} : vector<8x32xbf16> to vector<8x8xbf16>
    %cst_143 = arith.constant dense<0.000000e+00> : vector<8x8xf32>
    %343 = tpu.matmul %341, %342, %cst_143 {dimension_numbers = #tpu.dot_dimension_numbers<[1], [0], [0], [1], [0, 0, 1, 1], [], []>} : vector<8x8xbf16>, vector<8x8xbf16>, vector<8x8xf32> -> vector<8x8xf32>
    %344 = arith.truncf %343 : vector<8x8xf32> to vector<8x8xbf16>
    %345 = vector.extract_strided_slice %268 {offsets = [3, 0, 0], sizes = [1, 8, 32], strides = [1, 1, 1]} : vector<4x8x32xbf16> to vector<1x8x32xbf16>
    %346 = vector.shape_cast %345 : vector<1x8x32xbf16> to vector<8x32xbf16>
    %cst_144 = arith.constant dense<0.000000e+00> : vector<8x32xf32>
    %347 = tpu.matmul %344, %346, %cst_144 {dimension_numbers = #tpu.dot_dimension_numbers<[1], [0], [0], [1], [0, 0, 1, 1], [], []>} : vector<8x8xbf16>, vector<8x32xbf16>, vector<8x32xf32> -> vector<8x32xf32>
    %348 = arith.addf %339, %347 : vector<8x32xf32>
    %349 = arith.addf %348, %262 : vector<8x32xf32>
    %cst_145 = arith.constant dense<0.000000e+00> : vector<8xf32>
    %350 = vector.multi_reduction <add>, %349, %cst_145 [1] : vector<8x32xf32> to vector<8xf32>
    %351 = vector.shape_cast %350 : vector<8xf32> to vector<8x1xf32>
    %cst_146 = arith.constant 3.200000e+01 : f32
    %352 = vector.broadcast %cst_146 : f32 to vector<8x1xf32>
    %353 = arith.divf %351, %352 : vector<8x1xf32>
    %354 = vector.broadcast %353 : vector<8x1xf32> to vector<8x32xf32>
    %355 = arith.subf %349, %354 : vector<8x32xf32>
    %356 = arith.mulf %355, %355 : vector<8x32xf32>
    %cst_147 = arith.constant dense<0.000000e+00> : vector<8xf32>
    %357 = vector.multi_reduction <add>, %356, %cst_147 [1] : vector<8x32xf32> to vector<8xf32>
    %358 = vector.shape_cast %357 : vector<8xf32> to vector<8x1xf32>
    %cst_148 = arith.constant 3.200000e+01 : f32
    %359 = vector.broadcast %cst_148 : f32 to vector<8x1xf32>
    %360 = arith.divf %358, %359 : vector<8x1xf32>
    %361 = vector.broadcast %353 : vector<8x1xf32> to vector<8x32xf32>
    %362 = arith.subf %349, %361 : vector<8x32xf32>
    %cst_149 = arith.constant 9.99999974E-6 : f32
    %363 = vector.broadcast %cst_149 : f32 to vector<8x1xf32>
    %364 = arith.addf %360, %363 : vector<8x1xf32>
    %365 = math.rsqrt %364 : vector<8x1xf32>
    %366 = vector.broadcast %365 : vector<8x1xf32> to vector<8x32xf32>
    %367 = arith.mulf %362, %366 : vector<8x32xf32>
    %368 = vector.broadcast %272 : vector<1x32xf32> to vector<8x32xf32>
    %369 = arith.mulf %367, %368 : vector<8x32xf32>
    %370 = vector.broadcast %274 : vector<1x32xf32> to vector<8x32xf32>
    %371 = arith.addf %369, %370 : vector<8x32xf32>
    %c0_150 = arith.constant 0 : index
    %c0_151 = arith.constant 0 : index
    %c0_152 = arith.constant 0 : index
    %372 = vector.load %arg37[%c0_150, %c0_151, %c0_152] : memref<1x32x32xbf16, #tpu.memory_space<vmem>>, vector<1x32x32xbf16>
    %373 = vector.shape_cast %372 : vector<1x32x32xbf16> to vector<32x32xbf16>
    %c0_153 = arith.constant 0 : index
    %c0_154 = arith.constant 0 : index
    %c0_155 = arith.constant 0 : index
    %374 = vector.load %arg28[%c0_153, %c0_154, %c0_155] : memref<1x1x32xf32, #tpu.memory_space<vmem>>, vector<1x1x32xf32>
    %375 = vector.shape_cast %374 : vector<1x1x32xf32> to vector<1x32xf32>
    %c0_156 = arith.constant 0 : index
    %c0_157 = arith.constant 0 : index
    %c0_158 = arith.constant 0 : index
    %376 = vector.load %arg34[%c0_156, %c0_157, %c0_158] : memref<1x32x64xbf16, #tpu.memory_space<vmem>>, vector<1x32x64xbf16>
    %377 = vector.shape_cast %376 : vector<1x32x64xbf16> to vector<32x64xbf16>
    %c0_159 = arith.constant 0 : index
    %c0_160 = arith.constant 0 : index
    %c0_161 = arith.constant 0 : index
    %378 = vector.load %arg25[%c0_159, %c0_160, %c0_161] : memref<1x1x64xf32, #tpu.memory_space<vmem>>, vector<1x1x64xf32>
    %379 = vector.shape_cast %378 : vector<1x1x64xf32> to vector<1x64xf32>
    %c0_162 = arith.constant 0 : index
    %c0_163 = arith.constant 0 : index
    %c0_164 = arith.constant 0 : index
    %c0_165 = arith.constant 0 : index
    %380 = vector.load %arg36[%c0_162, %c0_163, %c0_164, %c0_165] : memref<1x4x8x32xbf16, #tpu.memory_space<vmem>>, vector<1x4x8x32xbf16>
    %381 = vector.shape_cast %380 : vector<1x4x8x32xbf16> to vector<4x8x32xbf16>
    %c0_166 = arith.constant 0 : index
    %c0_167 = arith.constant 0 : index
    %c0_168 = arith.constant 0 : index
    %382 = vector.load %arg27[%c0_166, %c0_167, %c0_168] : memref<1x1x32xf32, #tpu.memory_space<vmem>>, vector<1x1x32xf32>
    %383 = vector.shape_cast %382 : vector<1x1x32xf32> to vector<1x32xf32>
    %384 = arith.truncf %371 : vector<8x32xf32> to vector<8x32xbf16>
    %cst_169 = arith.constant dense<0.000000e+00> : vector<8x32xf32>
    %385 = tpu.matmul %384, %373, %cst_169 {dimension_numbers = #tpu.dot_dimension_numbers<[1], [0], [0], [1], [0, 0, 1, 1], [], []>} : vector<8x32xbf16>, vector<32x32xbf16>, vector<8x32xf32> -> vector<8x32xf32>
    %386 = vector.broadcast %375 : vector<1x32xf32> to vector<8x32xf32>
    %387 = arith.addf %385, %386 : vector<8x32xf32>
    %cst_170 = arith.constant dense<0.000000e+00> : vector<8x64xf32>
    %388 = tpu.matmul %259, %377, %cst_170 {dimension_numbers = #tpu.dot_dimension_numbers<[1], [0], [0], [1], [0, 0, 1, 1], [], []>} : vector<8x32xbf16>, vector<32x64xbf16>, vector<8x64xf32> -> vector<8x64xf32>
    %389 = vector.broadcast %379 : vector<1x64xf32> to vector<8x64xf32>
    %390 = arith.addf %388, %389 : vector<8x64xf32>
    %391 = vector.extract_strided_slice %390 {offsets = [0, 0], sizes = [8, 32], strides = [1, 1]} : vector<8x64xf32> to vector<8x32xf32>
    %392 = vector.extract_strided_slice %390 {offsets = [0, 32], sizes = [8, 32], strides = [1, 1]} : vector<8x64xf32> to vector<8x32xf32>
    %393 = arith.truncf %387 : vector<8x32xf32> to vector<8x32xbf16>
    %394 = arith.truncf %391 : vector<8x32xf32> to vector<8x32xbf16>
    %395 = arith.truncf %392 : vector<8x32xf32> to vector<8x32xbf16>
    %396 = vector.extract_strided_slice %393 {offsets = [0, 0], sizes = [8, 8], strides = [1, 1]} : vector<8x32xbf16> to vector<8x8xbf16>
    %397 = vector.extract_strided_slice %394 {offsets = [0, 0], sizes = [8, 8], strides = [1, 1]} : vector<8x32xbf16> to vector<8x8xbf16>
    %cst_171 = arith.constant dense<0.000000e+00> : vector<8x8xf32>
    %398 = tpu.matmul %396, %397, %cst_171 {dimension_numbers = #tpu.dot_dimension_numbers<[1], [1], [0], [0], [0, 0, 1, 0], [], []>} : vector<8x8xbf16>, vector<8x8xbf16>, vector<8x8xf32> -> vector<8x8xf32>
    %399 = vector.extract_strided_slice %393 {offsets = [0, 8], sizes = [8, 8], strides = [1, 1]} : vector<8x32xbf16> to vector<8x8xbf16>
    %400 = vector.extract_strided_slice %394 {offsets = [0, 8], sizes = [8, 8], strides = [1, 1]} : vector<8x32xbf16> to vector<8x8xbf16>
    %cst_172 = arith.constant dense<0.000000e+00> : vector<8x8xf32>
    %401 = tpu.matmul %399, %400, %cst_172 {dimension_numbers = #tpu.dot_dimension_numbers<[1], [1], [0], [0], [0, 0, 1, 0], [], []>} : vector<8x8xbf16>, vector<8x8xbf16>, vector<8x8xf32> -> vector<8x8xf32>
    %402 = vector.extract_strided_slice %393 {offsets = [0, 16], sizes = [8, 8], strides = [1, 1]} : vector<8x32xbf16> to vector<8x8xbf16>
    %403 = vector.extract_strided_slice %394 {offsets = [0, 16], sizes = [8, 8], strides = [1, 1]} : vector<8x32xbf16> to vector<8x8xbf16>
    %cst_173 = arith.constant dense<0.000000e+00> : vector<8x8xf32>
    %404 = tpu.matmul %402, %403, %cst_173 {dimension_numbers = #tpu.dot_dimension_numbers<[1], [1], [0], [0], [0, 0, 1, 0], [], []>} : vector<8x8xbf16>, vector<8x8xbf16>, vector<8x8xf32> -> vector<8x8xf32>
    %405 = vector.extract_strided_slice %393 {offsets = [0, 24], sizes = [8, 8], strides = [1, 1]} : vector<8x32xbf16> to vector<8x8xbf16>
    %406 = vector.extract_strided_slice %394 {offsets = [0, 24], sizes = [8, 8], strides = [1, 1]} : vector<8x32xbf16> to vector<8x8xbf16>
    %cst_174 = arith.constant dense<0.000000e+00> : vector<8x8xf32>
    %407 = tpu.matmul %405, %406, %cst_174 {dimension_numbers = #tpu.dot_dimension_numbers<[1], [1], [0], [0], [0, 0, 1, 0], [], []>} : vector<8x8xbf16>, vector<8x8xbf16>, vector<8x8xf32> -> vector<8x8xf32>
    %408 = vector.shape_cast %398 : vector<8x8xf32> to vector<1x8x8xf32>
    %409 = vector.shape_cast %401 : vector<8x8xf32> to vector<1x8x8xf32>
    %410 = vector.shape_cast %404 : vector<8x8xf32> to vector<1x8x8xf32>
    %411 = vector.shape_cast %407 : vector<8x8xf32> to vector<1x8x8xf32>
    %412 = tpu.concatenate %408, %409, %410, %411 in 0 : vector<1x8x8xf32>, vector<1x8x8xf32>, vector<1x8x8xf32>, vector<1x8x8xf32> -> vector<4x8x8xf32>
    %cst_175 = arith.constant dense<0xFF800000> : vector<4x8xf32>
    %413 = vector.multi_reduction <maximumf>, %412, %cst_175 [2] : vector<4x8x8xf32> to vector<4x8xf32>
    %414 = vector.shape_cast %413 : vector<4x8xf32> to vector<4x8x1xf32>
    %415 = vector.broadcast %414 : vector<4x8x1xf32> to vector<4x8x8xf32>
    %416 = arith.subf %412, %415 : vector<4x8x8xf32>
    %417 = math.exp %416 : vector<4x8x8xf32>
    %cst_176 = arith.constant dense<0.000000e+00> : vector<4x8xf32>
    %418 = vector.multi_reduction <add>, %417, %cst_176 [2] : vector<4x8x8xf32> to vector<4x8xf32>
    %419 = vector.shape_cast %418 : vector<4x8xf32> to vector<4x8x1xf32>
    %420 = vector.broadcast %419 : vector<4x8x1xf32> to vector<4x8x8xf32>
    %421 = arith.divf %417, %420 : vector<4x8x8xf32>
    %422 = arith.truncf %421 : vector<4x8x8xf32> to vector<4x8x8xbf16>
    %423 = vector.extract_strided_slice %422 {offsets = [0, 0, 0], sizes = [1, 8, 8], strides = [1, 1, 1]} : vector<4x8x8xbf16> to vector<1x8x8xbf16>
    %424 = vector.shape_cast %423 : vector<1x8x8xbf16> to vector<8x8xbf16>
    %425 = vector.extract_strided_slice %395 {offsets = [0, 0], sizes = [8, 8], strides = [1, 1]} : vector<8x32xbf16> to vector<8x8xbf16>
    %cst_177 = arith.constant dense<0.000000e+00> : vector<8x8xf32>
    %426 = tpu.matmul %424, %425, %cst_177 {dimension_numbers = #tpu.dot_dimension_numbers<[1], [0], [0], [1], [0, 0, 1, 1], [], []>} : vector<8x8xbf16>, vector<8x8xbf16>, vector<8x8xf32> -> vector<8x8xf32>
    %427 = arith.truncf %426 : vector<8x8xf32> to vector<8x8xbf16>
    %428 = vector.extract_strided_slice %381 {offsets = [0, 0, 0], sizes = [1, 8, 32], strides = [1, 1, 1]} : vector<4x8x32xbf16> to vector<1x8x32xbf16>
    %429 = vector.shape_cast %428 : vector<1x8x32xbf16> to vector<8x32xbf16>
    %cst_178 = arith.constant dense<0.000000e+00> : vector<8x32xf32>
    %430 = tpu.matmul %427, %429, %cst_178 {dimension_numbers = #tpu.dot_dimension_numbers<[1], [0], [0], [1], [0, 0, 1, 1], [], []>} : vector<8x8xbf16>, vector<8x32xbf16>, vector<8x32xf32> -> vector<8x32xf32>
    %431 = vector.broadcast %383 : vector<1x32xf32> to vector<8x32xf32>
    %432 = arith.addf %431, %430 : vector<8x32xf32>
    %433 = vector.extract_strided_slice %422 {offsets = [1, 0, 0], sizes = [1, 8, 8], strides = [1, 1, 1]} : vector<4x8x8xbf16> to vector<1x8x8xbf16>
    %434 = vector.shape_cast %433 : vector<1x8x8xbf16> to vector<8x8xbf16>
    %435 = vector.extract_strided_slice %395 {offsets = [0, 8], sizes = [8, 8], strides = [1, 1]} : vector<8x32xbf16> to vector<8x8xbf16>
    %cst_179 = arith.constant dense<0.000000e+00> : vector<8x8xf32>
    %436 = tpu.matmul %434, %435, %cst_179 {dimension_numbers = #tpu.dot_dimension_numbers<[1], [0], [0], [1], [0, 0, 1, 1], [], []>} : vector<8x8xbf16>, vector<8x8xbf16>, vector<8x8xf32> -> vector<8x8xf32>
    %437 = arith.truncf %436 : vector<8x8xf32> to vector<8x8xbf16>
    %438 = vector.extract_strided_slice %381 {offsets = [1, 0, 0], sizes = [1, 8, 32], strides = [1, 1, 1]} : vector<4x8x32xbf16> to vector<1x8x32xbf16>
    %439 = vector.shape_cast %438 : vector<1x8x32xbf16> to vector<8x32xbf16>
    %cst_180 = arith.constant dense<0.000000e+00> : vector<8x32xf32>
    %440 = tpu.matmul %437, %439, %cst_180 {dimension_numbers = #tpu.dot_dimension_numbers<[1], [0], [0], [1], [0, 0, 1, 1], [], []>} : vector<8x8xbf16>, vector<8x32xbf16>, vector<8x32xf32> -> vector<8x32xf32>
    %441 = arith.addf %432, %440 : vector<8x32xf32>
    %442 = vector.extract_strided_slice %422 {offsets = [2, 0, 0], sizes = [1, 8, 8], strides = [1, 1, 1]} : vector<4x8x8xbf16> to vector<1x8x8xbf16>
    %443 = vector.shape_cast %442 : vector<1x8x8xbf16> to vector<8x8xbf16>
    %444 = vector.extract_strided_slice %395 {offsets = [0, 16], sizes = [8, 8], strides = [1, 1]} : vector<8x32xbf16> to vector<8x8xbf16>
    %cst_181 = arith.constant dense<0.000000e+00> : vector<8x8xf32>
    %445 = tpu.matmul %443, %444, %cst_181 {dimension_numbers = #tpu.dot_dimension_numbers<[1], [0], [0], [1], [0, 0, 1, 1], [], []>} : vector<8x8xbf16>, vector<8x8xbf16>, vector<8x8xf32> -> vector<8x8xf32>
    %446 = arith.truncf %445 : vector<8x8xf32> to vector<8x8xbf16>
    %447 = vector.extract_strided_slice %381 {offsets = [2, 0, 0], sizes = [1, 8, 32], strides = [1, 1, 1]} : vector<4x8x32xbf16> to vector<1x8x32xbf16>
    %448 = vector.shape_cast %447 : vector<1x8x32xbf16> to vector<8x32xbf16>
    %cst_182 = arith.constant dense<0.000000e+00> : vector<8x32xf32>
    %449 = tpu.matmul %446, %448, %cst_182 {dimension_numbers = #tpu.dot_dimension_numbers<[1], [0], [0], [1], [0, 0, 1, 1], [], []>} : vector<8x8xbf16>, vector<8x32xbf16>, vector<8x32xf32> -> vector<8x32xf32>
    %450 = arith.addf %441, %449 : vector<8x32xf32>
    %451 = vector.extract_strided_slice %422 {offsets = [3, 0, 0], sizes = [1, 8, 8], strides = [1, 1, 1]} : vector<4x8x8xbf16> to vector<1x8x8xbf16>
    %452 = vector.shape_cast %451 : vector<1x8x8xbf16> to vector<8x8xbf16>
    %453 = vector.extract_strided_slice %395 {offsets = [0, 24], sizes = [8, 8], strides = [1, 1]} : vector<8x32xbf16> to vector<8x8xbf16>
    %cst_183 = arith.constant dense<0.000000e+00> : vector<8x8xf32>
    %454 = tpu.matmul %452, %453, %cst_183 {dimension_numbers = #tpu.dot_dimension_numbers<[1], [0], [0], [1], [0, 0, 1, 1], [], []>} : vector<8x8xbf16>, vector<8x8xbf16>, vector<8x8xf32> -> vector<8x8xf32>
    %455 = arith.truncf %454 : vector<8x8xf32> to vector<8x8xbf16>
    %456 = vector.extract_strided_slice %381 {offsets = [3, 0, 0], sizes = [1, 8, 32], strides = [1, 1, 1]} : vector<4x8x32xbf16> to vector<1x8x32xbf16>
    %457 = vector.shape_cast %456 : vector<1x8x32xbf16> to vector<8x32xbf16>
    %cst_184 = arith.constant dense<0.000000e+00> : vector<8x32xf32>
    %458 = tpu.matmul %455, %457, %cst_184 {dimension_numbers = #tpu.dot_dimension_numbers<[1], [0], [0], [1], [0, 0, 1, 1], [], []>} : vector<8x8xbf16>, vector<8x32xbf16>, vector<8x32xf32> -> vector<8x32xf32>
    %459 = arith.addf %450, %458 : vector<8x32xf32>
    %c0_185 = arith.constant 0 : index
    %c0_186 = arith.constant 0 : index
    %c0_187 = arith.constant 0 : index
    %460 = vector.load %arg32[%c0_185, %c0_186, %c0_187] : memref<1x32x32xbf16, #tpu.memory_space<vmem>>, vector<1x32x32xbf16>
    %461 = vector.shape_cast %460 : vector<1x32x32xbf16> to vector<32x32xbf16>
    %c0_188 = arith.constant 0 : index
    %c0_189 = arith.constant 0 : index
    %c0_190 = arith.constant 0 : index
    %462 = vector.load %arg23[%c0_188, %c0_189, %c0_190] : memref<1x1x32xf32, #tpu.memory_space<vmem>>, vector<1x1x32xf32>
    %463 = vector.shape_cast %462 : vector<1x1x32xf32> to vector<1x32xf32>
    %c0_191 = arith.constant 0 : index
    %c0_192 = arith.constant 0 : index
    %c0_193 = arith.constant 0 : index
    %464 = vector.load %arg33[%c0_191, %c0_192, %c0_193] : memref<1x32x32xbf16, #tpu.memory_space<vmem>>, vector<1x32x32xbf16>
    %465 = vector.shape_cast %464 : vector<1x32x32xbf16> to vector<32x32xbf16>
    %c0_194 = arith.constant 0 : index
    %c0_195 = arith.constant 0 : index
    %c0_196 = arith.constant 0 : index
    %466 = vector.load %arg24[%c0_194, %c0_195, %c0_196] : memref<1x1x32xf32, #tpu.memory_space<vmem>>, vector<1x1x32xf32>
    %467 = vector.shape_cast %466 : vector<1x1x32xf32> to vector<1x32xf32>
    %468 = arith.truncf %459 : vector<8x32xf32> to vector<8x32xbf16>
    %cst_197 = arith.constant dense<0.000000e+00> : vector<8x32xf32>
    %469 = tpu.matmul %468, %461, %cst_197 {dimension_numbers = #tpu.dot_dimension_numbers<[1], [0], [0], [1], [0, 0, 1, 1], [], []>} : vector<8x32xbf16>, vector<32x32xbf16>, vector<8x32xf32> -> vector<8x32xf32>
    %470 = vector.broadcast %463 : vector<1x32xf32> to vector<8x32xf32>
    %471 = arith.addf %469, %470 : vector<8x32xf32>
    %cst_198 = arith.constant 0.000000e+00 : f32
    %472 = vector.broadcast %cst_198 : f32 to vector<8x32xf32>
    %473 = arith.maximumf %471, %472 : vector<8x32xf32>
    %474 = arith.truncf %473 : vector<8x32xf32> to vector<8x32xbf16>
    %cst_199 = arith.constant dense<0.000000e+00> : vector<8x32xf32>
    %475 = tpu.matmul %474, %465, %cst_199 {dimension_numbers = #tpu.dot_dimension_numbers<[1], [0], [0], [1], [0, 0, 1, 1], [], []>} : vector<8x32xbf16>, vector<32x32xbf16>, vector<8x32xf32> -> vector<8x32xf32>
    %476 = vector.broadcast %467 : vector<1x32xf32> to vector<8x32xf32>
    %477 = arith.addf %475, %476 : vector<8x32xf32>
    %478 = arith.addf %477, %459 : vector<8x32xf32>
    %c0_200 = arith.constant 0 : index
    %c0_201 = arith.constant 0 : index
    %479 = vector.load %arg22[%c0_200, %c0_201] : memref<32x96xbf16, #tpu.memory_space<vmem>>, vector<32x96xbf16>
    %c0_202 = arith.constant 0 : index
    %c0_203 = arith.constant 0 : index
    %480 = vector.load %arg16[%c0_202, %c0_203] : memref<1x96xf32, #tpu.memory_space<vmem>>, vector<1x96xf32>
    %c0_204 = arith.constant 0 : index
    %c0_205 = arith.constant 0 : index
    %c0_206 = arith.constant 0 : index
    %481 = vector.load %arg20[%c0_204, %c0_205, %c0_206] : memref<4x8x32xbf16, #tpu.memory_space<vmem>>, vector<4x8x32xbf16>
    %c0_207 = arith.constant 0 : index
    %c0_208 = arith.constant 0 : index
    %482 = vector.load %arg14[%c0_207, %c0_208] : memref<1x32xf32, #tpu.memory_space<vmem>>, vector<1x32xf32>
    %c0_209 = arith.constant 0 : index
    %c0_210 = arith.constant 0 : index
    %483 = vector.load %arg18[%c0_209, %c0_210] : memref<1x32xf32, #tpu.memory_space<vmem>>, vector<1x32xf32>
    %c0_211 = arith.constant 0 : index
    %c0_212 = arith.constant 0 : index
    %484 = vector.load %arg17[%c0_211, %c0_212] : memref<1x32xf32, #tpu.memory_space<vmem>>, vector<1x32xf32>
    %485 = arith.truncf %478 : vector<8x32xf32> to vector<8x32xbf16>
    %cst_213 = arith.constant dense<0.000000e+00> : vector<8x96xf32>
    %486 = tpu.matmul %485, %479, %cst_213 {dimension_numbers = #tpu.dot_dimension_numbers<[1], [0], [0], [1], [0, 0, 1, 1], [], []>} : vector<8x32xbf16>, vector<32x96xbf16>, vector<8x96xf32> -> vector<8x96xf32>
    %487 = vector.broadcast %480 : vector<1x96xf32> to vector<8x96xf32>
    %488 = arith.addf %486, %487 : vector<8x96xf32>
    %489 = vector.extract_strided_slice %488 {offsets = [0, 0], sizes = [8, 32], strides = [1, 1]} : vector<8x96xf32> to vector<8x32xf32>
    %490 = vector.extract_strided_slice %488 {offsets = [0, 32], sizes = [8, 32], strides = [1, 1]} : vector<8x96xf32> to vector<8x32xf32>
    %491 = vector.extract_strided_slice %488 {offsets = [0, 64], sizes = [8, 32], strides = [1, 1]} : vector<8x96xf32> to vector<8x32xf32>
    %492 = arith.truncf %489 : vector<8x32xf32> to vector<8x32xbf16>
    %493 = arith.truncf %490 : vector<8x32xf32> to vector<8x32xbf16>
    %494 = arith.truncf %491 : vector<8x32xf32> to vector<8x32xbf16>
    %495 = vector.extract_strided_slice %492 {offsets = [0, 0], sizes = [8, 8], strides = [1, 1]} : vector<8x32xbf16> to vector<8x8xbf16>
    %496 = vector.extract_strided_slice %493 {offsets = [0, 0], sizes = [8, 8], strides = [1, 1]} : vector<8x32xbf16> to vector<8x8xbf16>
    %cst_214 = arith.constant dense<0.000000e+00> : vector<8x8xf32>
    %497 = tpu.matmul %495, %496, %cst_214 {dimension_numbers = #tpu.dot_dimension_numbers<[1], [1], [0], [0], [0, 0, 1, 0], [], []>} : vector<8x8xbf16>, vector<8x8xbf16>, vector<8x8xf32> -> vector<8x8xf32>
    %498 = vector.extract_strided_slice %492 {offsets = [0, 8], sizes = [8, 8], strides = [1, 1]} : vector<8x32xbf16> to vector<8x8xbf16>
    %499 = vector.extract_strided_slice %493 {offsets = [0, 8], sizes = [8, 8], strides = [1, 1]} : vector<8x32xbf16> to vector<8x8xbf16>
    %cst_215 = arith.constant dense<0.000000e+00> : vector<8x8xf32>
    %500 = tpu.matmul %498, %499, %cst_215 {dimension_numbers = #tpu.dot_dimension_numbers<[1], [1], [0], [0], [0, 0, 1, 0], [], []>} : vector<8x8xbf16>, vector<8x8xbf16>, vector<8x8xf32> -> vector<8x8xf32>
    %501 = vector.extract_strided_slice %492 {offsets = [0, 16], sizes = [8, 8], strides = [1, 1]} : vector<8x32xbf16> to vector<8x8xbf16>
    %502 = vector.extract_strided_slice %493 {offsets = [0, 16], sizes = [8, 8], strides = [1, 1]} : vector<8x32xbf16> to vector<8x8xbf16>
    %cst_216 = arith.constant dense<0.000000e+00> : vector<8x8xf32>
    %503 = tpu.matmul %501, %502, %cst_216 {dimension_numbers = #tpu.dot_dimension_numbers<[1], [1], [0], [0], [0, 0, 1, 0], [], []>} : vector<8x8xbf16>, vector<8x8xbf16>, vector<8x8xf32> -> vector<8x8xf32>
    %504 = vector.extract_strided_slice %492 {offsets = [0, 24], sizes = [8, 8], strides = [1, 1]} : vector<8x32xbf16> to vector<8x8xbf16>
    %505 = vector.extract_strided_slice %493 {offsets = [0, 24], sizes = [8, 8], strides = [1, 1]} : vector<8x32xbf16> to vector<8x8xbf16>
    %cst_217 = arith.constant dense<0.000000e+00> : vector<8x8xf32>
    %506 = tpu.matmul %504, %505, %cst_217 {dimension_numbers = #tpu.dot_dimension_numbers<[1], [1], [0], [0], [0, 0, 1, 0], [], []>} : vector<8x8xbf16>, vector<8x8xbf16>, vector<8x8xf32> -> vector<8x8xf32>
    %507 = vector.shape_cast %497 : vector<8x8xf32> to vector<1x8x8xf32>
    %508 = vector.shape_cast %500 : vector<8x8xf32> to vector<1x8x8xf32>
    %509 = vector.shape_cast %503 : vector<8x8xf32> to vector<1x8x8xf32>
    %510 = vector.shape_cast %506 : vector<8x8xf32> to vector<1x8x8xf32>
    %511 = tpu.concatenate %507, %508, %509, %510 in 0 : vector<1x8x8xf32>, vector<1x8x8xf32>, vector<1x8x8xf32>, vector<1x8x8xf32> -> vector<4x8x8xf32>
    %cst_218 = arith.constant dense<0xFF800000> : vector<4x8xf32>
    %512 = vector.multi_reduction <maximumf>, %511, %cst_218 [2] : vector<4x8x8xf32> to vector<4x8xf32>
    %513 = vector.shape_cast %512 : vector<4x8xf32> to vector<4x8x1xf32>
    %514 = vector.broadcast %513 : vector<4x8x1xf32> to vector<4x8x8xf32>
    %515 = arith.subf %511, %514 : vector<4x8x8xf32>
    %516 = math.exp %515 : vector<4x8x8xf32>
    %cst_219 = arith.constant dense<0.000000e+00> : vector<4x8xf32>
    %517 = vector.multi_reduction <add>, %516, %cst_219 [2] : vector<4x8x8xf32> to vector<4x8xf32>
    %518 = vector.shape_cast %517 : vector<4x8xf32> to vector<4x8x1xf32>
    %519 = vector.broadcast %518 : vector<4x8x1xf32> to vector<4x8x8xf32>
    %520 = arith.divf %516, %519 : vector<4x8x8xf32>
    %521 = arith.truncf %520 : vector<4x8x8xf32> to vector<4x8x8xbf16>
    %522 = vector.extract_strided_slice %521 {offsets = [0, 0, 0], sizes = [1, 8, 8], strides = [1, 1, 1]} : vector<4x8x8xbf16> to vector<1x8x8xbf16>
    %523 = vector.shape_cast %522 : vector<1x8x8xbf16> to vector<8x8xbf16>
    %524 = vector.extract_strided_slice %494 {offsets = [0, 0], sizes = [8, 8], strides = [1, 1]} : vector<8x32xbf16> to vector<8x8xbf16>
    %cst_220 = arith.constant dense<0.000000e+00> : vector<8x8xf32>
    %525 = tpu.matmul %523, %524, %cst_220 {dimension_numbers = #tpu.dot_dimension_numbers<[1], [0], [0], [1], [0, 0, 1, 1], [], []>} : vector<8x8xbf16>, vector<8x8xbf16>, vector<8x8xf32> -> vector<8x8xf32>
    %526 = arith.truncf %525 : vector<8x8xf32> to vector<8x8xbf16>
    %527 = vector.extract_strided_slice %481 {offsets = [0, 0, 0], sizes = [1, 8, 32], strides = [1, 1, 1]} : vector<4x8x32xbf16> to vector<1x8x32xbf16>
    %528 = vector.shape_cast %527 : vector<1x8x32xbf16> to vector<8x32xbf16>
    %cst_221 = arith.constant dense<0.000000e+00> : vector<8x32xf32>
    %529 = tpu.matmul %526, %528, %cst_221 {dimension_numbers = #tpu.dot_dimension_numbers<[1], [0], [0], [1], [0, 0, 1, 1], [], []>} : vector<8x8xbf16>, vector<8x32xbf16>, vector<8x32xf32> -> vector<8x32xf32>
    %530 = vector.broadcast %482 : vector<1x32xf32> to vector<8x32xf32>
    %531 = arith.addf %530, %529 : vector<8x32xf32>
    %532 = vector.extract_strided_slice %521 {offsets = [1, 0, 0], sizes = [1, 8, 8], strides = [1, 1, 1]} : vector<4x8x8xbf16> to vector<1x8x8xbf16>
    %533 = vector.shape_cast %532 : vector<1x8x8xbf16> to vector<8x8xbf16>
    %534 = vector.extract_strided_slice %494 {offsets = [0, 8], sizes = [8, 8], strides = [1, 1]} : vector<8x32xbf16> to vector<8x8xbf16>
    %cst_222 = arith.constant dense<0.000000e+00> : vector<8x8xf32>
    %535 = tpu.matmul %533, %534, %cst_222 {dimension_numbers = #tpu.dot_dimension_numbers<[1], [0], [0], [1], [0, 0, 1, 1], [], []>} : vector<8x8xbf16>, vector<8x8xbf16>, vector<8x8xf32> -> vector<8x8xf32>
    %536 = arith.truncf %535 : vector<8x8xf32> to vector<8x8xbf16>
    %537 = vector.extract_strided_slice %481 {offsets = [1, 0, 0], sizes = [1, 8, 32], strides = [1, 1, 1]} : vector<4x8x32xbf16> to vector<1x8x32xbf16>
    %538 = vector.shape_cast %537 : vector<1x8x32xbf16> to vector<8x32xbf16>
    %cst_223 = arith.constant dense<0.000000e+00> : vector<8x32xf32>
    %539 = tpu.matmul %536, %538, %cst_223 {dimension_numbers = #tpu.dot_dimension_numbers<[1], [0], [0], [1], [0, 0, 1, 1], [], []>} : vector<8x8xbf16>, vector<8x32xbf16>, vector<8x32xf32> -> vector<8x32xf32>
    %540 = arith.addf %531, %539 : vector<8x32xf32>
    %541 = vector.extract_strided_slice %521 {offsets = [2, 0, 0], sizes = [1, 8, 8], strides = [1, 1, 1]} : vector<4x8x8xbf16> to vector<1x8x8xbf16>
    %542 = vector.shape_cast %541 : vector<1x8x8xbf16> to vector<8x8xbf16>
    %543 = vector.extract_strided_slice %494 {offsets = [0, 16], sizes = [8, 8], strides = [1, 1]} : vector<8x32xbf16> to vector<8x8xbf16>
    %cst_224 = arith.constant dense<0.000000e+00> : vector<8x8xf32>
    %544 = tpu.matmul %542, %543, %cst_224 {dimension_numbers = #tpu.dot_dimension_numbers<[1], [0], [0], [1], [0, 0, 1, 1], [], []>} : vector<8x8xbf16>, vector<8x8xbf16>, vector<8x8xf32> -> vector<8x8xf32>
    %545 = arith.truncf %544 : vector<8x8xf32> to vector<8x8xbf16>
    %546 = vector.extract_strided_slice %481 {offsets = [2, 0, 0], sizes = [1, 8, 32], strides = [1, 1, 1]} : vector<4x8x32xbf16> to vector<1x8x32xbf16>
    %547 = vector.shape_cast %546 : vector<1x8x32xbf16> to vector<8x32xbf16>
    %cst_225 = arith.constant dense<0.000000e+00> : vector<8x32xf32>
    %548 = tpu.matmul %545, %547, %cst_225 {dimension_numbers = #tpu.dot_dimension_numbers<[1], [0], [0], [1], [0, 0, 1, 1], [], []>} : vector<8x8xbf16>, vector<8x32xbf16>, vector<8x32xf32> -> vector<8x32xf32>
    %549 = arith.addf %540, %548 : vector<8x32xf32>
    %550 = vector.extract_strided_slice %521 {offsets = [3, 0, 0], sizes = [1, 8, 8], strides = [1, 1, 1]} : vector<4x8x8xbf16> to vector<1x8x8xbf16>
    %551 = vector.shape_cast %550 : vector<1x8x8xbf16> to vector<8x8xbf16>
    %552 = vector.extract_strided_slice %494 {offsets = [0, 24], sizes = [8, 8], strides = [1, 1]} : vector<8x32xbf16> to vector<8x8xbf16>
    %cst_226 = arith.constant dense<0.000000e+00> : vector<8x8xf32>
    %553 = tpu.matmul %551, %552, %cst_226 {dimension_numbers = #tpu.dot_dimension_numbers<[1], [0], [0], [1], [0, 0, 1, 1], [], []>} : vector<8x8xbf16>, vector<8x8xbf16>, vector<8x8xf32> -> vector<8x8xf32>
    %554 = arith.truncf %553 : vector<8x8xf32> to vector<8x8xbf16>
    %555 = vector.extract_strided_slice %481 {offsets = [3, 0, 0], sizes = [1, 8, 32], strides = [1, 1, 1]} : vector<4x8x32xbf16> to vector<1x8x32xbf16>
    %556 = vector.shape_cast %555 : vector<1x8x32xbf16> to vector<8x32xbf16>
    %cst_227 = arith.constant dense<0.000000e+00> : vector<8x32xf32>
    %557 = tpu.matmul %554, %556, %cst_227 {dimension_numbers = #tpu.dot_dimension_numbers<[1], [0], [0], [1], [0, 0, 1, 1], [], []>} : vector<8x8xbf16>, vector<8x32xbf16>, vector<8x32xf32> -> vector<8x32xf32>
    %558 = arith.addf %549, %557 : vector<8x32xf32>
    %559 = arith.addf %558, %478 : vector<8x32xf32>
    %cst_228 = arith.constant dense<0.000000e+00> : vector<8xf32>
    %560 = vector.multi_reduction <add>, %559, %cst_228 [1] : vector<8x32xf32> to vector<8xf32>
    %561 = vector.shape_cast %560 : vector<8xf32> to vector<8x1xf32>
    %cst_229 = arith.constant 3.200000e+01 : f32
    %562 = vector.broadcast %cst_229 : f32 to vector<8x1xf32>
    %563 = arith.divf %561, %562 : vector<8x1xf32>
    %564 = vector.broadcast %563 : vector<8x1xf32> to vector<8x32xf32>
    %565 = arith.subf %559, %564 : vector<8x32xf32>
    %566 = arith.mulf %565, %565 : vector<8x32xf32>
    %cst_230 = arith.constant dense<0.000000e+00> : vector<8xf32>
    %567 = vector.multi_reduction <add>, %566, %cst_230 [1] : vector<8x32xf32> to vector<8xf32>
    %568 = vector.shape_cast %567 : vector<8xf32> to vector<8x1xf32>
    %cst_231 = arith.constant 3.200000e+01 : f32
    %569 = vector.broadcast %cst_231 : f32 to vector<8x1xf32>
    %570 = arith.divf %568, %569 : vector<8x1xf32>
    %571 = vector.broadcast %563 : vector<8x1xf32> to vector<8x32xf32>
    %572 = arith.subf %559, %571 : vector<8x32xf32>
    %cst_232 = arith.constant 9.99999974E-6 : f32
    %573 = vector.broadcast %cst_232 : f32 to vector<8x1xf32>
    %574 = arith.addf %570, %573 : vector<8x1xf32>
    %575 = math.rsqrt %574 : vector<8x1xf32>
    %576 = vector.broadcast %575 : vector<8x1xf32> to vector<8x32xf32>
    %577 = arith.mulf %572, %576 : vector<8x32xf32>
    %578 = vector.broadcast %483 : vector<1x32xf32> to vector<8x32xf32>
    %579 = arith.mulf %577, %578 : vector<8x32xf32>
    %580 = vector.broadcast %484 : vector<1x32xf32> to vector<8x32xf32>
    %581 = arith.addf %579, %580 : vector<8x32xf32>
    %c0_233 = arith.constant 0 : index
    %c0_234 = arith.constant 0 : index
    %582 = vector.load %arg21[%c0_233, %c0_234] : memref<32x8xbf16, #tpu.memory_space<vmem>>, vector<32x8xbf16>
    %c0_235 = arith.constant 0 : index
    %c0_236 = arith.constant 0 : index
    %583 = vector.load %arg15[%c0_235, %c0_236] : memref<1x8xf32, #tpu.memory_space<vmem>>, vector<1x8xf32>
    %c0_237 = arith.constant 0 : index
    %c0_238 = arith.constant 0 : index
    %584 = vector.load %arg19[%c0_237, %c0_238] : memref<32x8xbf16, #tpu.memory_space<vmem>>, vector<32x8xbf16>
    %c0_239 = arith.constant 0 : index
    %c0_240 = arith.constant 0 : index
    %585 = vector.load %arg13[%c0_239, %c0_240] : memref<1x8xf32, #tpu.memory_space<vmem>>, vector<1x8xf32>
    %586 = arith.truncf %581 : vector<8x32xf32> to vector<8x32xbf16>
    %cst_241 = arith.constant dense<0.000000e+00> : vector<8x8xf32>
    %587 = tpu.matmul %586, %582, %cst_241 {dimension_numbers = #tpu.dot_dimension_numbers<[1], [0], [0], [1], [0, 0, 1, 1], [], []>} : vector<8x32xbf16>, vector<32x8xbf16>, vector<8x8xf32> -> vector<8x8xf32>
    %588 = vector.broadcast %583 : vector<1x8xf32> to vector<8x8xf32>
    %589 = arith.addf %587, %588 : vector<8x8xf32>
    %cst_242 = arith.constant dense<0.000000e+00> : vector<8x8xf32>
    %590 = tpu.matmul %1, %584, %cst_242 {dimension_numbers = #tpu.dot_dimension_numbers<[1], [0], [0], [1], [0, 0, 1, 1], [], []>} : vector<8x32xbf16>, vector<32x8xbf16>, vector<8x8xf32> -> vector<8x8xf32>
    %591 = vector.broadcast %585 : vector<1x8xf32> to vector<8x8xf32>
    %592 = arith.addf %590, %591 : vector<8x8xf32>
    %593 = arith.truncf %589 : vector<8x8xf32> to vector<8x8xbf16>
    %594 = arith.truncf %592 : vector<8x8xf32> to vector<8x8xbf16>
    %cst_243 = arith.constant dense<0.000000e+00> : vector<8x8xf32>
    %595 = tpu.matmul %593, %594, %cst_243 {dimension_numbers = #tpu.dot_dimension_numbers<[1], [1], [0], [0], [0, 0, 1, 0], [], []>} : vector<8x8xbf16>, vector<8x8xbf16>, vector<8x8xf32> -> vector<8x8xf32>
    %cst_244 = arith.constant dense<0xFF800000> : vector<8xf32>
    %596 = vector.multi_reduction <maximumf>, %595, %cst_244 [1] : vector<8x8xf32> to vector<8xf32>
    %597 = vector.shape_cast %596 : vector<8xf32> to vector<8x1xf32>
    %598 = vector.broadcast %597 : vector<8x1xf32> to vector<8x8xf32>
    %599 = arith.subf %595, %598 : vector<8x8xf32>
    %600 = math.exp %599 : vector<8x8xf32>
    %cst_245 = arith.constant dense<0.000000e+00> : vector<8xf32>
    %601 = vector.multi_reduction <add>, %600, %cst_245 [1] : vector<8x8xf32> to vector<8xf32>
    %602 = vector.shape_cast %601 : vector<8xf32> to vector<8x1xf32>
    %603 = vector.broadcast %602 : vector<8x1xf32> to vector<8x8xf32>
    %604 = arith.divf %600, %603 : vector<8x8xf32>
    %c0_246 = arith.constant 0 : index
    %c0_247 = arith.constant 0 : index
    %c0_248 = arith.constant 0 : index
    %605 = vector.load %arg39[%c0_246, %c0_247, %c0_248] : memref<1x8x8xf32, #tpu.memory_space<vmem>>, vector<1x8x8xf32>
    %606 = vector.shape_cast %605 : vector<1x8x8xf32> to vector<8x8xf32>
    %607 = vector.shape_cast %604 : vector<8x8xf32> to vector<1x8x8xf32>
    tpu.vector_store %arg39[%c0_246, %c0_247, %c0_248], %607 {strides = array<i32>} : memref<1x8x8xf32, #tpu.memory_space<vmem>>, vector<1x8x8xf32>,
    return
  }
  func.func @transform_0(%arg0: i32) -> (i32, i32, i32) {
    %c0_i32 = arith.constant 0 : i32
    %c0_i32_0 = arith.constant 0 : i32
    %c0_i32_1 = arith.constant 0 : i32
    return %arg0, %c0_i32, %c0_i32_0 : i32, i32, i32
  }
  func.func @transform_1(%arg0: i32) -> (i32, i32, i32) {
    %c0_i32 = arith.constant 0 : i32
    %c0_i32_0 = arith.constant 0 : i32
    %c0_i32_1 = arith.constant 0 : i32
    return %arg0, %c0_i32, %c0_i32_0 : i32, i32, i32
  }
  func.func @transform_2(%arg0: i32) -> (i32, i32, i32) {
    %c0_i32 = arith.constant 0 : i32
    %c0_i32_0 = arith.constant 0 : i32
    %c0_i32_1 = arith.constant 0 : i32
    %c0_i32_2 = arith.constant 0 : i32
    return %c0_i32, %c0_i32_0, %c0_i32_1 : i32, i32, i32
  }
  func.func @transform_3(%arg0: i32) -> (i32, i32, i32) {
    %c0_i32 = arith.constant 0 : i32
    %c0_i32_0 = arith.constant 0 : i32
    %c0_i32_1 = arith.constant 0 : i32
    %c0_i32_2 = arith.constant 0 : i32
    return %c0_i32, %c0_i32_0, %c0_i32_1 : i32, i32, i32
  }
  func.func @transform_4(%arg0: i32) -> (i32, i32, i32) {
    %c0_i32 = arith.constant 0 : i32
    %c0_i32_0 = arith.constant 0 : i32
    %c0_i32_1 = arith.constant 0 : i32
    %c0_i32_2 = arith.constant 0 : i32
    return %c0_i32, %c0_i32_0, %c0_i32_1 : i32, i32, i32
  }
  func.func @transform_5(%arg0: i32) -> (i32, i32, i32) {
    %c0_i32 = arith.constant 0 : i32
    %c0_i32_0 = arith.constant 0 : i32
    %c0_i32_1 = arith.constant 0 : i32
    %c0_i32_2 = arith.constant 0 : i32
    return %c0_i32, %c0_i32_0, %c0_i32_1 : i32, i32, i32
  }
  func.func @transform_6(%arg0: i32) -> (i32, i32, i32) {
    %c0_i32 = arith.constant 0 : i32
    %c0_i32_0 = arith.constant 0 : i32
    %c0_i32_1 = arith.constant 0 : i32
    %c0_i32_2 = arith.constant 0 : i32
    return %c0_i32, %c0_i32_0, %c0_i32_1 : i32, i32, i32
  }
  func.func @transform_7(%arg0: i32) -> (i32, i32, i32) {
    %c0_i32 = arith.constant 0 : i32
    %c0_i32_0 = arith.constant 0 : i32
    %c0_i32_1 = arith.constant 0 : i32
    %c0_i32_2 = arith.constant 0 : i32
    return %c0_i32, %c0_i32_0, %c0_i32_1 : i32, i32, i32
  }
  func.func @transform_8(%arg0: i32) -> (i32, i32, i32) {
    %c0_i32 = arith.constant 0 : i32
    %c0_i32_0 = arith.constant 0 : i32
    %c0_i32_1 = arith.constant 0 : i32
    %c0_i32_2 = arith.constant 0 : i32
    return %c0_i32, %c0_i32_0, %c0_i32_1 : i32, i32, i32
  }
  func.func @transform_9(%arg0: i32) -> (i32, i32, i32) {
    %c0_i32 = arith.constant 0 : i32
    %c0_i32_0 = arith.constant 0 : i32
    %c0_i32_1 = arith.constant 0 : i32
    %c0_i32_2 = arith.constant 0 : i32
    return %c0_i32, %c0_i32_0, %c0_i32_1 : i32, i32, i32
  }
  func.func @transform_10(%arg0: i32) -> (i32, i32, i32, i32) {
    %c0_i32 = arith.constant 0 : i32
    %c0_i32_0 = arith.constant 0 : i32
    %c0_i32_1 = arith.constant 0 : i32
    %c0_i32_2 = arith.constant 0 : i32
    %c0_i32_3 = arith.constant 0 : i32
    return %c0_i32, %c0_i32_0, %c0_i32_1, %c0_i32_2 : i32, i32, i32, i32
  }
  func.func @transform_11(%arg0: i32) -> (i32, i32, i32) {
    %c0_i32 = arith.constant 0 : i32
    %c0_i32_0 = arith.constant 0 : i32
    %c0_i32_1 = arith.constant 0 : i32
    %c0_i32_2 = arith.constant 0 : i32
    return %c0_i32, %c0_i32_0, %c0_i32_1 : i32, i32, i32
  }
  func.func @transform_12(%arg0: i32) -> (i32, i32) {
    %c0_i32 = arith.constant 0 : i32
    %c0_i32_0 = arith.constant 0 : i32
    %c0_i32_1 = arith.constant 0 : i32
    return %c0_i32, %c0_i32_0 : i32, i32
  }
  func.func @transform_13(%arg0: i32) -> (i32, i32) {
    %c0_i32 = arith.constant 0 : i32
    %c0_i32_0 = arith.constant 0 : i32
    %c0_i32_1 = arith.constant 0 : i32
    return %c0_i32, %c0_i32_0 : i32, i32
  }
  func.func @transform_14(%arg0: i32) -> (i32, i32) {
    %c0_i32 = arith.constant 0 : i32
    %c0_i32_0 = arith.constant 0 : i32
    %c0_i32_1 = arith.constant 0 : i32
    return %c0_i32, %c0_i32_0 : i32, i32
  }
  func.func @transform_15(%arg0: i32) -> (i32, i32) {
    %c0_i32 = arith.constant 0 : i32
    %c0_i32_0 = arith.constant 0 : i32
    %c0_i32_1 = arith.constant 0 : i32
    return %c0_i32, %c0_i32_0 : i32, i32
  }
  func.func @transform_16(%arg0: i32) -> (i32, i32) {
    %c0_i32 = arith.constant 0 : i32
    %c0_i32_0 = arith.constant 0 : i32
    %c0_i32_1 = arith.constant 0 : i32
    return %c0_i32, %c0_i32_0 : i32, i32
  }
  func.func @transform_17(%arg0: i32) -> (i32, i32) {
    %c0_i32 = arith.constant 0 : i32
    %c0_i32_0 = arith.constant 0 : i32
    %c0_i32_1 = arith.constant 0 : i32
    return %c0_i32, %c0_i32_0 : i32, i32
  }
  func.func @transform_18(%arg0: i32) -> (i32, i32) {
    %c0_i32 = arith.constant 0 : i32
    %c0_i32_0 = arith.constant 0 : i32
    %c0_i32_1 = arith.constant 0 : i32
    return %c0_i32, %c0_i32_0 : i32, i32
  }
  func.func @transform_19(%arg0: i32) -> (i32, i32, i32) {
    %c0_i32 = arith.constant 0 : i32
    %c0_i32_0 = arith.constant 0 : i32
    %c0_i32_1 = arith.constant 0 : i32
    %c0_i32_2 = arith.constant 0 : i32
    return %c0_i32, %c0_i32_0, %c0_i32_1 : i32, i32, i32
  }
  func.func @transform_20(%arg0: i32) -> (i32, i32) {
    %c0_i32 = arith.constant 0 : i32
    %c0_i32_0 = arith.constant 0 : i32
    %c0_i32_1 = arith.constant 0 : i32
    return %c0_i32, %c0_i32_0 : i32, i32
  }
  func.func @transform_21(%arg0: i32) -> (i32, i32) {
    %c0_i32 = arith.constant 0 : i32
    %c0_i32_0 = arith.constant 0 : i32
    %c0_i32_1 = arith.constant 0 : i32
    return %c0_i32, %c0_i32_0 : i32, i32
  }
  func.func @transform_22(%arg0: i32) -> (i32, i32, i32) {
    %c0_i32 = arith.constant 0 : i32
    %c0_i32_0 = arith.constant 0 : i32
    %c0_i32_1 = arith.constant 0 : i32
    %c0_i32_2 = arith.constant 0 : i32
    return %c0_i32, %c0_i32_0, %c0_i32_1 : i32, i32, i32
  }
  func.func @transform_23(%arg0: i32) -> (i32, i32, i32) {
    %c0_i32 = arith.constant 0 : i32
    %c0_i32_0 = arith.constant 0 : i32
    %c0_i32_1 = arith.constant 0 : i32
    %c0_i32_2 = arith.constant 0 : i32
    return %c0_i32, %c0_i32_0, %c0_i32_1 : i32, i32, i32
  }
  func.func @transform_24(%arg0: i32) -> (i32, i32, i32) {
    %c0_i32 = arith.constant 0 : i32
    %c0_i32_0 = arith.constant 0 : i32
    %c0_i32_1 = arith.constant 0 : i32
    %c0_i32_2 = arith.constant 0 : i32
    return %c0_i32, %c0_i32_0, %c0_i32_1 : i32, i32, i32
  }
  func.func @transform_25(%arg0: i32) -> (i32, i32, i32) {
    %c0_i32 = arith.constant 0 : i32
    %c0_i32_0 = arith.constant 0 : i32
    %c0_i32_1 = arith.constant 0 : i32
    %c0_i32_2 = arith.constant 0 : i32
    return %c0_i32, %c0_i32_0, %c0_i32_1 : i32, i32, i32
  }
  func.func @transform_26(%arg0: i32) -> (i32, i32, i32) {
    %c0_i32 = arith.constant 0 : i32
    %c0_i32_0 = arith.constant 0 : i32
    %c0_i32_1 = arith.constant 0 : i32
    %c0_i32_2 = arith.constant 0 : i32
    return %c0_i32, %c0_i32_0, %c0_i32_1 : i32, i32, i32
  }
  func.func @transform_27(%arg0: i32) -> (i32, i32, i32) {
    %c0_i32 = arith.constant 0 : i32
    %c0_i32_0 = arith.constant 0 : i32
    %c0_i32_1 = arith.constant 0 : i32
    %c0_i32_2 = arith.constant 0 : i32
    return %c0_i32, %c0_i32_0, %c0_i32_1 : i32, i32, i32
  }
  func.func @transform_28(%arg0: i32) -> (i32, i32, i32) {
    %c0_i32 = arith.constant 0 : i32
    %c0_i32_0 = arith.constant 0 : i32
    %c0_i32_1 = arith.constant 0 : i32
    %c0_i32_2 = arith.constant 0 : i32
    return %c0_i32, %c0_i32_0, %c0_i32_1 : i32, i32, i32
  }
  func.func @transform_29(%arg0: i32) -> (i32, i32, i32) {
    %c0_i32 = arith.constant 0 : i32
    %c0_i32_0 = arith.constant 0 : i32
    %c0_i32_1 = arith.constant 0 : i32
    %c0_i32_2 = arith.constant 0 : i32
    return %c0_i32, %c0_i32_0, %c0_i32_1 : i32, i32, i32
  }
  func.func @transform_30(%arg0: i32) -> (i32, i32, i32) {
    %c0_i32 = arith.constant 0 : i32
    %c0_i32_0 = arith.constant 0 : i32
    %c0_i32_1 = arith.constant 0 : i32
    %c0_i32_2 = arith.constant 0 : i32
    return %c0_i32, %c0_i32_0, %c0_i32_1 : i32, i32, i32
  }
  func.func @transform_31(%arg0: i32) -> (i32, i32, i32) {
    %c0_i32 = arith.constant 0 : i32
    %c0_i32_0 = arith.constant 0 : i32
    %c0_i32_1 = arith.constant 0 : i32
    %c0_i32_2 = arith.constant 0 : i32
    return %c0_i32, %c0_i32_0, %c0_i32_1 : i32, i32, i32
  }
  func.func @transform_32(%arg0: i32) -> (i32, i32, i32) {
    %c0_i32 = arith.constant 0 : i32
    %c0_i32_0 = arith.constant 0 : i32
    %c0_i32_1 = arith.constant 0 : i32
    %c0_i32_2 = arith.constant 0 : i32
    return %c0_i32, %c0_i32_0, %c0_i32_1 : i32, i32, i32
  }
  func.func @transform_33(%arg0: i32) -> (i32, i32, i32) {
    %c0_i32 = arith.constant 0 : i32
    %c0_i32_0 = arith.constant 0 : i32
    %c0_i32_1 = arith.constant 0 : i32
    %c0_i32_2 = arith.constant 0 : i32
    return %c0_i32, %c0_i32_0, %c0_i32_1 : i32, i32, i32
  }
  func.func @transform_34(%arg0: i32) -> (i32, i32, i32, i32) {
    %c0_i32 = arith.constant 0 : i32
    %c0_i32_0 = arith.constant 0 : i32
    %c0_i32_1 = arith.constant 0 : i32
    %c0_i32_2 = arith.constant 0 : i32
    %c0_i32_3 = arith.constant 0 : i32
    return %c0_i32, %c0_i32_0, %c0_i32_1, %c0_i32_2 : i32, i32, i32, i32
  }
  func.func @transform_35(%arg0: i32) -> (i32, i32, i32, i32) {
    %c0_i32 = arith.constant 0 : i32
    %c0_i32_0 = arith.constant 0 : i32
    %c0_i32_1 = arith.constant 0 : i32
    %c0_i32_2 = arith.constant 0 : i32
    %c0_i32_3 = arith.constant 0 : i32
    return %c0_i32, %c0_i32_0, %c0_i32_1, %c0_i32_2 : i32, i32, i32, i32
  }
  func.func @transform_36(%arg0: i32) -> (i32, i32, i32) {
    %c0_i32 = arith.constant 0 : i32
    %c0_i32_0 = arith.constant 0 : i32
    %c0_i32_1 = arith.constant 0 : i32
    %c0_i32_2 = arith.constant 0 : i32
    return %c0_i32, %c0_i32_0, %c0_i32_1 : i32, i32, i32
  }
  func.func @transform_37(%arg0: i32) -> (i32, i32, i32) {
    %c0_i32 = arith.constant 0 : i32
    %c0_i32_0 = arith.constant 0 : i32
    %c0_i32_1 = arith.constant 0 : i32
    %c0_i32_2 = arith.constant 0 : i32
    return %c0_i32, %c0_i32_0, %c0_i32_1 : i32, i32, i32
  }
  func.func @transform_38(%arg0: i32) -> (i32, i32, i32) {
    %c0_i32 = arith.constant 0 : i32
    %c0_i32_0 = arith.constant 0 : i32
    %c0_i32_1 = arith.constant 0 : i32
    return %arg0, %c0_i32, %c0_i32_0 : i32, i32, i32
  }
}

</mosaic_0001>

<bundles_post_ra>
// kernel: ranknet_forward.1
= control target key start
LH: loop header
LB: loop body
LE: loop exit
PB: predicated region body
PF: predicated region fallthrough
CT: control target
= control target key end

     0   :  { %s8613_s6 = smov 1   ;;  %s8614_s10 = smov 2   ;;  %s9864_s0 = inlined_call_operand.smem [shape: u32[39], index: -1, kind: input, shape index: {}] }
   0x1   :  { %s8707_s5 = sld [smem:[%s9864_s0]]   ;;  %s8615_s14 = smov 3  }
   0x2   :  { %s8712_s9 = sld [smem:[%s9864_s0 + %s8613_s6]]   ;;  %s8616_s18 = smov 4  }
   0x3   :  { %s8717_s13 = sld [smem:[%s9864_s0 + %s8614_s10]]   ;;  %s8617_s22 = smov 5  }
   0x4   :  { %s8722_s17 = sld [smem:[%s9864_s0 + %s8615_s14]]   ;;  %s8618_s26 = smov 6  }
   0x5   :  { %s8727_s21 = sld [smem:[%s9864_s0 + %s8616_s18]]   ;;  %s8619_s30 = smov 7  }
   0x6   :  { %s8732_s25 = sld [smem:[%s9864_s0 + %s8617_s22]]   ;;  %s8620_s4 = smov 8  }
   0x7   :  { %9911 = sst [smem:[#allocation67_spill]] %s8707_s5  ;;  %s8621_s10 = smov 9  }
   0x8   :  { %9912 = sst [smem:[#allocation68_spill]] %s8712_s9  ;;  %s8622_s15 = smov 10  }
   0x9   :  { %s8737_s29 = sld [smem:[%s9864_s0 + %s8618_s26]]   ;;  %s8623_s20 = smov 11  }
   0xa   :  { %9913 = sst [smem:[#allocation69_spill]] %s8722_s17  ;;  %s8624_s26 = smov 12  }
   0xb   :  { %9914 = sst [smem:[#allocation70_spill]] %s8727_s21  ;;  %s8625_s1 = smov 13  }
   0xc   :  { %9915 = sst [smem:[#allocation71_spill]] %s8732_s25  ;;  %s8626_s7 = smov 14  }
   0xd   :  { %s8742_s3 = sld [smem:[%s9864_s0 + %s8619_s30]]   ;;  %s8628_s22 = smov 16  }
   0xe   :  { %s8747_s8 = sld [smem:[%s9864_s0 + %s8620_s4]]   ;;  %s8629_s28 = smov 17  }
   0xf   :  { %9916 = sst [smem:[#allocation72_spill]] %s8737_s29 }
  0x10   :  { %s8752_s14 = sld [smem:[%s9864_s0 + %s8621_s10]]  }
  0x11   :  { %s8757_s19 = sld [smem:[%s9864_s0 + %s8622_s15]]   ;;  %s8627_s15 = smov 15  }
  0x12   :  { %s8762_s24 = sld [smem:[%s9864_s0 + %s8623_s20]]  }
  0x13   :  { %9917 = sst [smem:[#allocation73_spill]] %s8742_s3 }
  0x14   :  { %9918 = sst [smem:[#allocation74_spill]] %s8747_s8 }
  0x15   :  { %s8767_s30 = sld [smem:[%s9864_s0 + %s8624_s26]]  }
  0x16   :  { %9919 = sst [smem:[#allocation75_spill]] %s8752_s14 }
  0x17   :  { %9920 = sst [smem:[#allocation76_spill]] %s8757_s19 }
  0x18   :  { %9921 = sst [smem:[#allocation77_spill]] %s8762_s24 }
  0x19   :  { %s8772_s6 = sld [smem:[%s9864_s0 + %s8625_s1]]  }
  0x1a   :  { %s8777_s12 = sld [smem:[%s9864_s0 + %s8626_s7]]   ;;  %s8630_s7 = smov 18  }
  0x1b   :  { %s8782_s20 = sld [smem:[%s9864_s0 + %s8627_s15]]   ;;  %s8631_s15 = smov 19  }
  0x1c   :  { %s8787_s27 = sld [smem:[%s9864_s0 + %s8628_s22]]   ;;  %s8632_s22 = smov 20  }
  0x1d   :  { %s8792_s4 = sld [smem:[%s9864_s0 + %s8629_s28]]   ;;  %s8633_s28 = smov 21  }
  0x1e   :  { %s8797_s9 = sld [smem:[%s9864_s0 + %s8630_s7]]   ;;  %s8634_s7 = smov 22  }
  0x1f   :  { %9922 = sst [smem:[#allocation78_spill]] %s8772_s6 }
  0x20   :  { %s8802_s14 = sld [smem:[%s9864_s0 + %s8631_s15]]   ;;  %s8635_s15 = smov 23  }
  0x21   :  { %9923 = sst [smem:[#allocation79_spill]] %s8782_s20 }
  0x22   :  { %s8807_s8 = sld [smem:[%s9864_s0 + %s8632_s22]]   ;;  %s8636_s22 = smov 24  }
  0x23   :  { %9924 = sst [smem:[#allocation80_spill]] %s8792_s4 }
  0x24   :  { %9925 = sst [smem:[#allocation81_spill]] %s8797_s9 }
  0x25   :  { %s8812_s19 = sld [smem:[%s9864_s0 + %s8633_s28]]   ;;  %s8637_s28 = smov 25  }
  0x26   :  { %s8817_s9 = sld [smem:[%s9864_s0 + %s8634_s7]]   ;;  %s8638_s7 = smov 26  }
  0x27   :  { %s8822_s5 = sld [smem:[%s9864_s0 + %s8635_s15]]   ;;  %s8639_s15 = smov 27  }
  0x28   :  { %9926 = sst [smem:[#allocation82_spill]] %s8807_s8 }
  0x29   :  { %s8827_s8 = sld [smem:[%s9864_s0 + %s8636_s22]]   ;;  %s8640_s22 = smov 28  }
  0x2a   :  { %s8837_s4 = sld [smem:[%s9864_s0 + %s8638_s7]]   ;;  %s8642_s7 = smov 30  }
  0x2b   :  { %9927 = sst [smem:[#allocation83_spill]] %s8812_s19 }
  0x2c   :  { %s8832_s19 = sld [smem:[%s9864_s0 + %s8637_s28]]   ;;  %s8641_s28 = smov 29  }
  0x2d   :  { %9928 = sst [smem:[#allocation84_spill]] %s8822_s5 }
  0x2e   :  { %s8842_s5 = sld [smem:[%s9864_s0 + %s8639_s15]]   ;;  %s8643_s15 = smov 31  }
  0x2f   :  { %s8847_s20 = sld [smem:[%s9864_s0 + %s8640_s22]]   ;;  %s8644_s22 = smov 32  }
  0x30   :  { %9930 = sst [smem:[#allocation86_spill]] %s8837_s4 }
  0x31   :  { %s8857_s6 = sld [smem:[%s9864_s0 + %s8642_s7]]   ;;  %s8646_s7 = smov 34  }
  0x32   :  { %9929 = sst [smem:[#allocation85_spill]] %s8832_s19 }
  0x33   :  { %s8852_s19 = sld [smem:[%s9864_s0 + %s8641_s28]]   ;;  %s8645_s28 = smov 33  }
  0x34   :  { %9931 = sst [smem:[#allocation87_spill]] %s8842_s5 }
  0x35   :  { %s8862_s5 = sld [smem:[%s9864_s0 + %s8643_s15]]   ;;  %s8647_s15 = smov 35  }
  0x36   :  { %s8867_s24 = sld [smem:[%s9864_s0 + %s8644_s22]]   ;;  %s8648_s22 = smov 36  }
  0x37   :  { %s8877_s29 = sld [smem:[%s9864_s0 + %s8646_s7]]   ;;  %s8650_s7 = smov 38  }
  0x38   :  { %s8887_s21 = sld [smem:[%s9864_s0 + %s8648_s22]]  }
  0x39   :  { %9932 = sst [smem:[#allocation88_spill]] %s8852_s19 }
  0x3a   :  { %s8872_s19 = sld [smem:[%s9864_s0 + %s8645_s28]]   ;;  %s8649_s28 = smov 37  }
  0x3b   :  { %9933 = sst [smem:[#allocation89_spill]] %s8862_s5 }
  0x3c   :  { %s8882_s5 = sld [smem:[%s9864_s0 + %s8647_s15]]  }
  0x3d   :  { %9935 = sst [smem:[#allocation91_spill]] %s8877_s29 }
  0x3e   :  { %s8897_s29 = sld [smem:[%s9864_s0 + %s8650_s7]]  }
  0x40   :  { %9934 = sst [smem:[#allocation90_spill]] %s8872_s19 }
  0x41   :  { %s8892_s19 = sld [smem:[%s9864_s0 + %s8649_s28]]  }
  0x42   :  { %9936 = sst [smem:[#allocation92_spill]] %s8882_s5 }
  0x43   :  { %82 = vsyncpa [#allocation3], 0 }
  0x44   :  { %83 = vsyncpa [#allocation6], 0 }
  0x45   :  { %84 = vsyncpa [#allocation9], 0 }
  0x46   :  { %85 = vsyncpa [#allocation12], 0 }
  0x47   :  { %86 = vsyncpa [#allocation15], 0 }
  0x48   :  { %87 = vsyncpa [#allocation18], 0 }
  0x49   :  { %88 = vsyncpa [#allocation21], 0 }
  0x4a   :  { %89 = vsyncpa [#allocation24], 0 }
  0x4b   :  { %90 = vsyncpa [#allocation27], 0 }
  0x4c   :  { %91 = vsyncpa [#allocation30], 0 }
  0x4d   :  { %92 = vsyncpa [#allocation33], 0 }
  0x4e   :  { %93 = vsyncpa [#allocation36], 0 }
  0x4f   :  { %94 = vsyncpa [#allocation39], 0 }
  0x50   :  { %95 = vsyncpa [#allocation42], 0 }
  0x51   :  { %96 = vsyncpa [#allocation45], 0 }
  0x52   :  { %97 = vsyncpa [#allocation48], 0 }
  0x53   :  { %98 = vsyncpa [#allocation4], 0 }
  0x54   :  { %100 = vsyncpa [#allocation4 + $0x1], 0  ;;  %s8899_s0 = smov 0   ;;  %s8901_s15 = smov 0  }
  0x55   :  { %s8903_s16 = smov 0   ;;  %s8905_s18 = smov 0  }
  0x56 LB: > { %9937 = sst [smem:[#allocation93_spill]] %s8599_s0  ;;  %s8920_s22 = sadd.s32 4294967295, %s8611_s18   ;;  %s8611_s18 = sphi %s8905_s18, %s10026_s18   ;;  %s8607_s16 = sphi %s8903_s16, %s10028_s16   ;;  %s8603_s15 = sphi %s8901_s15, %s10030_s15   ;;  %s8599_s0 = sphi %s8899_s0, %s10029_s0  }
  0x57   : > { %9938 = sst [smem:[#allocation94_spill]] %s8607_s16  ;;  %s6336_s23 = sadd.s32 4294967294, %s8611_s18  }
  0x58   : > { %9939 = sst [smem:[#allocation95_spill]] %s8611_s18  ;;  %s8924_s26 = sadd.s32 1, %s8611_s18  }
  0x59   : > { %9940 = sst [smem:[#allocation96_spill]] %s8924_s26  ;;  %s921_s28 = sadd.s32 1, %s8607_s16 }
  0x5a   : > { %s918_s1 = ssub.s32 %s8611_s18, %s8924_s26  ;;  %p931_p0 = scmp.ne.s32.totalorder %s8607_s16, %s8603_s15 }
  0x5b   : > { %p919_p1 = scmp.eq.s32.totalorder %s918_s1, 0  ;;  %p932_p2 = scmp.eq.s32.totalorder %s8920_s22, 1 }
  0x5c   : > { %p937_p3 = scmp.ne.s32.totalorder %s8603_s15, %s8599_s0  ;;  %p938_p4 = scmp.eq.s32.totalorder %s6336_s23, 1 }
  0x5d   : > { %s8935_s2 = scalar_select %p919_p1, %s8607_s16, %s921_s28  }
  0x5e   : > { %p8937_p5 = por %p932_p2, %p931_p0  ;;  %p8941_p6 = por %p938_p4, %p937_p3 }
  0x5f   : > { %9941 = sst [smem:[#allocation97_spill]] %s8935_s2  ;;  %p6337_p7 = scmp.ge.s32.totalorder %s8611_s18, 1 }
  0x60   : > { %s9942_s7 = scalar_select %p8937_p5, 1, 0 }
  0x61   : > { %s9943_s10 = scalar_select %p8941_p6, 1, 0 }
  0x62   : > { %p945_p8 = scmp.lt.s32.totalorder %s8611_s18, 3  ;;  %p9877_p9 = scmp.eq.s32.totalorder %s8920_s22, 0 }
  0x63   : > { %9944 = sst [smem:[#allocation98_spill]] %s9943_s10  ;;  %s8651_s23 = smov [#allocation5]  }
  0x64   : > { %p8948_p10 = pnand %p6337_p7, %p945_p8  ;;  %s970_s28 = sshll.u32 %s8651_s23, 4  ;;  %s971_s28 = int_to_ptr.vmem [resolvable:$true] %s970_s28 }
  0x65   : > { %s8652_s2 = smov [#allocation8]   ;;  %s8653_s26 = smov [#allocation11]  }
  0x66   : > { %s9945_s11 = scalar_select %p8948_p10, 1, 0 }
  0x67   : > { %p7313_p11 = pneg %p8948_p10  ;;  %s996_s16 = sshll.u32 %s8652_s2, 4  ;;  %s997_s16 = int_to_ptr.vmem [resolvable:$true] %s996_s16 }
  0x68   : > { %s1022_s10 = sshll.u32 %s8653_s26, 4  ;;  %s7718_s18 = scalar_lea.vmem %s971_s28, 32  ;;  %s1023_s10 = int_to_ptr.vmem [resolvable:$true] %s1022_s10 }
  0x69   : > { %p8956_p12 = pnand %p9877_p9, %p7313_p11  ;;  %p7719_p0 = scmp.ne.s32.totalorder %s971_s28, %s7718_s18 }
  0x6a   : > { %p7726_p3 = scmp.lt.s32.totalorder %s971_s28, %s971_s28  ;;  %p7727_p4 = scmp.lt.s32.totalorder %s7718_s18, %s7718_s18 }
  0x6b   : > { %p8962_p13 = pneg %p8956_p12 }
  0x6c   : > { %p7728_p7 = por %p7727_p4, %p7726_p3 }
  0x6d   : > { %p7721_p1 = pnand %p7719_p0, %p8962_p13 }
  0x6f   : > { %p7722_p2 = pneg %p7721_p1 }
  0x71   : > { %p7729_p8 = pnand %p7728_p7, %p7722_p2 }
  0x73   : > { %7732 = shalt.err (!%p7729_p8)
}
  0x74   : > { %s9880_s2 = smov 16   ;;  %s9948_s17 = sld [smem:[#allocation69_spill]] }
  0x75   : > { %s9882_s26 = smov 1   ;;  %s7744_s23 = scalar_lea.vmem %s997_s16, 32 }
  0x76   : > { %p7745_p11 = scmp.ne.s32.totalorder %s997_s16, %s7744_s23  ;;  %p7752_p9 = scmp.lt.s32.totalorder %s997_s16, %s997_s16 }
  0x77   : > { %p7753_p6 = scmp.lt.s32.totalorder %s7744_s23, %s7744_s23 }
  0x78   : > { %p7747_p0 = pnand %p7745_p11, %p8962_p13 }
  0x79   : > { %p7754_p3 = por %p7753_p6, %p7752_p9 }
  0x7a   : > { %7319 = dma.hbm_to_vmem [thread:$0]  (!%p8956_p12), %s9948_s17, 32, %s971_s28, [#allocation6], %s9880_s2, %s9880_s2, %s9882_s26  }
  0x7b   : > { %p7748_p1 = pneg %p7747_p0 }
  0x7d   : > { %p7755_p2 = pnand %p7754_p3, %p7748_p1 }
  0x7f   : > { %7758 = shalt.err (!%p7755_p2)
}
  0x80   : > { %s9949_s25 = sld [smem:[#allocation71_spill]]  ;;  %s7770_s18 = scalar_lea.vmem %s1023_s10, 32 }
  0x81   : > { %p7771_p4 = scmp.ne.s32.totalorder %s1023_s10, %s7770_s18  ;;  %p7778_p11 = scmp.lt.s32.totalorder %s1023_s10, %s1023_s10 }
  0x82   : > { %p7779_p0 = scmp.lt.s32.totalorder %s7770_s18, %s7770_s18 }
  0x83   : > { %p7773_p7 = pnand %p7771_p4, %p8962_p13 }
  0x84   : > { %p7780_p5 = por %p7779_p0, %p7778_p11 }
  0x85   : > { %p7774_p8 = pneg %p7773_p7 }
  0x86   : > { %7325 = dma.hbm_to_vmem [thread:$0]  (!%p8956_p12), %s9949_s25, 32, %s997_s16, [#allocation9], %s9880_s2, %s9880_s2, %s9882_s26  }
  0x87   : > { %p7781_p6 = pnand %p7780_p5, %p7774_p8 }
  0x89   : > { %7784 = shalt.err (!%p7781_p6)
}
  0x8a   : > { %s9950_s3 = sld [smem:[#allocation73_spill]]  ;;  %s8656_s16 = smov [#allocation14]  }
  0x8b   : > { %s1058_s28 = sshll.u32 %s8656_s16, 4  ;;  %s8657_s23 = smov [#allocation17]   ;;  %s1059_s28 = int_to_ptr.vmem [resolvable:$true] %s1058_s28 }
  0x8c   : > { %s1080_s17 = sshll.u32 %s8657_s23, 4  ;;  %s7796_s25 = scalar_lea.vmem %s1059_s28, 16  ;;  %s1081_s17 = int_to_ptr.vmem [resolvable:$true] %s1080_s17 }
  0x8d   : > { %p7797_p9 = scmp.ne.s32.totalorder %s1059_s28, %s7796_s25  ;;  %s7803_s18 = scalar_lea.vmem %s1059_s28, 32 }
  0x8e   : > { %p7804_p5 = scmp.lt.s32.totalorder %s1059_s28, %s1059_s28  ;;  %p7805_p2 = scmp.lt.s32.totalorder %s7803_s18, %s7796_s25 }
  0x8f   : > { %p7799_p1 = pnand %p7797_p9, %p8962_p13 }
  0x90   : > { %7331 = dma.hbm_to_vmem [thread:$0]  (!%p8956_p12), %s9950_s3, 32, %s1023_s10, [#allocation12], %s9880_s2, %s9880_s2, %s9882_s26  }
  0x91   : > { %p7800_p3 = pneg %p7799_p1  ;;  %p7806_p4 = por %p7805_p2, %p7804_p5 }
  0x93   : > { %p7807_p7 = pnand %p7806_p4, %p7800_p3 }
  0x95   : > { %7810 = shalt.err (!%p7807_p7)
}
  0x96   : > { %7337 = dma.hbm_to_vmem [thread:$0]  (!%p8956_p12), %s8767_s30, 16, %s1059_s28, [#allocation15]  }
  0x97   : > { %s7822_s10 = scalar_lea.vmem %s1081_s17, 16  ;;  %s7829_s16 = scalar_lea.vmem %s1081_s17, 32 }
  0x98   : > { %p7823_p8 = scmp.ne.s32.totalorder %s1081_s17, %s7822_s10  ;;  %p7830_p6 = scmp.lt.s32.totalorder %s1081_s17, %s1081_s17 }
  0x99   : > { %p7831_p9 = scmp.lt.s32.totalorder %s7829_s16, %s7822_s10 }
  0x9a   : > { %p7825_p11 = pnand %p7823_p8, %p8962_p13 }
  0x9b   : > { %p7832_p1 = por %p7831_p9, %p7830_p6 }
  0x9c   : > { %p7826_p0 = pneg %p7825_p11 }
  0x9e   : > { %p7833_p10 = pnand %p7832_p1, %p7826_p0 }
  0xa0   : > { %7836 = shalt.err (!%p7833_p10)
}
  0xa1   : > { %7343 = dma.hbm_to_vmem [thread:$0]  (!%p8956_p12), %s8777_s12, 16, %s1081_s17, [#allocation18]  }
  0xa2   : > { %s8658_s25 = smov [#allocation20]  }
  0xa3   : > { %s1102_s23 = sshll.u32 %s8658_s25, 4  ;;  %s1103_s23 = int_to_ptr.vmem [resolvable:$true] %s1102_s23 }
  0xa4   : > { %s7848_s28 = scalar_lea.vmem %s1103_s23, 16  ;;  %s7855_s18 = scalar_lea.vmem %s1103_s23, 32 }
  0xa5   : > { %p7849_p3 = scmp.ne.s32.totalorder %s1103_s23, %s7848_s28  ;;  %p7856_p4 = scmp.lt.s32.totalorder %s1103_s23, %s1103_s23 }
  0xa6   : > { %p7857_p7 = scmp.lt.s32.totalorder %s7855_s18, %s7848_s28 }
  0xa7   : > { %p7851_p5 = pnand %p7849_p3, %p8962_p13 }
  0xa8   : > { %p7858_p8 = por %p7857_p7, %p7856_p4 }
  0xa9   : > { %p7852_p2 = pneg %p7851_p5 }
  0xab   : > { %p7859_p11 = pnand %p7858_p8, %p7852_p2 }
  0xad   : > { %7862 = shalt.err (!%p7859_p11)
}
  0xae   : > { %7349 = dma.hbm_to_vmem [thread:$0]  (!%p8956_p12), %s8787_s27, 16, %s1103_s23, [#allocation21]  }
  0xaf   : > { %s8659_s17 = smov [#allocation23]   ;;  %s8660_s16 = smov [#allocation26]  }
  0xb0   : > { %s1126_s10 = sshll.u32 %s8659_s17, 4  ;;  %s1156_s25 = sshll.u32 %s8660_s16, 4  ;;  %s1127_s10 = int_to_ptr.vmem [resolvable:$true] %s1126_s10  ;;  %s1157_s25 = int_to_ptr.vmem [resolvable:$true] %s1156_s25 }
  0xb1   : > { %s7874_s2 = scalar_lea.vmem %s1127_s10, 256  ;;  %p7882_p9 = scmp.lt.s32.totalorder %s1127_s10, %s1127_s10 }
  0xb2   : > { %p7875_p10 = scmp.ne.s32.totalorder %s1127_s10, %s7874_s2  ;;  %p7883_p1 = scmp.lt.s32.totalorder %s7874_s2, %s7874_s2 }
  0xb4   : > { %p7877_p0 = pnand %p7875_p10, %p8962_p13  ;;  %p7884_p3 = por %p7883_p1, %p7882_p9 }
  0xb6   : > { %p7878_p6 = pneg %p7877_p0 }
  0xb8   : > { %p7885_p5 = pnand %p7884_p3, %p7878_p6 }
  0xba   : > { %7888 = shalt.err (!%p7885_p5)
}
  0xbb   : > { %s9884_s28 = smov 64   ;;  %s9886_s23 = smov 4  }
  0xbc   : > { %7355 = dma.hbm_to_vmem [thread:$0]  (!%p8956_p12), %s8802_s14, 256, %s1127_s10, [#allocation24], %s9884_s28, %s9884_s28, %s9886_s23  }
  0xbd   : > { %s7900_s18 = scalar_lea.vmem %s1157_s25, 16  ;;  %s7907_s17 = scalar_lea.vmem %s1157_s25, 32 }
  0xbe   : > { %p7901_p2 = scmp.ne.s32.totalorder %s1157_s25, %s7900_s18  ;;  %p7908_p8 = scmp.lt.s32.totalorder %s1157_s25, %s1157_s25 }
  0xbf   : > { %p7909_p11 = scmp.lt.s32.totalorder %s7907_s17, %s7900_s18 }
  0xc0   : > { %p7903_p4 = pnand %p7901_p2, %p8962_p13 }
  0xc1   : > { %p7910_p10 = por %p7909_p11, %p7908_p8 }
  0xc2   : > { %p7904_p7 = pneg %p7903_p4 }
  0xc4   : > { %p7911_p0 = pnand %p7910_p10, %p7904_p7 }
  0xc6   : > { %7914 = shalt.err (!%p7911_p0)
}
  0xc7   : > { %7361 = dma.hbm_to_vmem [thread:$0]  (!%p8956_p12), %s8817_s9, 16, %s1157_s25, [#allocation27]  }
  0xc8   : > { %s8663_s2 = smov [#allocation29]   ;;  %s8664_s26 = smov [#allocation32]  }
  0xc9   : > { %s1178_s16 = sshll.u32 %s8663_s2, 4  ;;  %s1200_s10 = sshll.u32 %s8664_s26, 4  ;;  %s1179_s16 = int_to_ptr.vmem [resolvable:$true] %s1178_s16  ;;  %s1201_s10 = int_to_ptr.vmem [resolvable:$true] %s1200_s10 }
  0xca   : > { %s7926_s28 = scalar_lea.vmem %s1179_s16, 16  ;;  %s7933_s18 = scalar_lea.vmem %s1179_s16, 32 }
  0xcb   : > { %p7927_p6 = scmp.ne.s32.totalorder %s1179_s16, %s7926_s28  ;;  %p7934_p3 = scmp.lt.s32.totalorder %s1179_s16, %s1179_s16 }
  0xcc   : > { %p7935_p5 = scmp.lt.s32.totalorder %s7933_s18, %s7926_s28 }
  0xcd   : > { %p7929_p9 = pnand %p7927_p6, %p8962_p13 }
  0xce   : > { %p7936_p2 = por %p7935_p5, %p7934_p3 }
  0xcf   : > { %p7930_p1 = pneg %p7929_p9 }
  0xd1   : > { %p7937_p4 = pnand %p7936_p2, %p7930_p1 }
  0xd3   : > { %7940 = shalt.err (!%p7937_p4)
}
  0xd4   : > { %7367 = dma.hbm_to_vmem [thread:$0]  (!%p8956_p12), %s8827_s8, 16, %s1179_s16, [#allocation30]  }
  0xd5   : > { %s7952_s25 = scalar_lea.vmem %s1201_s10, 16  ;;  %s7959_s26 = scalar_lea.vmem %s1201_s10, 32 }
  0xd6   : > { %p7953_p7 = scmp.ne.s32.totalorder %s1201_s10, %s7952_s25  ;;  %p7960_p10 = scmp.lt.s32.totalorder %s1201_s10, %s1201_s10 }
  0xd7   : > { %p7961_p0 = scmp.lt.s32.totalorder %s7959_s26, %s7952_s25 }
  0xd8   : > { %p7955_p8 = pnand %p7953_p7, %p8962_p13 }
  0xd9   : > { %p7962_p6 = por %p7961_p0, %p7960_p10 }
  0xda   : > { %p7956_p11 = pneg %p7955_p8 }
  0xdc   : > { %p7963_p9 = pnand %p7962_p6, %p7956_p11 }
  0xde   : > { %7966 = shalt.err (!%p7963_p9)
}
  0xdf   : > { %s9951_s4 = sld [smem:[#allocation86_spill]]  ;;  %s8665_s28 = smov [#allocation35]  }
  0xe0   : > { %s1222_s17 = sshll.u32 %s8665_s28, 4  ;;  %s8666_s2 = smov [#allocation38]   ;;  %s1223_s17 = int_to_ptr.vmem [resolvable:$true] %s1222_s17 }
  0xe1   : > { %s1244_s16 = sshll.u32 %s8666_s2, 4  ;;  %s7978_s18 = scalar_lea.vmem %s1223_s17, 16  ;;  %s1245_s16 = int_to_ptr.vmem [resolvable:$true] %s1244_s16 }
  0xe2   : > { %p7979_p1 = scmp.ne.s32.totalorder %s1223_s17, %s7978_s18  ;;  %s7985_s25 = scalar_lea.vmem %s1223_s17, 32 }
  0xe3   : > { %p7986_p2 = scmp.lt.s32.totalorder %s1223_s17, %s1223_s17  ;;  %p7987_p4 = scmp.lt.s32.totalorder %s7985_s25, %s7978_s18 }
  0xe4   : > { %p7981_p3 = pnand %p7979_p1, %p8962_p13 }
  0xe5   : > { %7373 = dma.hbm_to_vmem [thread:$0]  (!%p8956_p12), %s9951_s4, 16, %s1201_s10, [#allocation33]  }
  0xe6   : > { %p7982_p5 = pneg %p7981_p3  ;;  %p7988_p7 = por %p7987_p4, %p7986_p2 }
  0xe8   : > { %p7989_p8 = pnand %p7988_p7, %p7982_p5 }
  0xea   : > { %7992 = shalt.err (!%p7989_p8)
}
  0xeb   : > { %7379 = dma.hbm_to_vmem [thread:$0]  (!%p8956_p12), %s8847_s20, 16, %s1223_s17, [#allocation36]  }
  0xec   : > { %s8004_s10 = scalar_lea.vmem %s1245_s16, 16  ;;  %s8011_s26 = scalar_lea.vmem %s1245_s16, 32 }
  0xed   : > { %p8005_p11 = scmp.ne.s32.totalorder %s1245_s16, %s8004_s10  ;;  %p8012_p6 = scmp.lt.s32.totalorder %s1245_s16, %s1245_s16 }
  0xee   : > { %p8013_p9 = scmp.lt.s32.totalorder %s8011_s26, %s8004_s10 }
  0xef   : > { %p8007_p10 = pnand %p8005_p11, %p8962_p13 }
  0xf0   : > { %p8014_p1 = por %p8013_p9, %p8012_p6 }
  0xf1   : > { %p8008_p0 = pneg %p8007_p10 }
  0xf3   : > { %p8015_p3 = pnand %p8014_p1, %p8008_p0 }
  0xf5   : > { %8018 = shalt.err (!%p8015_p3)
}
  0xf6   : > { %7385 = dma.hbm_to_vmem [thread:$0]  (!%p8956_p12), %s8857_s6, 16, %s1245_s16, [#allocation39]  }
  0xf7   : > { %s8667_s28 = smov [#allocation41]   ;;  %s8668_s18 = smov [#allocation44]  }
  0xf8   : > { %s1267_s2 = sshll.u32 %s8667_s28, 4  ;;  %s1296_s17 = sshll.u32 %s8668_s18, 4  ;;  %s1268_s2 = int_to_ptr.vmem [resolvable:$true] %s1267_s2  ;;  %s1297_s17 = int_to_ptr.vmem [resolvable:$true] %s1296_s17 }
  0xf9   : > { %s8030_s25 = scalar_lea.vmem %s1268_s2, 256  ;;  %p8038_p7 = scmp.lt.s32.totalorder %s1268_s2, %s1268_s2 }
  0xfa   : > { %p8031_p5 = scmp.ne.s32.totalorder %s1268_s2, %s8030_s25  ;;  %p8039_p8 = scmp.lt.s32.totalorder %s8030_s25, %s8030_s25 }
  0xfc   : > { %p8033_p2 = pnand %p8031_p5, %p8962_p13  ;;  %p8040_p11 = por %p8039_p8, %p8038_p7 }
  0xfe   : > { %p8034_p4 = pneg %p8033_p2 }
 0x100   : > { %p8041_p10 = pnand %p8040_p11, %p8034_p4 }
 0x102   : > { %8044 = shalt.err (!%p8041_p10)
}
 0x103   : > { %s9952_s16 = smov 64   ;;  %s8056_s10 = scalar_lea.vmem %s1297_s17, 256 }
 0x104   : > { %7391 = dma.hbm_to_vmem [thread:$0]  (!%p8956_p12), %s8867_s24, 256, %s1268_s2, [#allocation42], %s9952_s16, %s9952_s16, %s9886_s23  }
 0x105   : > { %p8057_p0 = scmp.ne.s32.totalorder %s1297_s17, %s8056_s10  ;;  %p8064_p1 = scmp.lt.s32.totalorder %s1297_s17, %s1297_s17 }
 0x106   : > { %p8065_p3 = scmp.lt.s32.totalorder %s8056_s10, %s8056_s10 }
 0x107   : > { %p8059_p6 = pnand %p8057_p0, %p8962_p13 }
 0x108   : > { %p8066_p5 = por %p8065_p3, %p8064_p1 }
 0x109   : > { %p8060_p9 = pneg %p8059_p6 }
 0x10b   : > { %p8067_p2 = pnand %p8066_p5, %p8060_p9 }
 0x10d   : > { %8070 = shalt.err (!%p8067_p2)
}
 0x10e   : > { %s9953_s5 = sld [smem:[#allocation92_spill]]  ;;  %s8669_s26 = smov [#allocation2]  }
 0x10f   : > { %s957_s28 = sshll.u32 %s8669_s26, 4  ;;  %s8670_s2 = smov [#allocation7]   ;;  %s958_s28 = int_to_ptr.vmem [resolvable:$true] %s957_s28 }
 0x110   : > { %s983_s18 = sshll.u32 %s8670_s2, 4  ;;  %s8082_s25 = scalar_lea.vmem %s958_s28, 32  ;;  %s984_s18 = int_to_ptr.vmem [resolvable:$true] %s983_s18 }
 0x111   : > { %p8083_p4 = scmp.ne.s32.totalorder %s958_s28, %s8082_s25  ;;  %p8090_p11 = scmp.lt.s32.totalorder %s958_s28, %s958_s28 }
 0x112   : > { %p8091_p10 = scmp.lt.s32.totalorder %s8082_s25, %s8082_s25 }
 0x113   : > { %p8085_p7 = pnand %p8083_p4, %p8962_p13 }
 0x114   : > { %7397 = dma.hbm_to_vmem [thread:$0]  (!%p8956_p12), %s9953_s5, 256, %s1297_s17, [#allocation45], %s9952_s16, %s9952_s16, %s9886_s23  }
 0x115   : > { %p8086_p8 = pneg %p8085_p7  ;;  %p8092_p0 = por %p8091_p10, %p8090_p11 }
 0x117   : > { %p8093_p6 = pnand %p8092_p0, %p8086_p8 }
 0x119   : > { %8096 = shalt.err (!%p8093_p6)
}
 0x11a   : > { %s9954_s10 = smov 1   ;;  %s9955_s17 = smov 16  }
 0x11b   : > { %7316 = dma.hbm_to_vmem [thread:$0]  (!%p8956_p12), %s8717_s13, 32, %s958_s28, [#allocation3], %s9955_s17, %s9955_s17, %s9954_s10  }
 0x11c   : > { %s8108_s26 = scalar_lea.vmem %s984_s18, 32  ;;  %p8116_p5 = scmp.lt.s32.totalorder %s984_s18, %s984_s18 }
 0x11d   : > { %p8109_p9 = scmp.ne.s32.totalorder %s984_s18, %s8108_s26  ;;  %p8117_p2 = scmp.lt.s32.totalorder %s8108_s26, %s8108_s26 }
 0x11f   : > { %p8111_p1 = pnand %p8109_p9, %p8962_p13  ;;  %p8118_p4 = por %p8117_p2, %p8116_p5 }
 0x121   : > { %p8112_p3 = pneg %p8111_p1 }
 0x123   : > { %p8119_p7 = pnand %p8118_p4, %p8112_p3 }
 0x125   : > { %8122 = shalt.err (!%p8119_p7)
}
 0x126   : > { %s9956_s2 = sld [smem:[#allocation70_spill]]  ;;  %s8671_s25 = smov [#allocation10]  }
 0x127   : > { %s1009_s28 = sshll.u32 %s8671_s25, 4  ;;  %s8672_s23 = smov [#allocation13]   ;;  %s1010_s28 = int_to_ptr.vmem [resolvable:$true] %s1009_s28 }
 0x128   : > { %s1044_s3 = sshll.u32 %s8672_s23, 4  ;;  %s8134_s4 = scalar_lea.vmem %s1010_s28, 32  ;;  %s1045_s3 = int_to_ptr.vmem [resolvable:$true] %s1044_s3 }
 0x129   : > { %p8135_p8 = scmp.ne.s32.totalorder %s1010_s28, %s8134_s4  ;;  %p8142_p0 = scmp.lt.s32.totalorder %s1010_s28, %s1010_s28 }
 0x12a   : > { %p8143_p6 = scmp.lt.s32.totalorder %s8134_s4, %s8134_s4 }
 0x12b   : > { %p8137_p11 = pnand %p8135_p8, %p8962_p13 }
 0x12c   : > { %7322 = dma.hbm_to_vmem [thread:$0]  (!%p8956_p12), %s9956_s2, 32, %s984_s18, [#allocation6], %s9955_s17, %s9955_s17, %s9954_s10  }
 0x12d   : > { %p8138_p10 = pneg %p8137_p11  ;;  %p8144_p9 = por %p8143_p6, %p8142_p0 }
 0x12f   : > { %p8145_p1 = pnand %p8144_p9, %p8138_p10 }
 0x131   : > { %8148 = shalt.err (!%p8145_p1)
}
 0x132   : > { %s9957_s18 = sld [smem:[#allocation72_spill]]  ;;  %s8160_s23 = scalar_lea.vmem %s1045_s3, 512 }
 0x133   : > { %p8161_p3 = scmp.ne.s32.totalorder %s1045_s3, %s8160_s23  ;;  %p8168_p4 = scmp.lt.s32.totalorder %s1045_s3, %s1045_s3 }
 0x134   : > { %p8169_p7 = scmp.lt.s32.totalorder %s8160_s23, %s8160_s23 }
 0x135   : > { %p8163_p5 = pnand %p8161_p3, %p8962_p13 }
 0x136   : > { %p8170_p8 = por %p8169_p7, %p8168_p4 }
 0x137   : > { %p8164_p2 = pneg %p8163_p5 }
 0x138   : > { %7328 = dma.hbm_to_vmem [thread:$0]  (!%p8956_p12), %s9957_s18, 32, %s1010_s28, [#allocation9], %s9955_s17, %s9955_s17, %s9954_s10  }
 0x139   : > { %p8171_p11 = pnand %p8170_p8, %p8164_p2 }
 0x13b   : > { %8174 = shalt.err (!%p8171_p11)
}
 0x13c   : > { %s9958_s4 = smov 4   ;;  %s9959_s26 = sld [smem:[#allocation77_spill]] }
 0x13d   : > { %s8673_s2 = smov [#allocation16]   ;;  %s8674_s17 = smov [#allocation19]  }
 0x13e   : > { %s1069_s10 = sshll.u32 %s8673_s2, 4  ;;  %s1091_s25 = sshll.u32 %s8674_s17, 4  ;;  %s1070_s10 = int_to_ptr.vmem [resolvable:$true] %s1069_s10  ;;  %s1092_s25 = int_to_ptr.vmem [resolvable:$true] %s1091_s25 }
 0x13f   : > { %s8186_s28 = scalar_lea.vmem %s1070_s10, 16  ;;  %s8193_s18 = scalar_lea.vmem %s1070_s10, 32 }
 0x140   : > { %p8187_p10 = scmp.ne.s32.totalorder %s1070_s10, %s8186_s28  ;;  %p8194_p9 = scmp.lt.s32.totalorder %s1070_s10, %s1070_s10 }
 0x141   : > { %p8195_p1 = scmp.lt.s32.totalorder %s8193_s18, %s8186_s28 }
 0x142   : > { %7334 = dma.hbm_to_vmem [thread:$0]  (!%p8956_p12), %s9959_s26, 512, %s1045_s3, [#allocation12], %s9952_s16, %s9952_s16, %s9958_s4  }
 0x143   : > { %p8189_p0 = pnand %p8187_p10, %p8962_p13  ;;  %p8196_p3 = por %p8195_p1, %p8194_p9 }
 0x145   : > { %p8190_p6 = pneg %p8189_p0 }
 0x147   : > { %p8197_p5 = pnand %p8196_p3, %p8190_p6 }
 0x149   : > { %8200 = shalt.err (!%p8197_p5)
}
 0x14a   : > { %s9960_s3 = sld [smem:[#allocation78_spill]]  ;;  %s8212_s23 = scalar_lea.vmem %s1092_s25, 16 }
 0x14b   : > { %p8213_p2 = scmp.ne.s32.totalorder %s1092_s25, %s8212_s23  ;;  %s8219_s26 = scalar_lea.vmem %s1092_s25, 32 }
 0x14c   : > { %p8220_p8 = scmp.lt.s32.totalorder %s1092_s25, %s1092_s25  ;;  %p8221_p11 = scmp.lt.s32.totalorder %s8219_s26, %s8212_s23 }
 0x14d   : > { %p8215_p4 = pnand %p8213_p2, %p8962_p13 }
 0x14e   : > { %p8222_p10 = por %p8221_p11, %p8220_p8 }
 0x14f   : > { %p8216_p7 = pneg %p8215_p4 }
 0x150   : > { %7340 = dma.hbm_to_vmem [thread:$0]  (!%p8956_p12), %s9960_s3, 16, %s1070_s10, [#allocation15]  }
 0x151   : > { %p8223_p0 = pnand %p8222_p10, %p8216_p7 }
 0x153   : > { %8226 = shalt.err (!%p8223_p0)
}
 0x154   : > { %s9961_s2 = sld [smem:[#allocation79_spill]]  ;;  %s8675_s17 = smov [#allocation22]  }
 0x155   : > { %s1113_s28 = sshll.u32 %s8675_s17, 4  ;;  %s8676_s18 = smov [#allocation25]   ;;  %s1114_s28 = int_to_ptr.vmem [resolvable:$true] %s1113_s28 }
 0x156   : > { %s1142_s10 = sshll.u32 %s8676_s18, 4  ;;  %s8238_s3 = scalar_lea.vmem %s1114_s28, 16  ;;  %s1143_s10 = int_to_ptr.vmem [resolvable:$true] %s1142_s10 }
 0x157   : > { %p8239_p6 = scmp.ne.s32.totalorder %s1114_s28, %s8238_s3  ;;  %s8245_s23 = scalar_lea.vmem %s1114_s28, 32 }
 0x158   : > { %p8246_p3 = scmp.lt.s32.totalorder %s1114_s28, %s1114_s28  ;;  %p8247_p5 = scmp.lt.s32.totalorder %s8245_s23, %s8238_s3 }
 0x159   : > { %p8241_p9 = pnand %p8239_p6, %p8962_p13 }
 0x15a   : > { %7346 = dma.hbm_to_vmem [thread:$0]  (!%p8956_p12), %s9961_s2, 16, %s1092_s25, [#allocation18]  }
 0x15b   : > { %p8242_p1 = pneg %p8241_p9  ;;  %p8248_p2 = por %p8247_p5, %p8246_p3 }
 0x15d   : > { %p8249_p4 = pnand %p8248_p2, %p8242_p1 }
 0x15f   : > { %8252 = shalt.err (!%p8249_p4)
}
 0x160   : > { %s9962_s25 = sld [smem:[#allocation80_spill]]  ;;  %s8264_s26 = scalar_lea.vmem %s1143_s10, 256 }
 0x161   : > { %p8265_p7 = scmp.ne.s32.totalorder %s1143_s10, %s8264_s26  ;;  %p8272_p10 = scmp.lt.s32.totalorder %s1143_s10, %s1143_s10 }
 0x162   : > { %p8273_p0 = scmp.lt.s32.totalorder %s8264_s26, %s8264_s26 }
 0x163   : > { %p8267_p8 = pnand %p8265_p7, %p8962_p13 }
 0x164   : > { %p8274_p6 = por %p8273_p0, %p8272_p10 }
 0x165   : > { %p8268_p11 = pneg %p8267_p8 }
 0x166   : > { %7352 = dma.hbm_to_vmem [thread:$0]  (!%p8956_p12), %s9962_s25, 16, %s1114_s28, [#allocation21]  }
 0x167   : > { %p8275_p9 = pnand %p8274_p6, %p8268_p11 }
 0x169   : > { %8278 = shalt.err (!%p8275_p9)
}
 0x16a   : > { %s9963_s2 = sld [smem:[#allocation83_spill]]  ;;  %s8677_s17 = smov [#allocation28]  }
 0x16b   : > { %s1167_s28 = sshll.u32 %s8677_s17, 4  ;;  %s8678_s18 = smov [#allocation31]   ;;  %s1168_s28 = int_to_ptr.vmem [resolvable:$true] %s1167_s28 }
 0x16c   : > { %s1189_s3 = sshll.u32 %s8678_s18, 4  ;;  %s8290_s23 = scalar_lea.vmem %s1168_s28, 16  ;;  %s1190_s3 = int_to_ptr.vmem [resolvable:$true] %s1189_s3 }
 0x16d   : > { %p8291_p1 = scmp.ne.s32.totalorder %s1168_s28, %s8290_s23  ;;  %s8297_s25 = scalar_lea.vmem %s1168_s28, 32 }
 0x16e   : > { %p8298_p2 = scmp.lt.s32.totalorder %s1168_s28, %s1168_s28  ;;  %p8299_p4 = scmp.lt.s32.totalorder %s8297_s25, %s8290_s23 }
 0x16f   : > { %p8293_p3 = pnand %p8291_p1, %p8962_p13 }
 0x170   : > { %7358 = dma.hbm_to_vmem [thread:$0]  (!%p8956_p12), %s9963_s2, 256, %s1143_s10, [#allocation24], %s9952_s16, %s9952_s16, %s9958_s4  }
 0x171   : > { %p8294_p5 = pneg %p8293_p3  ;;  %p8300_p7 = por %p8299_p4, %p8298_p2 }
 0x173   : > { %p8301_p8 = pnand %p8300_p7, %p8294_p5 }
 0x175   : > { %8304 = shalt.err (!%p8301_p8)
}
 0x176   : > { %s9964_s10 = sld [smem:[#allocation84_spill]]  ;;  %s8316_s26 = scalar_lea.vmem %s1190_s3, 16 }
 0x177   : > { %p8317_p11 = scmp.ne.s32.totalorder %s1190_s3, %s8316_s26  ;;  %s8323_s2 = scalar_lea.vmem %s1190_s3, 32 }
 0x178   : > { %p8324_p6 = scmp.lt.s32.totalorder %s1190_s3, %s1190_s3  ;;  %p8325_p9 = scmp.lt.s32.totalorder %s8323_s2, %s8316_s26 }
 0x179   : > { %p8319_p10 = pnand %p8317_p11, %p8962_p13 }
 0x17a   : > { %p8326_p1 = por %p8325_p9, %p8324_p6 }
 0x17b   : > { %p8320_p0 = pneg %p8319_p10 }
 0x17c   : > { %7364 = dma.hbm_to_vmem [thread:$0]  (!%p8956_p12), %s9964_s10, 16, %s1168_s28, [#allocation27]  }
 0x17d   : > { %p8327_p3 = pnand %p8326_p1, %p8320_p0 }
 0x17f   : > { %8330 = shalt.err (!%p8327_p3)
}
 0x180   : > { %s9965_s17 = sld [smem:[#allocation85_spill]]  ;;  %s8679_s18 = smov [#allocation34]  }
 0x181   : > { %s1211_s23 = sshll.u32 %s8679_s18, 4  ;;  %s8680_s25 = smov [#allocation37]   ;;  %s1212_s23 = int_to_ptr.vmem [resolvable:$true] %s1211_s23 }
 0x182   : > { %s1233_s28 = sshll.u32 %s8680_s25, 4  ;;  %s8342_s10 = scalar_lea.vmem %s1212_s23, 16  ;;  %s1234_s28 = int_to_ptr.vmem [resolvable:$true] %s1233_s28 }
 0x183   : > { %p8343_p5 = scmp.ne.s32.totalorder %s1212_s23, %s8342_s10  ;;  %s8349_s26 = scalar_lea.vmem %s1212_s23, 32 }
 0x184   : > { %p8350_p7 = scmp.lt.s32.totalorder %s1212_s23, %s1212_s23  ;;  %p8351_p8 = scmp.lt.s32.totalorder %s8349_s26, %s8342_s10 }
 0x185   : > { %p8345_p2 = pnand %p8343_p5, %p8962_p13 }
 0x186   : > { %7370 = dma.hbm_to_vmem [thread:$0]  (!%p8956_p12), %s9965_s17, 16, %s1190_s3, [#allocation30]  }
 0x187   : > { %p8346_p4 = pneg %p8345_p2  ;;  %p8352_p11 = por %p8351_p8, %p8350_p7 }
 0x189   : > { %p8353_p10 = pnand %p8352_p11, %p8346_p4 }
 0x18b   : > { %8356 = shalt.err (!%p8353_p10)
}
 0x18c   : > { %s9966_s3 = sld [smem:[#allocation87_spill]]  ;;  %s8368_s2 = scalar_lea.vmem %s1234_s28, 16 }
 0x18d   : > { %p8369_p0 = scmp.ne.s32.totalorder %s1234_s28, %s8368_s2  ;;  %s8375_s17 = scalar_lea.vmem %s1234_s28, 32 }
 0x18e   : > { %p8376_p1 = scmp.lt.s32.totalorder %s1234_s28, %s1234_s28  ;;  %p8377_p3 = scmp.lt.s32.totalorder %s8375_s17, %s8368_s2 }
 0x18f   : > { %p8371_p6 = pnand %p8369_p0, %p8962_p13 }
 0x190   : > { %p8378_p5 = por %p8377_p3, %p8376_p1 }
 0x191   : > { %p8372_p9 = pneg %p8371_p6 }
 0x192   : > { %7376 = dma.hbm_to_vmem [thread:$0]  (!%p8956_p12), %s9966_s3, 16, %s1212_s23, [#allocation33]  }
 0x193   : > { %p8379_p2 = pnand %p8378_p5, %p8372_p9 }
 0x195   : > { %8382 = shalt.err (!%p8379_p2)
}
 0x196   : > { %s9967_s18 = sld [smem:[#allocation88_spill]]  ;;  %s8681_s25 = smov [#allocation40]  }
 0x197   : > { %s1254_s10 = sshll.u32 %s8681_s25, 4  ;;  %s8682_s26 = smov [#allocation43]   ;;  %s1255_s10 = int_to_ptr.vmem [resolvable:$true] %s1254_s10 }
 0x198   : > { %s1283_s23 = sshll.u32 %s8682_s26, 4  ;;  %s8394_s3 = scalar_lea.vmem %s1255_s10, 256  ;;  %s1284_s23 = int_to_ptr.vmem [resolvable:$true] %s1283_s23 }
 0x199   : > { %p8395_p4 = scmp.ne.s32.totalorder %s1255_s10, %s8394_s3  ;;  %p8402_p11 = scmp.lt.s32.totalorder %s1255_s10, %s1255_s10 }
 0x19a   : > { %p8403_p10 = scmp.lt.s32.totalorder %s8394_s3, %s8394_s3 }
 0x19b   : > { %p8397_p7 = pnand %p8395_p4, %p8962_p13 }
 0x19c   : > { %7382 = dma.hbm_to_vmem [thread:$0]  (!%p8956_p12), %s9967_s18, 16, %s1234_s28, [#allocation36]  }
 0x19d   : > { %p8398_p8 = pneg %p8397_p7  ;;  %p8404_p0 = por %p8403_p10, %p8402_p11 }
 0x19f   : > { %p8405_p6 = pnand %p8404_p0, %p8398_p8 }
 0x1a1   : > { %8408 = shalt.err (!%p8405_p6)
}
 0x1a2   : > { %s9968_s28 = sld [smem:[#allocation89_spill]]  ;;  %s8420_s2 = scalar_lea.vmem %s1284_s23, 256 }
 0x1a3   : > { %p8421_p9 = scmp.ne.s32.totalorder %s1284_s23, %s8420_s2  ;;  %p8428_p5 = scmp.lt.s32.totalorder %s1284_s23, %s1284_s23 }
 0x1a4   : > { %p8429_p2 = scmp.lt.s32.totalorder %s8420_s2, %s8420_s2 }
 0x1a5   : > { %p8423_p1 = pnand %p8421_p9, %p8962_p13 }
 0x1a6   : > { %p8430_p4 = por %p8429_p2, %p8428_p5 }
 0x1a7   : > { %p8424_p3 = pneg %p8423_p1 }
 0x1a8   : > { %7388 = dma.hbm_to_vmem [thread:$0]  (!%p8956_p12), %s9968_s28, 256, %s1255_s10, [#allocation39], %s9952_s16, %s9952_s16, %s9958_s4  }
 0x1a9   : > { %p8431_p7 = pnand %p8430_p4, %p8424_p3 }
 0x1ab   : > { %8434 = shalt.err (!%p8431_p7)
}
 0x1ac   : > { %s9969_s17 = sld [smem:[#allocation91_spill]]  ;;  %s8683_s18 = smov [#allocation46]  }
 0x1ad   : > { %s1309_s25 = sshll.u32 %s8683_s18, 4  ;;  %s8684_s10 = smov [#allocation47]   ;;  %s1310_s25 = int_to_ptr.vmem [resolvable:$true] %s1309_s25 }
 0x1ae   : > { %s1322_s26 = sshll.u32 %s8684_s10, 4  ;;  %s8446_s3 = scalar_lea.vmem %s1310_s25, 256  ;;  %s1323_s26 = int_to_ptr.vmem [resolvable:$true] %s1322_s26 }
 0x1af   : > { %p8447_p8 = scmp.ne.s32.totalorder %s1310_s25, %s8446_s3  ;;  %p8454_p0 = scmp.lt.s32.totalorder %s1310_s25, %s1310_s25 }
 0x1b0   : > { %p8455_p6 = scmp.lt.s32.totalorder %s8446_s3, %s8446_s3 }
 0x1b1   : > { %p8449_p11 = pnand %p8447_p8, %p8962_p13 }
 0x1b2   : > { %7394 = dma.hbm_to_vmem [thread:$0]  (!%p8956_p12), %s9969_s17, 256, %s1284_s23, [#allocation42], %s9952_s16, %s9952_s16, %s9958_s4  }
 0x1b3   : > { %p8450_p10 = pneg %p8449_p11  ;;  %p8456_p9 = por %p8455_p6, %p8454_p0 }
 0x1b5   : > { %p8457_p1 = pnand %p8456_p9, %p8450_p10 }
 0x1b7   : > { %8460 = shalt.err (!%p8457_p1)
}
 0x1b8   : > { %7400 = dma.hbm_to_vmem [thread:$0]  (!%p8956_p12), %s8887_s21, 256, %s1310_s25, [#allocation45], %s9952_s16, %s9952_s16, %s9958_s4  }
 0x1b9   : > { %s8472_s23 = scalar_lea.vmem %s1323_s26, 256  ;;  %p8480_p4 = scmp.lt.s32.totalorder %s1323_s26, %s1323_s26 }
 0x1ba   : > { %p8473_p3 = scmp.ne.s32.totalorder %s1323_s26, %s8472_s23  ;;  %p8481_p7 = scmp.lt.s32.totalorder %s8472_s23, %s8472_s23 }
 0x1bc   : > { %p8475_p5 = pnand %p8473_p3, %p8962_p13  ;;  %p8482_p8 = por %p8481_p7, %p8480_p4 }
 0x1be   : > { %p8476_p2 = pneg %p8475_p5 }
 0x1c0   : > { %p8483_p11 = pnand %p8482_p8, %p8476_p2 }
 0x1c2   : > { %8486 = shalt.err (!%p8483_p11)
}
 0x1c3   : > { %7403 = dma.hbm_to_vmem [thread:$0]  (!%p8956_p12), %s8892_s19, 256, %s1323_s26, [#allocation48], %s9952_s16, %s9952_s16, %s9958_s4  }
 0x1c4   : > { %p9970_p10 = scmp.ne.s32.totalorder %s9945_s11, 0 }
 0x1c5   : > { %p9971_p0 = scmp.eq.s32.totalorder (!%p9970_p10), %s8920_s22, 0 }
 0x1c6   : > { %1352 = sbr.rel (%p9970_p10) target bundleno = 9646 (0x25ae), region = 172 }
 0x1cb   : > { %8530 = dma.done.wait (%p9971_p0), [#allocation3], 32   ;;  %p9972_p13 = pmov %p9971_p0 }
 0x1cc   : > { %p9973_p6 = pmov %p9971_p0 }
 0x1cd   : > { %8532 = vsyncadd (%p9972_p13), [#allocation3], 4294967264 }
 0x1ce   : > { %8534 = dma.done.wait (%p9973_p6), [#allocation6], 64   ;;  %p9974_p9 = pmov %p9971_p0 }
 0x1cf   : > { %p9975_p1 = pmov %p9971_p0 }
 0x1d0   : > { %8536 = vsyncadd (%p9974_p9), [#allocation6], 4294967232 }
 0x1d1   : > { %8538 = dma.done.wait (%p9975_p1), [#allocation9], 64   ;;  %p9976_p12 = pmov %p9971_p0 }
 0x1d2   : > { %p9977_p3 = pmov %p9971_p0 }
 0x1d3   : > { %8540 = vsyncadd (%p9976_p12), [#allocation9], 4294967232 }
 0x1d4   : > { %8542 = dma.done.wait (%p9977_p3), [#allocation12], 544   ;;  %p9978_p5 = pmov %p9971_p0 }
 0x1d5   : > { %p9979_p2 = pmov %p9971_p0 }
 0x1d6   : > { %8544 = vsyncadd (%p9978_p5), [#allocation12], 4294966752 }
 0x1d7   : > { %8546 = dma.done.wait (%p9979_p2), [#allocation15], 32   ;;  %p9980_p4 = pmov %p9971_p0 }
 0x1d8   : > { %p9981_p7 = pmov %p9971_p0 }
 0x1d9   : > { %8548 = vsyncadd (%p9980_p4), [#allocation15], 4294967264 }
 0x1da   : > { %8550 = dma.done.wait (%p9981_p7), [#allocation18], 32   ;;  %p9982_p8 = pmov %p9971_p0 }
 0x1db   : > { %p9983_p11 = pmov %p9971_p0 }
 0x1dc   : > { %8552 = vsyncadd (%p9982_p8), [#allocation18], 4294967264 }
 0x1dd   : > { %8554 = dma.done.wait (%p9983_p11), [#allocation21], 32   ;;  %p9984_p10 = pmov %p9971_p0 }
 0x1df   : > { %8556 = vsyncadd (%p9984_p10), [#allocation21], 4294967264 }
 0x1e0   : > { %8558 = dma.done.wait (%p9971_p0), [#allocation24], 512   ;;  %p9985_p13 = pmov %p9971_p0 }
 0x1e1   : > { %p9986_p6 = pmov %p9971_p0 }
 0x1e2   : > { %8560 = vsyncadd (%p9985_p13), [#allocation24], 4294966784 }
 0x1e3   : > { %8562 = dma.done.wait (%p9986_p6), [#allocation27], 32   ;;  %p9987_p9 = pmov %p9971_p0 }
 0x1e4   : > { %p9988_p1 = pmov %p9971_p0 }
 0x1e5   : > { %8564 = vsyncadd (%p9987_p9), [#allocation27], 4294967264 }
 0x1e6   : > { %8566 = dma.done.wait (%p9988_p1), [#allocation30], 32   ;;  %p9989_p12 = pmov %p9971_p0 }
 0x1e7   : > { %p9990_p3 = pmov %p9971_p0 }
 0x1e8   : > { %8568 = vsyncadd (%p9989_p12), [#allocation30], 4294967264 }
 0x1e9   : > { %8570 = dma.done.wait (%p9990_p3), [#allocation33], 32   ;;  %p9991_p5 = pmov %p9971_p0 }
 0x1ea   : > { %p9992_p2 = pmov %p9971_p0 }
 0x1eb   : > { %8572 = vsyncadd (%p9991_p5), [#allocation33], 4294967264 }
 0x1ec   : > { %8574 = dma.done.wait (%p9992_p2), [#allocation36], 32   ;;  %p9993_p4 = pmov %p9971_p0 }
 0x1ed   : > { %p9994_p7 = pmov %p9971_p0 }
 0x1ee   : > { %8576 = vsyncadd (%p9993_p4), [#allocation36], 4294967264 }
 0x1ef   : > { %8578 = dma.done.wait (%p9994_p7), [#allocation39], 272   ;;  %p9995_p8 = pmov %p9971_p0 }
 0x1f0   : > { %p9996_p11 = pmov %p9971_p0 }
 0x1f1   : > { %8580 = vsyncadd (%p9995_p8), [#allocation39], 4294967024 }
 0x1f2   : > { %8582 = dma.done.wait (%p9996_p11), [#allocation42], 512   ;;  %p9997_p10 = pmov %p9971_p0 }
 0x1f4   : > { %8584 = vsyncadd (%p9997_p10), [#allocation42], 4294966784 }
 0x1f5   : > { %8586 = dma.done.wait (%p9971_p0), [#allocation45], 512   ;;  %p9998_p13 = pmov %p9971_p0 }
 0x1f6   : > { %p9999_p6 = pmov %p9971_p0 }
 0x1f7   : > { %8588 = vsyncadd (%p9998_p13), [#allocation45], 4294966784 }
 0x1f8   : > { %8590 = dma.done.wait (%p9999_p6), [#allocation48], 256   ;;  %p10000_p9 = pmov %p9971_p0 }
 0x1f9   : > { %s10001_s0 = sld [smem:[#allocation67_spill]]  ;;  %p1565_p1 = scmp.lt.s32.totalorder %s8920_s22, 1  ;;  %v8685_v0 = vmov 0.0   ;;  %vm8686_vm0 = vmmov 0   ;;  %v7586_v1 = vld [vmem:[#allocation13 + $0x8] sm:$0xff]   ;;  %v7587_v2 = vld [vmem:[#allocation13] sm:$0xff]  }
 0x1fa   : > { %8592 = vsyncadd (%p10000_p9), [#allocation48], 4294967040  ;;  %6713 = vmatprep.subr.bf16.mxu0 %v8685_v0  ;;  %6717 = vmatprep.mubr.msk.bf16.mxu0 %vm8686_vm0, %v8685_v0  ;;  %vm1606_vm1 = vcmask 261120   ;;  %v6403_v4 = vld [vmem:[#allocation8] ss:$0 sm:$0xff]  ;;  %s9903_s4 = smov 120  }
 0x1fb   : > { %s9232_s11 = scalar_select %p1565_p1, %s8920_s22, 1  ;;  %6721 = vmatprep.subr.bf16.mxu1 %v8685_v0  ;;  %6723 = vmatprep.mubr.msk.bf16.mxu1 %vm8686_vm0, %v8685_v0  ;;  %vm1654_vm2 = vcmask 64512   ;;  %vm1904_vm3 = vcmask 1043456  }
 0x1fc   : > { %6714 = vmatpush3.bf16.msra.mxu0 %v7586_v1  ;;  %s9907_s28 = smov 96   ;;  %s9905_s2 = smov 80  }
 0x1fd   : > { %s9888_s1 = sshll.u32 %s9232_s11, 2  ;;  %6715 = vmatprep.subr.bf16.mxu0 %v8685_v0  ;;  %s8690_s17 = smov 88  }
 0x1fe   : > { %s9901_s18 = smov 72   ;;  %s9897_s25 = smov 112  }
 0x1ff   : > { %s9241_s16 = scalar_lea.vmem %s10001_s0, %s9888_s1  ;;  %s9895_s10 = smov 104  }
 0x200   : > { %v9245_v3 = vld [vmem:[%s9241_s16] sm:$0xf]  ;;  %6716 = vmatpush3.bf16.msra.mxu0 %v7587_v2  ;;  %s9893_s26 = smov 56   ;;  %s9899_s3 = smov 64  }
 0x201   : > { %6727 = vmatprep.subr.bf16.mxu0 %v8685_v0  ;;  %s9889_s23 = smov 40   ;;  %s9891_s0 = smov 48  }
 0x202   : > { %s10002_s1 = sld [smem:[#allocation76_spill]]  ;;  %s10018_s5 = smov 80  }
 0x203   : > { %6718 = vmatmul.mubr.msk.bf16.vlgmr.msra.gmra.mxu0 %vm1606_vm1, %v9245_v3  ;;  %p10021_p3 = scmp.ne.s32.totalorder %s9942_s7, 0 }
 0x204   : > { %6729 = vmatprep.mubr.msk.bf16.mxu0 %vm8686_vm0, %v8685_v0 }
 0x2c3   : > { %v1644_v5 = vpop.f32.mrf.mxu0 }
 0x2c4   : > { %v1645_v6 = vadd.f32 %v6403_v4, %v1644_v5 }
 0x2c5   : > { %v6719_v7 = vpop.f32.mrf.mxu0 }
 0x2c6   : > { %v9252_v8 = vpack.c.bf16 %v1645_v6, %v1645_v6 }
 0x2c7   : > { %v1647_v9 = vpop.f32.mrf.mxu0 }
 0x2c8   : > { %1701 = vrot.lane.b32.xlu1 %v9252_v8, %s9903_s4  ;;  %1652 = vrot.lane.b32.xlu0 %v9252_v8, %s9907_s28 }
 0x2c9   : > { %v6720_v10 = vpop.f32.mrf.mxu0 }
 0x2cc   : > { %1753 = vrot.lane.b32.xlu1 %v9252_v8, %s9905_s2  ;;  %1703 = vrot.lane.b32.xlu0 %v9252_v8, %s8690_s17 }
 0x2d0   : > { %1803 = vrot.lane.b32.xlu1 %v9252_v8, %s9901_s18  ;;  %1751 = vrot.lane.b32.xlu0 %v9252_v8, %s9897_s25 }
 0x2d4   : > { %1801 = vrot.lane.b32.xlu0 %v9252_v8, %s9895_s10 }
 0x33a   : > { %v1702_v11 = vpop.permute.xlu1 %1701  ;;  %v1653_v12 = vpop.permute.xlu0 %1652 }
 0x33b   : > { %v1659_v13 = vsel %vm1654_vm2, %v1653_v12, 0 }
 0x33c   : > { %6722 = vmatpush3.bf16.xpose.msra.mxu1 %v1659_v13 }
 0x33d   : > { %6733 = vmatprep.subr.bf16.mxu1 %v8685_v0 }
 0x33e   : > { %v1754_v14 = vpop.permute.xlu1 %1753  ;;  %v1704_v15 = vpop.permute.xlu0 %1703 }
 0x33f   : > { %v1709_v16 = vsel %vm1654_vm2, %v1704_v15, 0  ;;  %v1759_v17 = vsel %vm1654_vm2, %v1754_v14, 0 }
 0x340   : > { %6728 = vmatpush3.bf16.xpose.msra.mxu0 %v1709_v16 }
 0x341   : > { %6739 = vmatprep.subr.bf16.mxu0 %v8685_v0 }
 0x342   : > { %v1804_v18 = vpop.permute.xlu1 %1803  ;;  %v1752_v20 = vpop.permute.xlu0 %1751 }
 0x343   : > { %6724 = vmatmul.mubr.msk.bf16.vlgmr.msra.gmra.mxu1 %vm1654_vm2, %v9252_v8  ;;  %v1809_v19 = vsel %vm1654_vm2, %v1804_v18, 0 }
 0x344   : > { %6734 = vmatpush3.bf16.xpose.msra.mxu1 %v1759_v17  ;;  %6735 = vmatprep.mubr.msk.bf16.mxu1 %vm8686_vm0, %v8685_v0 }
 0x345   : > { %6745 = vmatprep.subr.bf16.mxu1 %v8685_v0 }
 0x346   : > { %v1802_v21 = vpop.permute.xlu0 %1801 }
 0x347   : > { %6730 = vmatmul.mubr.msk.bf16.vlgmr.msra.gmra.mxu0 %vm1654_vm2, %v1702_v11 }
 0x348   : > { %6740 = vmatpush3.bf16.xpose.msra.mxu0 %v1809_v19  ;;  %6741 = vmatprep.mubr.msk.bf16.mxu0 %vm8686_vm0, %v8685_v0 }
 0x349   : > { %6751 = vmatprep.subr.bf16.mxu0 %v8685_v0 }
 0x34b   : > { %6736 = vmatmul.mubr.msk.bf16.vlgmr.msra.gmra.mxu1 %vm1654_vm2, %v1752_v20 }
 0x34c   : > { %6747 = vmatprep.mubr.msk.bf16.mxu1 %vm8686_vm0, %v8685_v0 }
 0x34f   : > { %6742 = vmatmul.mubr.msk.bf16.vlgmr.msra.gmra.mxu0 %vm1654_vm2, %v1802_v21 }
 0x350   : > { %6753 = vmatprep.mubr.msk.bf16.mxu0 %vm8686_vm0, %v8685_v0 }
 0x403   : > { %v1695_v22 = vpop.f32.mrf.mxu1 }
 0x404   : > { %v1851_v23 = vsel %vm1654_vm2, %v1695_v22, -inf }
 0x405   : > { %1852 = vmax.xlane.f32.xlu1 %v1851_v23  ;;  %v6725_v24 = vpop.f32.mrf.mxu1 }
 0x406   : > { %v1581_v24 = vld [vmem:[%s10002_s1] sm:$0xf] }
 0x407   : > { %v1698_v25 = vpop.f32.mrf.mxu1  ;;  %v1745_v26 = vpop.f32.mrf.mxu0 }
 0x408   : > { %v1854_v27 = vsel %vm1654_vm2, %v1745_v26, -inf  ;;  %v1953_v25 = vsel %vm1904_vm3, %v1581_v24, 0  ;;  %v6420_v24 = vld [vmem:[#allocation11] ss:$0 sm:$0xff] }
 0x409   : > { %v6726_v28 = vpop.f32.mrf.mxu1  ;;  %1855 = vmax.xlane.f32.xlu0 %v1854_v27  ;;  %v6731_v29 = vpop.f32.mrf.mxu0  ;;  %6752 = vmatpush3.bf16.msra.mxu0 %v1953_v25 }
 0x40a   : > { %6763 = vmatprep.subr.bf16.mxu0 %v8685_v0 }
 0x40b   : > { %v1748_v30 = vpop.f32.mrf.mxu0  ;;  %v1795_v31 = vpop.f32.mrf.mxu1 }
 0x40c   : > { %v1857_v32 = vsel %vm1654_vm2, %v1795_v31, -inf }
 0x40d   : > { %v6737_v33 = vpop.f32.mrf.mxu1  ;;  %1858 = vmax.xlane.f32.xlu0 %v1857_v32  ;;  %v6732_v34 = vpop.f32.mrf.mxu0 }
 0x40e   : > { %v1583_v33 = vld [vmem:[%s10002_s1 + $0x8] sm:$0xf] }
 0x40f   : > { %v1798_v35 = vpop.f32.mrf.mxu1  ;;  %v1845_v36 = vpop.f32.mrf.mxu0 }
 0x410   : > { %v1860_v37 = vsel %vm1654_vm2, %v1845_v36, -inf }
 0x411   : > { %v6738_v38 = vpop.f32.mrf.mxu1  ;;  %1861 = vmax.xlane.f32.xlu1 %v1860_v37  ;;  %v6743_v39 = vpop.f32.mrf.mxu0 }
 0x413   : > { %v1848_v40 = vpop.f32.mrf.mxu0 }
 0x414   : > { %v1584_v40 = vld [vmem:[%s10002_s1 + $0xc] sm:$0xf] }
 0x415   : > { %v6744_v41 = vpop.f32.mrf.mxu0 }
 0x48e   : > { %v1853_v42 = vpop.xlane.xlu1 %1852 }
 0x48f   : > { %v1863_v43 = vsub.f32 %v1695_v22, %v1853_v42 }
 0x491   : > { %v1867_v44 = vmul.f32 1.442695, %v1863_v43  ;;  %v2247_v43 = vsel %vm1904_vm3, %v1584_v40, 0  ;;  %v7592_v40 = vld [vmem:[#allocation13 + $0x18] sm:$0xff]  }
 0x492   : > { %v1856_v45 = vpop.xlane.xlu0 %1855 }
 0x493   : > { %7614 = vpow2.f32 %v1867_v44  ;;  %v1864_v46 = vsub.f32 %v1745_v26, %v1856_v45  ;;  %v1582_v26 = vld [vmem:[%s10002_s1 + $0x4] sm:$0xf] }
 0x494   : > { %v2055_v29 = vsel %vm1904_vm3, %v1582_v26, 0  ;;  %v6421_v26 = vld [vmem:[#allocation10] ss:$0 sm:$0xff] }
 0x495   : > { %v1869_v47 = vmul.f32 1.442695, %v1864_v46 }
 0x496   : > { %v1859_v48 = vpop.xlane.xlu0 %1858 }
 0x497   : > { %7616 = vpow2.f32 %v1869_v47  ;;  %v1865_v49 = vsub.f32 %v1795_v31, %v1859_v48 }
 0x499   : > { %v1871_v50 = vmul.f32 1.442695, %v1865_v49 }
 0x49a   : > { %v1862_v57 = vpop.xlane.xlu1 %1861 }
 0x49b   : > { %7618 = vpow2.f32 %v1871_v50  ;;  %v1866_v58 = vsub.f32 %v1845_v36, %v1862_v57  ;;  %v2151_v36 = vsel %vm1904_vm3, %v1583_v33, 0 }
 0x49d   : > { %v1873_v59 = vmul.f32 1.442695, %v1866_v58 }
 0x49f   : > { %7620 = vpow2.f32 %v1873_v59 }
 0x4a0   : > { %v7615_v51 = vpop.eup %7614 }
 0x4a1   : > { %v1875_v52 = vsel %vm1654_vm2, %v7615_v51, 0.0 }
 0x4a2   : > { %1876 = vadd.xlane.f32.xlu0 %v1875_v52 }
 0x4a4   : > { %v7617_v53 = vpop.eup %7616 }
 0x4a5   : > { %v1878_v54 = vsel %vm1654_vm2, %v7617_v53, 0.0 }
 0x4a6   : > { %1879 = vadd.xlane.f32.xlu1 %v1878_v54 }
 0x4a8   : > { %v7619_v55 = vpop.eup %7618 }
 0x4a9   : > { %v1881_v56 = vsel %vm1654_vm2, %v7619_v55, 0.0 }
 0x4aa   : > { %1882 = vadd.xlane.f32.xlu0 %v1881_v56 }
 0x4ac   : > { %v7621_v60 = vpop.eup %7620 }
 0x4ad   : > { %v1884_v61 = vsel %vm1654_vm2, %v7621_v60, 0.0 }
 0x4b7   : > { %2002 = vrot.lane.b32.xlu1 %v9252_v8, %s9893_s26 }
 0x4c0   : > { %1899 = vrot.lane.b32.xlu0 %v9252_v8, %s9899_s3 }
 0x4c4   : > { %2194 = vrot.lane.b32.xlu0 %v9252_v8, %s9889_s23  ;;  %s10003_s23 = sld [smem:[#allocation74_spill]] }
 0x4db   : > { %1885 = vadd.xlane.f32.xlu1 %v1884_v61  ;;  %v6413_v61 = vld [vmem:[#allocation7] ss:$0 sm:$0xff] }
 0x4ec   : > { %2098 = vrot.lane.b32.xlu1 %v9252_v8, %s9891_s0  ;;  %s10004_s0 = sld [smem:[#allocation75_spill]] }
 0x4f2   : > { %s10005_s26 = smov %s10004_s0 }
 0x52b   : > { %v1877_v62 = vpop.xlane.xlu0 %1876 }
 0x52c   : > { %7622 = vrcp.f32 %v1877_v62 }
 0x52f   : > { %v1880_v63 = vpop.xlane.xlu1 %1879 }
 0x530   : > { %7624 = vrcp.f32 %v1880_v63 }
 0x533   : > { %v1883_v1 = vpop.xlane.xlu0 %1882  ;;  %v2003_v7 = vpop.permute.xlu1 %2002 }
 0x534   : > { %v2008_v11 = vsel %vm1904_vm3, %v2003_v7, 0  ;;  %7626 = vrcp.f32 %v1883_v1 }
 0x537   : > { %v1900_v2 = vpop.permute.xlu0 %1899 }
 0x538   : > { %v1906_v4 = vsel %vm1904_vm3, %v1900_v2, 0 }
 0x539   : > { %v7623_v5 = vpop.eup %7622  ;;  %6746 = vmatpush3.bf16.msra.mxu1 %v1906_v4 }
 0x53a   : > { %6757 = vmatprep.subr.bf16.mxu1 %v8685_v0  ;;  %v1888_v6 = vmul.f32 %v7623_v5, %v7615_v51 }
 0x53b   : > { %v2195_v18 = vpop.permute.xlu0 %2194 }
 0x53c   : > { %v1895_v9 = vpack.c.bf16 %v1888_v6, %v1888_v6  ;;  %v2200_v20 = vsel %vm1904_vm3, %v2195_v18, 0  ;;  %v1575_v6 = vunpack.c.l.bf16 %v9245_v3  ;;  %v7589_v3 = vld [vmem:[%s10003_s23] sm:$0xff]  }
 0x53d   : > { %v7625_v10 = vpop.eup %7624 }
 0x53e   : > { %6748 = vmatmul.mubr.msk.bf16.vlgmr.msra.gmra.mxu1 %vm1654_vm2, %v1895_v9  ;;  %v1890_v8 = vmul.f32 %v7625_v10, %v7617_v53 }
 0x53f   : > { %6758 = vmatpush3.bf16.msra.mxu1 %v2008_v11  ;;  %6759 = vmatprep.mubr.msk.bf16.mxu1 %vm8686_vm0, %v8685_v0 }
 0x540   : > { %6769 = vmatprep.subr.bf16.mxu1 %v8685_v0  ;;  %v1896_v12 = vpack.c.bf16 %v1890_v8, %v1890_v8 }
 0x541   : > { %v7627_v13 = vpop.eup %7626 }
 0x542   : > { %v1892_v15 = vmul.f32 %v7627_v13, %v7619_v55 }
 0x544   : > { %v1897_v19 = vpack.c.bf16 %v1892_v15, %v1892_v15 }
 0x546   : > { %6760 = vmatmul.mubr.msk.bf16.vlgmr.msra.gmra.mxu1 %vm1654_vm2, %v1896_v12 }
 0x547   : > { %6771 = vmatprep.mubr.msk.bf16.mxu1 %vm8686_vm0, %v8685_v0 }
 0x564   : > { %v1886_v14 = vpop.xlane.xlu1 %1885 }
 0x565   : > { %7628 = vrcp.f32 %v1886_v14 }
 0x568   : > { %v2099_v16 = vpop.permute.xlu1 %2098 }
 0x569   : > { %v2104_v17 = vsel %vm1904_vm3, %v2099_v16, 0 }
 0x56a   : > { %6770 = vmatpush3.bf16.msra.mxu1 %v2104_v17 }
 0x56b   : > { %6781 = vmatprep.subr.bf16.mxu1 %v8685_v0 }
 0x56d   : > { %6772 = vmatmul.mubr.msk.bf16.vlgmr.msra.gmra.mxu1 %vm1654_vm2, %v1897_v19  ;;  %v7588_v19 = vld [vmem:[%s10003_s23 + $0x8] sm:$0xff]  }
 0x56e   : > { %6782 = vmatpush3.bf16.msra.mxu1 %v2200_v20  ;;  %6783 = vmatprep.mubr.msk.bf16.mxu1 %vm8686_vm0, %v8685_v0 }
 0x56f   : > { %6793 = vmatprep.subr.bf16.mxu1 %v8685_v0 }
 0x572   : > { %v7629_v21 = vpop.eup %7628 }
 0x573   : > { %v1894_v22 = vmul.f32 %v7629_v21, %v7621_v60 }
 0x575   : > { %v1898_v23 = vpack.c.bf16 %v1894_v22, %v1894_v22 }
 0x577   : > { %6784 = vmatmul.mubr.msk.bf16.vlgmr.msra.gmra.mxu1 %vm1654_vm2, %v1898_v23 }
 0x578   : > { %6797 = vmatprep.mubr.msk.bf16.mxu1 %vm8686_vm0, %v8685_v0  ;;  %6794 = vmatpush3.bf16.msra.mxu1 %v7588_v19 }
 0x579   : > { %6795 = vmatprep.subr.bf16.mxu1 %v8685_v0 }
 0x57c   : > { %6796 = vmatpush3.bf16.msra.mxu1 %v7589_v3 }
 0x57d   : > { %6809 = vmatprep.subr.bf16.mxu1 %v8685_v0 }
 0x5fe   : > { %v1942_v27 = vpop.f32.mrf.mxu1 }
 0x5ff   : > { %v1948_v28 = vpack.c.bf16 %v1942_v27, %v1942_v27 }
 0x600   : > { %v6749_v30 = vpop.f32.mrf.mxu1 }
 0x601   : > { %6754 = vmatmul.mubr.msk.bf16.vlgmr.msra.gmra.mxu0 %vm1654_vm2, %v1948_v28  ;;  %v7590_v30 = vld [vmem:[%s10004_s0 + $0x8] sm:$0xff]   ;;  %s10006_s0 = smov 56  }
 0x602   : > { %v1945_v31 = vpop.f32.mrf.mxu1  ;;  %6764 = vmatpush3.bf16.msra.mxu0 %v2055_v29  ;;  %6765 = vmatprep.mubr.msk.bf16.mxu0 %vm8686_vm0, %v8685_v0 }
 0x603   : > { %6775 = vmatprep.subr.bf16.mxu0 %v8685_v0  ;;  %v7591_v31 = vld [vmem:[%s10005_s26] sm:$0xff]  }
 0x604   : > { %v6750_v32 = vpop.f32.mrf.mxu1 }
 0x605   : > { %v6422_v32 = vld [vmem:[#allocation2] ss:$0 sm:$0xff] }
 0x606   : > { %v2044_v34 = vpop.f32.mrf.mxu1 }
 0x607   : > { %v2050_v35 = vpack.c.bf16 %v2044_v34, %v2044_v34 }
 0x608   : > { %v6761_v37 = vpop.f32.mrf.mxu1 }
 0x609   : > { %6766 = vmatmul.mubr.msk.bf16.vlgmr.msra.gmra.mxu0 %vm1654_vm2, %v2050_v35 }
 0x60a   : > { %v2047_v38 = vpop.f32.mrf.mxu1  ;;  %6776 = vmatpush3.bf16.msra.mxu0 %v2151_v36  ;;  %6777 = vmatprep.mubr.msk.bf16.mxu0 %vm8686_vm0, %v8685_v0 }
 0x60b   : > { %6787 = vmatprep.subr.bf16.mxu0 %v8685_v0 }
 0x60c   : > { %v6762_v39 = vpop.f32.mrf.mxu1 }
 0x62d   : > { %v2140_v41 = vpop.f32.mrf.mxu1 }
 0x62e   : > { %v2146_v42 = vpack.c.bf16 %v2140_v41, %v2140_v41  ;;  %v7593_v41 = vld [vmem:[#allocation13 + $0x10] sm:$0xff]  }
 0x62f   : > { %v6773_v44 = vpop.f32.mrf.mxu1 }
 0x630   : > { %6778 = vmatmul.mubr.msk.bf16.vlgmr.msra.gmra.mxu0 %vm1654_vm2, %v2146_v42  ;;  %v6426_v42 = vld [vmem:[#allocation5] ss:$0 sm:$0xff] }
 0x631   : > { %v2143_v45 = vpop.f32.mrf.mxu1  ;;  %6788 = vmatpush3.bf16.msra.mxu0 %v2247_v43  ;;  %6789 = vmatprep.mubr.msk.bf16.mxu0 %vm8686_vm0, %v8685_v0 }
 0x632   : > { %6801 = vmatprep.subr.bf16.mxu0 %v8685_v0 }
 0x633   : > { %v6774_v46 = vpop.f32.mrf.mxu1 }
 0x637   : > { %v2236_v47 = vpop.f32.mrf.mxu1 }
 0x638   : > { %v2242_v48 = vpack.c.bf16 %v2236_v47, %v2236_v47 }
 0x639   : > { %v6785_v49 = vpop.f32.mrf.mxu1 }
 0x63a   : > { %6790 = vmatmul.mubr.msk.bf16.vlgmr.msra.gmra.mxu0 %vm1654_vm2, %v2242_v48 }
 0x63b   : > { %v2239_v50 = vpop.f32.mrf.mxu1  ;;  %6805 = vmatprep.mubr.msk.bf16.mxu0 %vm8686_vm0, %v8685_v0  ;;  %6802 = vmatpush3.bf16.msra.mxu0 %v7590_v30 }
 0x63c   : > { %6803 = vmatprep.subr.bf16.mxu0 %v8685_v0  ;;  %v6434_v50 = vld [vmem:[#allocation8 + $0x1] ss:$0 sm:$0xff] }
 0x63d   : > { %v6786_v51 = vpop.f32.mrf.mxu1 }
 0x63f   : > { %6804 = vmatpush3.bf16.msra.mxu0 %v7591_v31 }
 0x640   : > { %6817 = vmatprep.subr.bf16.mxu0 %v8685_v0 }
 0x6c1   : > { %v1989_v52 = vpop.f32.mrf.mxu0 }
 0x6c2   : > { %v2001_v1 = vadd.f32 %v6413_v61, %v1989_v52 }
 0x6c3   : > { %v6755_v53 = vpop.f32.mrf.mxu0 }
 0x6c5   : > { %v1992_v54 = vpop.f32.mrf.mxu0 }
 0x6c7   : > { %v6756_v55 = vpop.f32.mrf.mxu0 }
 0x6c9   : > { %v2091_v56 = vpop.f32.mrf.mxu0 }
 0x6ca   : > { %v2097_v4 = vadd.f32 %v2091_v56, %v2001_v1 }
 0x6cb   : > { %v6767_v57 = vpop.f32.mrf.mxu0 }
 0x6cd   : > { %v2094_v58 = vpop.f32.mrf.mxu0 }
 0x6cf   : > { %v6768_v59 = vpop.f32.mrf.mxu0 }
 0x6f0   : > { %v2187_v60 = vpop.f32.mrf.mxu0 }
 0x6f1   : > { %v2193_v5 = vadd.f32 %v2187_v60, %v2097_v4 }
 0x6f2   : > { %v6779_v62 = vpop.f32.mrf.mxu0 }
 0x6f4   : > { %v2190_v63 = vpop.f32.mrf.mxu0 }
 0x6f6   : > { %v6780_v2 = vpop.f32.mrf.mxu0 }
 0x6fa   : > { %v2283_v7 = vpop.f32.mrf.mxu0 }
 0x6fb   : > { %v2289_v9 = vadd.f32 %v2283_v7, %v2193_v5 }
 0x6fc   : > { %v6791_v10 = vpop.f32.mrf.mxu0 }
 0x6fd   : > { %v2290_v11 = vadd.f32 %v2289_v9, %v1575_v6 }
 0x6fe   : > { %v2286_v8 = vpop.f32.mrf.mxu0 }
 0x6ff   : > { %v2291_v12 = vsel %vm1606_vm1, %v2290_v11, 0.0 }
 0x700   : > { %v6792_v13 = vpop.f32.mrf.mxu0  ;;  %2292 = vadd.xlane.f32.xlu1 %v2291_v12 }
 0x789   : > { %v2293_v14 = vpop.xlane.xlu1 %2292 }
 0x78a   : > { %v2295_v15 = vmul.f32 0.03125, %v2293_v14 }
 0x78c   : > { %v2296_v16 = vsub.f32 %v2290_v11, %v2295_v15 }
 0x78e   : > { %v2297_v17 = vmul.f32 %v2296_v16, %v2296_v16 }
 0x790   : > { %v2298_v18 = vsel %vm1606_vm1, %v2297_v17, 0.0 }
 0x791   : > { %2299 = vadd.xlane.f32.xlu0 %v2298_v18 }
 0x81a   : > { %v2300_v20 = vpop.xlane.xlu0 %2299 }
 0x81b   : > { %v2301_v21 = vmul.f32 0.03125, %v2300_v20 }
 0x81d   : > { %v2302_v22 = vadd.f32 1e-05, %v2301_v21 }
 0x81f   : > { %7630 = vrsqrt.f32 %v2302_v22 }
 0x82c   : > { %v7631_v23 = vpop.eup %7630 }
 0x82d   : > { %v2304_v25 = vmul.f32 %v7631_v23, %v2296_v16 }
 0x82f   : > { %v2311_v27 = vmul.f32 %v6420_v24, %v2304_v25 }
 0x831   : > { %v2318_v28 = vadd.f32 %v6421_v26, %v2311_v27 }
 0x833   : > { %v2329_v29 = vpack.c.bf16 %v2318_v28, %v2318_v28 }
 0x835   : > { %6798 = vmatmul.mubr.msk.bf16.vlgmr.msra.gmra.mxu1 %vm1606_vm1, %v2329_v29 }
 0x836   : > { %6813 = vmatprep.mubr.msk.bf16.mxu1 %vm8686_vm0, %v8685_v0  ;;  %6810 = vmatpush3.bf16.msra.mxu1 %v7592_v40 }
 0x837   : > { %6811 = vmatprep.subr.bf16.mxu1 %v8685_v0 }
 0x83a   : > { %6812 = vmatpush3.bf16.msra.mxu1 %v7593_v41 }
 0x83b   : > { %6823 = vmatprep.subr.bf16.mxu1 %v8685_v0 }
 0x8f5   : > { %v2385_v33 = vpop.f32.mrf.mxu1 }
 0x8f6   : > { %v2386_v34 = vadd.f32 %v6422_v32, %v2385_v33 }
 0x8f7   : > { %v6799_v35 = vpop.f32.mrf.mxu1 }
 0x8f8   : > { %v2391_v36 = vmax.f32 %v2386_v34, 0.0 }
 0x8f9   : > { %v2388_v37 = vpop.f32.mrf.mxu1 }
 0x8fa   : > { %v2392_v38 = vpack.c.bf16 %v2391_v36, %v2391_v36 }
 0x8fb   : > { %v6800_v39 = vpop.f32.mrf.mxu1 }
 0x8fc   : > { %6806 = vmatmul.mubr.msk.bf16.vlgmr.msra.gmra.mxu0 %vm1606_vm1, %v2392_v38 }
 0x8fd   : > { %6819 = vmatprep.mubr.msk.bf16.mxu0 %vm8686_vm0, %v8685_v0 }
 0x9bc   : > { %v2448_v43 = vpop.f32.mrf.mxu0 }
 0x9bd   : > { %v2449_v44 = vadd.f32 %v6426_v42, %v2448_v43 }
 0x9be   : > { %v6807_v45 = vpop.f32.mrf.mxu0 }
 0x9bf   : > { %v9368_v46 = vadd.f32 %v2449_v44, %v2318_v28 }
 0x9c0   : > { %v2451_v47 = vpop.f32.mrf.mxu0 }
 0x9c1   : > { %v2473_v48 = vpack.c.bf16 %v9368_v46, %v9368_v46 }
 0x9c2   : > { %v6808_v49 = vpop.f32.mrf.mxu0 }
 0x9c3   : > { %6814 = vmatmul.mubr.msk.bf16.vlgmr.msra.gmra.mxu1 %vm1606_vm1, %v2473_v48 }
 0x9c4   : > { %6825 = vmatprep.mubr.msk.bf16.mxu1 %vm8686_vm0, %v8685_v0 }
 0xa83   : > { %v2529_v51 = vpop.f32.mrf.mxu1 }
 0xa84   : > { %v2530_v52 = vadd.f32 %v6434_v50, %v2529_v51 }
 0xa85   : > { %v6815_v53 = vpop.f32.mrf.mxu1 }
 0xa86   : > { %v9375_v54 = vpack.c.bf16 %v2530_v52, %v2530_v52 }
 0xa87   : > { %v2532_v55 = vpop.f32.mrf.mxu1 }
 0xa88   : > { %2587 = vrot.lane.b32.xlu1 %v9375_v54, %s8690_s17  ;;  %2537 = vrot.lane.b32.xlu0 %v9375_v54, %s9907_s28 }
 0xa89   : > { %v6816_v56 = vpop.f32.mrf.mxu1 }
 0xa8c   : > { %2585 = vrot.lane.b32.xlu1 %v9375_v54, %s9903_s4  ;;  %2637 = vrot.lane.b32.xlu0 %v9375_v54, %s9905_s2 }
 0xa90   : > { %2635 = vrot.lane.b32.xlu1 %v9375_v54, %s9897_s25  ;;  %2687 = vrot.lane.b32.xlu0 %v9375_v54, %s9901_s18  ;;  %s10008_s25 = smov 40   ;;  %s10010_s18 = sshll.u32 %s9232_s11, 2 }
 0xa91   : > { %s10011_s11 = smov 120  }
 0xa94   : > { %2685 = vrot.lane.b32.xlu1 %v9375_v54, %s9895_s10  ;;  %s10007_s10 = smov 48  }
 0xafa   : > { %v2588_v57 = vpop.permute.xlu1 %2587  ;;  %v2538_v58 = vpop.permute.xlu0 %2537 }
 0xafb   : > { %v2593_v59 = vsel %vm1654_vm2, %v2588_v57, 0  ;;  %v2543_v60 = vsel %vm1654_vm2, %v2538_v58, 0 }
 0xafc   : > { %6818 = vmatpush3.bf16.xpose.msra.mxu0 %v2543_v60  ;;  %6824 = vmatpush3.bf16.xpose.msra.mxu1 %v2593_v59 }
 0xafd   : > { %6829 = vmatprep.subr.bf16.mxu0 %v8685_v0  ;;  %6835 = vmatprep.subr.bf16.mxu1 %v8685_v0 }
 0xafe   : > { %v2586_v61 = vpop.permute.xlu1 %2585  ;;  %v2638_v62 = vpop.permute.xlu0 %2637 }
 0xaff   : > { %v2643_v1 = vsel %vm1654_vm2, %v2638_v62, 0 }
 0xb02   : > { %v2688_v63 = vpop.permute.xlu0 %2687  ;;  %v2636_v4 = vpop.permute.xlu1 %2635 }
 0xb03   : > { %v2693_v2 = vsel %vm1654_vm2, %v2688_v63, 0  ;;  %6820 = vmatmul.mubr.msk.bf16.vlgmr.msra.gmra.mxu0 %vm1654_vm2, %v9375_v54  ;;  %6826 = vmatmul.mubr.msk.bf16.vlgmr.msra.gmra.mxu1 %vm1654_vm2, %v2586_v61 }
 0xb04   : > { %6830 = vmatpush3.bf16.xpose.msra.mxu0 %v2643_v1  ;;  %6836 = vmatpush3.bf16.xpose.msra.mxu1 %v2693_v2 }
 0xb05   : > { %6831 = vmatprep.mubr.msk.bf16.mxu0 %vm8686_vm0, %v8685_v0  ;;  %6837 = vmatprep.mubr.msk.bf16.mxu1 %vm8686_vm0, %v8685_v0 }
 0xb06   : > { %6841 = vmatprep.subr.bf16.mxu0 %v8685_v0  ;;  %6847 = vmatprep.subr.bf16.mxu1 %v8685_v0  ;;  %v2686_v5 = vpop.permute.xlu1 %2685 }
 0xb0b   : > { %6832 = vmatmul.mubr.msk.bf16.vlgmr.msra.gmra.mxu0 %vm1654_vm2, %v2636_v4  ;;  %6838 = vmatmul.mubr.msk.bf16.vlgmr.msra.gmra.mxu1 %vm1654_vm2, %v2686_v5 }
 0xb0c   : > { %6843 = vmatprep.mubr.msk.bf16.mxu0 %vm8686_vm0, %v8685_v0  ;;  %6849 = vmatprep.mubr.msk.bf16.mxu1 %vm8686_vm0, %v8685_v0 }
 0xbc3   : > { %v2579_v6 = vpop.f32.mrf.mxu0  ;;  %v2629_v7 = vpop.f32.mrf.mxu1 }
 0xbc4   : > { %v2735_v9 = vsel %vm1654_vm2, %v2579_v6, -inf  ;;  %v2738_v10 = vsel %vm1654_vm2, %v2629_v7, -inf }
 0xbc5   : > { %2736 = vmax.xlane.f32.xlu0 %v2735_v9  ;;  %v6821_v11 = vpop.f32.mrf.mxu0  ;;  %2739 = vmax.xlane.f32.xlu1 %v2738_v10  ;;  %v6827_v8 = vpop.f32.mrf.mxu1  ;;  %v6430_v9 = vld [vmem:[%s10002_s1 + $0x10] sm:$0xf] }
 0xbc6   : > { %v2836_v10 = vsel %vm1904_vm3, %v6430_v9, 0  ;;  %v6431_v11 = vld [vmem:[%s10002_s1 + $0x14] sm:$0xf] }
 0xbc7   : > { %v2582_v12 = vpop.f32.mrf.mxu0  ;;  %v2632_v13 = vpop.f32.mrf.mxu1  ;;  %6848 = vmatpush3.bf16.msra.mxu1 %v2836_v10  ;;  %v6452_v10 = vld [vmem:[#allocation10 + $0x1] ss:$0 sm:$0xff] }
 0xbc8   : > { %6859 = vmatprep.subr.bf16.mxu1 %v8685_v0  ;;  %v2938_v13 = vsel %vm1904_vm3, %v6431_v11, 0 }
 0xbc9   : > { %v6822_v14 = vpop.f32.mrf.mxu0  ;;  %v6828_v15 = vpop.f32.mrf.mxu1 }
 0xbcb   : > { %v2679_v16 = vpop.f32.mrf.mxu0  ;;  %v2729_v17 = vpop.f32.mrf.mxu1 }
 0xbcc   : > { %v2741_v18 = vsel %vm1654_vm2, %v2679_v16, -inf  ;;  %v2744_v22 = vsel %vm1654_vm2, %v2729_v17, -inf }
 0xbcd   : > { %2742 = vmax.xlane.f32.xlu0 %v2741_v18  ;;  %v6833_v19 = vpop.f32.mrf.mxu0  ;;  %v6839_v3 = vpop.f32.mrf.mxu1 }
 0xbcf   : > { %v2682_v20 = vpop.f32.mrf.mxu0  ;;  %v2732_v21 = vpop.f32.mrf.mxu1 }
 0xbd1   : > { %v6834_v23 = vpop.f32.mrf.mxu0  ;;  %2745 = vmax.xlane.f32.xlu0 %v2744_v22  ;;  %v6840_v24 = vpop.f32.mrf.mxu1 }
 0xbd2   : > { %v6433_v23 = vld [vmem:[%s10002_s1 + $0x1c] sm:$0xf] }
 0xc4e   : > { %v2737_v25 = vpop.xlane.xlu0 %2736  ;;  %v2740_v26 = vpop.xlane.xlu1 %2739 }
 0xc4f   : > { %v2747_v27 = vsub.f32 %v2579_v6, %v2737_v25  ;;  %v2748_v28 = vsub.f32 %v2629_v7, %v2740_v26  ;;  %v3130_v26 = vsel %vm1904_vm3, %v6433_v23, 0 }
 0xc51   : > { %v2751_v29 = vmul.f32 1.442695, %v2747_v27  ;;  %v2753_v30 = vmul.f32 1.442695, %v2748_v28 }
 0xc53   : > { %7632 = vpow2.f32 %v2751_v29 }
 0xc54   : > { %7634 = vpow2.f32 %v2753_v30 }
 0xc56   : > { %v2743_v31 = vpop.xlane.xlu0 %2742 }
 0xc57   : > { %v2749_v41 = vsub.f32 %v2679_v16, %v2743_v31 }
 0xc59   : > { %v2755_v42 = vmul.f32 1.442695, %v2749_v41 }
 0xc5a   : > { %v2746_v32 = vpop.xlane.xlu0 %2745 }
 0xc5b   : > { %v2750_v33 = vsub.f32 %v2729_v17, %v2746_v32  ;;  %v6432_v17 = vld [vmem:[%s10002_s1 + $0x18] sm:$0xf]  ;;  %s10017_s1 = smov 96  }
 0xc5c   : > { %v3034_v3 = vsel %vm1904_vm3, %v6432_v17, 0  ;;  %v7599_v17 = vld [vmem:[%s10005_s26 + $0x10] sm:$0xff]  }
 0xc5d   : > { %v2757_v34 = vmul.f32 1.442695, %v2750_v33 }
 0xc5f   : > { %7636 = vpow2.f32 %v2757_v34 }
 0xc60   : > { %v7633_v35 = vpop.eup %7632  ;;  %7638 = vpow2.f32 %v2755_v42 }
 0xc61   : > { %v7635_v36 = vpop.eup %7634  ;;  %v2759_v37 = vsel %vm1654_vm2, %v7633_v35, 0.0 }
 0xc62   : > { %2760 = vadd.xlane.f32.xlu1 %v2759_v37  ;;  %v2762_v38 = vsel %vm1654_vm2, %v7635_v36, 0.0 }
 0xc63   : > { %2763 = vadd.xlane.f32.xlu0 %v2762_v38 }
 0xc6c   : > { %v7637_v39 = vpop.eup %7636 }
 0xc6d   : > { %v2768_v40 = vsel %vm1654_vm2, %v7637_v39, 0.0  ;;  %v7639_v43 = vpop.eup %7638 }
 0xc6e   : > { %2769 = vadd.xlane.f32.xlu0 %v2768_v40  ;;  %v2765_v44 = vsel %vm1654_vm2, %v7639_v43, 0.0 }
 0xc73   : > { %2783 = vrot.lane.b32.xlu1 %v9375_v54, %s9899_s3  ;;  %s10009_s3 = sld [smem:[#allocation68_spill]] }
 0xc79   : > { %s1572_s4 = scalar_lea.vmem %s10009_s3, %s10010_s18  ;;  %s10013_s18 = smov 112  }
 0xc7a   : > { %s10014_s3 = smov 104  }
 0xc84   : > { %2885 = vrot.lane.b32.xlu0 %v9375_v54, %s10006_s0 }
 0xc97   : > { %2766 = vadd.xlane.f32.xlu1 %v2765_v44 }
 0xca8   : > { %2981 = vrot.lane.b32.xlu1 %v9375_v54, %s10007_s10 }
 0xcac   : > { %3077 = vrot.lane.b32.xlu1 %v9375_v54, %s10008_s25 }
 0xceb   : > { %v2761_v45 = vpop.xlane.xlu1 %2760 }
 0xcec   : > { %7640 = vrcp.f32 %v2761_v45  ;;  %v2764_v47 = vpop.xlane.xlu0 %2763 }
 0xced   : > { %7642 = vrcp.f32 %v2764_v47 }
 0xcef   : > { %v2784_v48 = vpop.permute.xlu1 %2783 }
 0xcf0   : > { %v2789_v49 = vsel %vm1904_vm3, %v2784_v48, 0 }
 0xcf1   : > { %6842 = vmatpush3.bf16.msra.mxu0 %v2789_v49 }
 0xcf2   : > { %6853 = vmatprep.subr.bf16.mxu0 %v8685_v0 }
 0xcf7   : > { %v2770_v50 = vpop.xlane.xlu0 %2769 }
 0xcf9   : > { %v7641_v51 = vpop.eup %7640 }
 0xcfa   : > { %v2772_v52 = vmul.f32 %v7641_v51, %v7633_v35  ;;  %v7643_v57 = vpop.eup %7642 }
 0xcfb   : > { %v2886_v53 = vpop.permute.xlu0 %2885  ;;  %v2774_v54 = vmul.f32 %v7643_v57, %v7635_v36 }
 0xcfc   : > { %v2891_v55 = vsel %vm1904_vm3, %v2886_v53, 0  ;;  %v2779_v56 = vpack.c.bf16 %v2772_v52, %v2772_v52 }
 0xcfd   : > { %v2780_v58 = vpack.c.bf16 %v2774_v54, %v2774_v54 }
 0xcfe   : > { %6844 = vmatmul.mubr.msk.bf16.vlgmr.msra.gmra.mxu0 %vm1654_vm2, %v2779_v56 }
 0xcff   : > { %6854 = vmatpush3.bf16.msra.mxu0 %v2891_v55  ;;  %6855 = vmatprep.mubr.msk.bf16.mxu0 %vm8686_vm0, %v8685_v0 }
 0xd00   : > { %6865 = vmatprep.subr.bf16.mxu0 %v8685_v0 }
 0xd06   : > { %6856 = vmatmul.mubr.msk.bf16.vlgmr.msra.gmra.mxu0 %vm1654_vm2, %v2780_v58 }
 0xd07   : > { %6867 = vmatprep.mubr.msk.bf16.mxu0 %vm8686_vm0, %v8685_v0 }
 0xd20   : > { %v2767_v59 = vpop.xlane.xlu1 %2766 }
 0xd21   : > { %7644 = vrcp.f32 %v2767_v59 }
 0xd22   : > { %7646 = vrcp.f32 %v2770_v50 }
 0xd24   : > { %v2982_v60 = vpop.permute.xlu1 %2981 }
 0xd25   : > { %v2987_v61 = vsel %vm1904_vm3, %v2982_v60, 0 }
 0xd26   : > { %6866 = vmatpush3.bf16.msra.mxu0 %v2987_v61 }
 0xd27   : > { %6877 = vmatprep.subr.bf16.mxu0 %v8685_v0 }
 0xd28   : > { %v3078_v1 = vpop.permute.xlu1 %3077 }
 0xd29   : > { %v3083_v5 = vsel %vm1904_vm3, %v3078_v1, 0  ;;  %v7594_v1 = vld [vmem:[%s10003_s23 + $0x18] sm:$0xff]  }
 0xd2e   : > { %v7645_v62 = vpop.eup %7644 }
 0xd2f   : > { %v2776_v63 = vmul.f32 %v7645_v62, %v7639_v43  ;;  %v7647_v4 = vpop.eup %7646  ;;  %v6444_v43 = vld [vmem:[#allocation7 + $0x1] ss:$0 sm:$0xff] }
 0xd30   : > { %v2778_v6 = vmul.f32 %v7647_v4, %v7637_v39 }
 0xd31   : > { %v2781_v2 = vpack.c.bf16 %v2776_v63, %v2776_v63 }
 0xd32   : > { %v2782_v7 = vpack.c.bf16 %v2778_v6, %v2778_v6 }
 0xd33   : > { %6868 = vmatmul.mubr.msk.bf16.vlgmr.msra.gmra.mxu0 %vm1654_vm2, %v2781_v2  ;;  %v7595_v2 = vld [vmem:[%s10003_s23 + $0x10] sm:$0xff]  }
 0xd34   : > { %6878 = vmatpush3.bf16.msra.mxu0 %v3083_v5  ;;  %6879 = vmatprep.mubr.msk.bf16.mxu0 %vm8686_vm0, %v8685_v0 }
 0xd35   : > { %6889 = vmatprep.subr.bf16.mxu0 %v8685_v0 }
 0xd3b   : > { %6880 = vmatmul.mubr.msk.bf16.vlgmr.msra.gmra.mxu0 %vm1654_vm2, %v2782_v7  ;;  %v6451_v7 = vld [vmem:[#allocation11 + $0x1] ss:$0 sm:$0xff] }
 0xd3c   : > { %6893 = vmatprep.mubr.msk.bf16.mxu0 %vm8686_vm0, %v8685_v0  ;;  %6890 = vmatpush3.bf16.msra.mxu0 %v7594_v1 }
 0xd3d   : > { %6891 = vmatprep.subr.bf16.mxu0 %v8685_v0 }
 0xd40   : > { %6892 = vmatpush3.bf16.msra.mxu0 %v7595_v2 }
 0xd41   : > { %6905 = vmatprep.subr.bf16.mxu0 %v8685_v0 }
 0xdbe   : > { %v2825_v8 = vpop.f32.mrf.mxu0 }
 0xdbf   : > { %v2831_v12 = vpack.c.bf16 %v2825_v8, %v2825_v8 }
 0xdc0   : > { %v6845_v14 = vpop.f32.mrf.mxu0 }
 0xdc1   : > { %6850 = vmatmul.mubr.msk.bf16.vlgmr.msra.gmra.mxu1 %vm1654_vm2, %v2831_v12  ;;  %v7596_v12 = vld [vmem:[#allocation47 + $0x8] sm:$0xff]   ;;  %v7597_v14 = vld [vmem:[#allocation47] sm:$0xff]  }
 0xdc2   : > { %v2828_v15 = vpop.f32.mrf.mxu0  ;;  %6860 = vmatpush3.bf16.msra.mxu1 %v2938_v13  ;;  %6861 = vmatprep.mubr.msk.bf16.mxu1 %vm8686_vm0, %v8685_v0 }
 0xdc3   : > { %6871 = vmatprep.subr.bf16.mxu1 %v8685_v0  ;;  %v9490_v15 = vld [vmem:[%s1572_s4] sm:$0xf]  ;;  %s10012_s4 = smov 72  }
 0xdc4   : > { %v6846_v16 = vpop.f32.mrf.mxu0 }
 0xdc5   : > { %v7598_v16 = vld [vmem:[%s10005_s26 + $0x18] sm:$0xff]  }
 0xdc6   : > { %v2927_v18 = vpop.f32.mrf.mxu0 }
 0xdc7   : > { %v2933_v19 = vpack.c.bf16 %v2927_v18, %v2927_v18  ;;  %v6461_v18 = vld [vmem:[#allocation2 + $0x1] ss:$0 sm:$0xff] }
 0xdc8   : > { %v6857_v20 = vpop.f32.mrf.mxu0 }
 0xdc9   : > { %6862 = vmatmul.mubr.msk.bf16.vlgmr.msra.gmra.mxu1 %vm1654_vm2, %v2933_v19 }
 0xdca   : > { %v2930_v21 = vpop.f32.mrf.mxu0  ;;  %6872 = vmatpush3.bf16.msra.mxu1 %v3034_v3  ;;  %6873 = vmatprep.mubr.msk.bf16.mxu1 %vm8686_vm0, %v8685_v0 }
 0xdcb   : > { %6883 = vmatprep.subr.bf16.mxu1 %v8685_v0 }
 0xdcc   : > { %v6858_v22 = vpop.f32.mrf.mxu0 }
 0xdf3   : > { %v3023_v24 = vpop.f32.mrf.mxu0 }
 0xdf4   : > { %v3029_v25 = vpack.c.bf16 %v3023_v24, %v3023_v24 }
 0xdf5   : > { %v6869_v27 = vpop.f32.mrf.mxu0 }
 0xdf6   : > { %6874 = vmatmul.mubr.msk.bf16.vlgmr.msra.gmra.mxu1 %vm1654_vm2, %v3029_v25  ;;  %v6469_v25 = vld [vmem:[#allocation35] ss:$0 sm:$0xff] }
 0xdf7   : > { %v3026_v28 = vpop.f32.mrf.mxu0  ;;  %6884 = vmatpush3.bf16.msra.mxu1 %v3130_v26  ;;  %6885 = vmatprep.mubr.msk.bf16.mxu1 %vm8686_vm0, %v8685_v0 }
 0xdf8   : > { %6897 = vmatprep.subr.bf16.mxu1 %v8685_v0 }
 0xdf9   : > { %v6870_v29 = vpop.f32.mrf.mxu0 }
 0xdfb   : > { %v3119_v30 = vpop.f32.mrf.mxu0 }
 0xdfc   : > { %v3125_v31 = vpack.c.bf16 %v3119_v30, %v3119_v30 }
 0xdfd   : > { %v6881_v32 = vpop.f32.mrf.mxu0 }
 0xdfe   : > { %6886 = vmatmul.mubr.msk.bf16.vlgmr.msra.gmra.mxu1 %vm1654_vm2, %v3125_v31 }
 0xdff   : > { %v3122_v33 = vpop.f32.mrf.mxu0  ;;  %6901 = vmatprep.mubr.msk.bf16.mxu1 %vm8686_vm0, %v8685_v0  ;;  %6898 = vmatpush3.bf16.msra.mxu1 %v7598_v16 }
 0xe00   : > { %6899 = vmatprep.subr.bf16.mxu1 %v8685_v0 }
 0xe01   : > { %v6882_v34 = vpop.f32.mrf.mxu0 }
 0xe03   : > { %6900 = vmatpush3.bf16.msra.mxu1 %v7599_v17 }
 0xe04   : > { %6913 = vmatprep.subr.bf16.mxu1 %v8685_v0 }
 0xe81   : > { %v2872_v35 = vpop.f32.mrf.mxu1 }
 0xe82   : > { %v2884_v47 = vadd.f32 %v6444_v43, %v2872_v35 }
 0xe83   : > { %v6851_v36 = vpop.f32.mrf.mxu1 }
 0xe85   : > { %v2875_v37 = vpop.f32.mrf.mxu1 }
 0xe87   : > { %v6852_v38 = vpop.f32.mrf.mxu1 }
 0xe89   : > { %v2974_v39 = vpop.f32.mrf.mxu1 }
 0xe8a   : > { %v2980_v49 = vadd.f32 %v2974_v39, %v2884_v47 }
 0xe8b   : > { %v6863_v40 = vpop.f32.mrf.mxu1 }
 0xe8d   : > { %v2977_v41 = vpop.f32.mrf.mxu1 }
 0xe8f   : > { %v6864_v42 = vpop.f32.mrf.mxu1 }
 0xeb6   : > { %v3070_v44 = vpop.f32.mrf.mxu1 }
 0xeb7   : > { %v3076_v51 = vadd.f32 %v3070_v44, %v2980_v49 }
 0xeb8   : > { %v6875_v45 = vpop.f32.mrf.mxu1 }
 0xeba   : > { %v3073_v48 = vpop.f32.mrf.mxu1 }
 0xebc   : > { %v6876_v50 = vpop.f32.mrf.mxu1 }
 0xebe   : > { %v3166_v52 = vpop.f32.mrf.mxu1 }
 0xebf   : > { %v3172_v53 = vadd.f32 %v3166_v52, %v3076_v51 }
 0xec0   : > { %v6887_v55 = vpop.f32.mrf.mxu1 }
 0xec1   : > { %v3173_v56 = vadd.f32 %v3172_v53, %v9368_v46 }
 0xec2   : > { %v3169_v57 = vpop.f32.mrf.mxu1 }
 0xec3   : > { %v3174_v54 = vsel %vm1606_vm1, %v3173_v56, 0.0 }
 0xec4   : > { %3175 = vadd.xlane.f32.xlu0 %v3174_v54  ;;  %v6888_v58 = vpop.f32.mrf.mxu1 }
 0xf4d   : > { %v3176_v59 = vpop.xlane.xlu0 %3175 }
 0xf4e   : > { %v3177_v60 = vmul.f32 0.03125, %v3176_v59 }
 0xf50   : > { %v3178_v61 = vsub.f32 %v3173_v56, %v3177_v60 }
 0xf52   : > { %v3179_v62 = vmul.f32 %v3178_v61, %v3178_v61 }
 0xf54   : > { %v3180_v63 = vsel %vm1606_vm1, %v3179_v62, 0.0 }
 0xf55   : > { %3181 = vadd.xlane.f32.xlu1 %v3180_v63 }
 0xfde   : > { %v3182_v46 = vpop.xlane.xlu1 %3181 }
 0xfdf   : > { %v3183_v4 = vmul.f32 0.03125, %v3182_v46 }
 0xfe1   : > { %v3184_v5 = vadd.f32 1e-05, %v3183_v4 }
 0xfe3   : > { %7648 = vrsqrt.f32 %v3184_v5 }
 0xff0   : > { %v7649_v6 = vpop.eup %7648 }
 0xff1   : > { %v3186_v9 = vmul.f32 %v7649_v6, %v3178_v61 }
 0xff3   : > { %v3193_v11 = vmul.f32 %v6451_v7, %v3186_v9 }
 0xff5   : > { %v9479_v8 = vadd.f32 %v6452_v10, %v3193_v11 }
 0xff7   : > { %v3215_v13 = vpack.c.bf16 %v9479_v8, %v9479_v8 }
 0xff9   : > { %6894 = vmatmul.mubr.msk.bf16.vlgmr.msra.gmra.mxu0 %vm1606_vm1, %v3215_v13 }
 0xffa   : > { %6906 = vmatpush3.bf16.msra.mxu0 %v7596_v12  ;;  %6909 = vmatprep.mubr.msk.bf16.mxu0 %vm8686_vm0, %v8685_v0 }
 0xffb   : > { %6907 = vmatprep.subr.bf16.mxu0 %v8685_v0 }
 0xffe   : > { %6908 = vmatpush3.bf16.msra.mxu0 %v7597_v14 }
 0xfff   : > { %6919 = vmatprep.subr.bf16.mxu0 %v8685_v0 }
0x1001   : > { %6910 = vmatmul.mubr.msk.bf16.vlgmr.msra.gmra.mxu0 %vm1606_vm1, %v9490_v15 }
0x1002   : > { %6921 = vmatprep.mubr.msk.bf16.mxu0 %vm8686_vm0, %v8685_v0 }
0x10b9   : > { %v3271_v19 = vpop.f32.mrf.mxu0 }
0x10ba   : > { %v3272_v3 = vadd.f32 %v6461_v18, %v3271_v19 }
0x10bb   : > { %v6895_v20 = vpop.f32.mrf.mxu0 }
0x10bc   : > { %v3277_v21 = vmax.f32 %v3272_v3, 0.0 }
0x10bd   : > { %v3274_v22 = vpop.f32.mrf.mxu0 }
0x10be   : > { %v3278_v23 = vpack.c.bf16 %v3277_v21, %v3277_v21 }
0x10bf   : > { %v6896_v24 = vpop.f32.mrf.mxu0 }
0x10c0   : > { %6902 = vmatmul.mubr.msk.bf16.vlgmr.msra.gmra.mxu1 %vm1606_vm1, %v3278_v23 }
0x10c1   : > { %v3411_v26 = vpop.f32.mrf.mxu0  ;;  %6915 = vmatprep.mubr.msk.bf16.mxu1 %vm8686_vm0, %v8685_v0 }
0x10c2   : > { %v3412_v27 = vadd.f32 %v6469_v25, %v3411_v26 }
0x10c3   : > { %v6911_v28 = vpop.f32.mrf.mxu0 }
0x10c4   : > { %v9504_v29 = vpack.c.bf16 %v3412_v27, %v3412_v27 }
0x10c5   : > { %v3414_v30 = vpop.f32.mrf.mxu0 }
0x10c6   : > { %3469 = vrot.lane.b32.xlu1 %v9504_v29, %s8690_s17  ;;  %3419 = vrot.lane.b32.xlu0 %v9504_v29, %s9907_s28  ;;  %s10016_s28 = sld [smem:[#allocation90_spill]] }
0x10c7   : > { %v6912_v31 = vpop.f32.mrf.mxu0 }
0x10ca   : > { %3519 = vrot.lane.b32.xlu1 %v9504_v29, %s9905_s2  ;;  %3467 = vrot.lane.b32.xlu0 %v9504_v29, %s10011_s11  ;;  %s10015_s2 = smov 64  }
0x10ce   : > { %3569 = vrot.lane.b32.xlu1 %v9504_v29, %s10012_s4  ;;  %3517 = vrot.lane.b32.xlu0 %v9504_v29, %s10013_s18 }
0x10d2   : > { %3567 = vrot.lane.b32.xlu0 %v9504_v29, %s10014_s3 }
0x1138   : > { %v3470_v32 = vpop.permute.xlu1 %3469  ;;  %v3420_v33 = vpop.permute.xlu0 %3419 }
0x1139   : > { %v3475_v34 = vsel %vm1654_vm2, %v3470_v32, 0  ;;  %v3425_v35 = vsel %vm1654_vm2, %v3420_v33, 0 }
0x113a   : > { %6914 = vmatpush3.bf16.xpose.msra.mxu1 %v3425_v35  ;;  %6920 = vmatpush3.bf16.xpose.msra.mxu0 %v3475_v34 }
0x113b   : > { %6925 = vmatprep.subr.bf16.mxu1 %v8685_v0  ;;  %6931 = vmatprep.subr.bf16.mxu0 %v8685_v0 }
0x113c   : > { %v3520_v36 = vpop.permute.xlu1 %3519  ;;  %v3468_v37 = vpop.permute.xlu0 %3467 }
0x113d   : > { %v3525_v39 = vsel %vm1654_vm2, %v3520_v36, 0 }
0x1140   : > { %v3570_v38 = vpop.permute.xlu1 %3569  ;;  %v3518_v41 = vpop.permute.xlu0 %3517 }
0x1141   : > { %v3575_v40 = vsel %vm1654_vm2, %v3570_v38, 0  ;;  %6916 = vmatmul.mubr.msk.bf16.vlgmr.msra.gmra.mxu1 %vm1654_vm2, %v9504_v29  ;;  %6922 = vmatmul.mubr.msk.bf16.vlgmr.msra.gmra.mxu0 %vm1654_vm2, %v3468_v37 }
0x1142   : > { %6926 = vmatpush3.bf16.xpose.msra.mxu1 %v3525_v39  ;;  %6932 = vmatpush3.bf16.xpose.msra.mxu0 %v3575_v40 }
0x1143   : > { %6927 = vmatprep.mubr.msk.bf16.mxu1 %vm8686_vm0, %v8685_v0  ;;  %6933 = vmatprep.mubr.msk.bf16.mxu0 %vm8686_vm0, %v8685_v0 }
0x1144   : > { %6937 = vmatprep.subr.bf16.mxu1 %v8685_v0  ;;  %6943 = vmatprep.subr.bf16.mxu0 %v8685_v0  ;;  %v3568_v42 = vpop.permute.xlu0 %3567 }
0x1149   : > { %6928 = vmatmul.mubr.msk.bf16.vlgmr.msra.gmra.mxu1 %vm1654_vm2, %v3518_v41  ;;  %6934 = vmatmul.mubr.msk.bf16.vlgmr.msra.gmra.mxu0 %vm1654_vm2, %v3568_v42 }
0x114a   : > { %6939 = vmatprep.mubr.msk.bf16.mxu1 %vm8686_vm0, %v8685_v0  ;;  %6945 = vmatprep.mubr.msk.bf16.mxu0 %vm8686_vm0, %v8685_v0 }
0x1180   : > { %v9541_v43 = vpop.f32.mrf.mxu1 }
0x1182   : > { %v6903_v44 = vpop.f32.mrf.mxu1 }
0x1184   : > { %v3337_v45 = vpop.f32.mrf.mxu1 }
0x1186   : > { %v6904_v47 = vpop.f32.mrf.mxu1 }
0x1201   : > { %v3461_v48 = vpop.f32.mrf.mxu1  ;;  %v3511_v49 = vpop.f32.mrf.mxu0 }
0x1202   : > { %v3620_v50 = vsel %vm1654_vm2, %v3511_v49, -inf  ;;  %v3617_v51 = vsel %vm1654_vm2, %v3461_v48, -inf }
0x1203   : > { %3621 = vmax.xlane.f32.xlu0 %v3620_v50  ;;  %v6923_v52 = vpop.f32.mrf.mxu0  ;;  %3618 = vmax.xlane.f32.xlu1 %v3617_v51  ;;  %v6917_v53 = vpop.f32.mrf.mxu1 }
0x1204   : > { %v3349_v52 = vld [vmem:[#allocation43] sm:$0xf] }
0x1205   : > { %v3464_v55 = vpop.f32.mrf.mxu1  ;;  %v3514_v56 = vpop.f32.mrf.mxu0  ;;  %v3718_v53 = vsel %vm1904_vm3, %v3349_v52, 0 }
0x1206   : > { %6944 = vmatpush3.bf16.msra.mxu0 %v3718_v53  ;;  %v3350_v55 = vld [vmem:[#allocation43 + $0x4] sm:$0xf] }
0x1207   : > { %v6918_v57 = vpop.f32.mrf.mxu1  ;;  %v6924_v54 = vpop.f32.mrf.mxu0  ;;  %6955 = vmatprep.subr.bf16.mxu0 %v8685_v0 }
0x1208   : > { %v3820_v54 = vsel %vm1904_vm3, %v3350_v55, 0 }
0x1209   : > { %v3561_v58 = vpop.f32.mrf.mxu1  ;;  %v3611_v59 = vpop.f32.mrf.mxu0 }
0x120a   : > { %v3626_v60 = vsel %vm1654_vm2, %v3611_v59, -inf  ;;  %v3623_v61 = vsel %vm1654_vm2, %v3561_v58, -inf }
0x120b   : > { %v6935_v62 = vpop.f32.mrf.mxu0  ;;  %3627 = vmax.xlane.f32.xlu1 %v3626_v60  ;;  %3624 = vmax.xlane.f32.xlu0 %v3623_v61  ;;  %v6929_v63 = vpop.f32.mrf.mxu1  ;;  %v3351_v61 = vld [vmem:[#allocation43 + $0x8] sm:$0xf] }
0x120d   : > { %v3564_v1 = vpop.f32.mrf.mxu1  ;;  %v3614_v2 = vpop.f32.mrf.mxu0 }
0x120e   : > { %v3916_v1 = vsel %vm1904_vm3, %v3351_v61, 0 }
0x120f   : > { %v6930_v46 = vpop.f32.mrf.mxu1  ;;  %v6936_v4 = vpop.f32.mrf.mxu0 }
0x128c   : > { %v3622_v5 = vpop.xlane.xlu0 %3621  ;;  %v3619_v6 = vpop.xlane.xlu1 %3618 }
0x128d   : > { %v3630_v7 = vsub.f32 %v3511_v49, %v3622_v5  ;;  %v3629_v9 = vsub.f32 %v3461_v48, %v3619_v6  ;;  %v3352_v5 = vld [vmem:[#allocation43 + $0xc] sm:$0xf] }
0x128f   : > { %v3635_v10 = vmul.f32 1.442695, %v3630_v7  ;;  %v3633_v11 = vmul.f32 1.442695, %v3629_v9  ;;  %v4012_v9 = vsel %vm1904_vm3, %v3352_v5, 0 }
0x1291   : > { %7650 = vpow2.f32 %v3635_v10 }
0x1292   : > { %7652 = vpow2.f32 %v3633_v11 }
0x1294   : > { %v3625_v12 = vpop.xlane.xlu0 %3624  ;;  %v3628_v21 = vpop.xlane.xlu1 %3627 }
0x1295   : > { %v3631_v13 = vsub.f32 %v3561_v58, %v3625_v12  ;;  %v3632_v22 = vsub.f32 %v3611_v59, %v3628_v21 }
0x1297   : > { %v3637_v14 = vmul.f32 1.442695, %v3631_v13  ;;  %v3639_v23 = vmul.f32 1.442695, %v3632_v22  ;;  %v6465_v13 = vld [vmem:[#allocation5 + $0x1] ss:$0 sm:$0xff] }
0x1299   : > { %7654 = vpow2.f32 %v3637_v14 }
0x129a   : > { %7656 = vpow2.f32 %v3639_v23 }
0x129e   : > { %v7651_v16 = vpop.eup %7650 }
0x129f   : > { %v7653_v17 = vpop.eup %7652  ;;  %v3644_v18 = vsel %vm1654_vm2, %v7651_v16, 0.0 }
0x12a0   : > { %3645 = vadd.xlane.f32.xlu1 %v3644_v18  ;;  %v3641_v19 = vsel %vm1654_vm2, %v7653_v17, 0.0 }
0x12a1   : > { %3642 = vadd.xlane.f32.xlu0 %v3641_v19 }
0x12a6   : > { %v7655_v3 = vpop.eup %7654 }
0x12a7   : > { %v3647_v20 = vsel %vm1654_vm2, %v7655_v3, 0.0  ;;  %v7657_v24 = vpop.eup %7656 }
0x12a8   : > { %3648 = vadd.xlane.f32.xlu0 %v3647_v20  ;;  %v3650_v25 = vsel %vm1654_vm2, %v7657_v24, 0.0  ;;  %v7601_v20 = vld [vmem:[%s10016_s28] sm:$0xff]  }
0x12b1   : > { %3767 = vrot.lane.b32.xlu1 %v9504_v29, %s10006_s0 }
0x12be   : > { %3665 = vrot.lane.b32.xlu0 %v9504_v29, %s10015_s2 }
0x12c2   : > { %3959 = vrot.lane.b32.xlu0 %v9504_v29, %s10008_s25 }
0x12d5   : > { %3651 = vadd.xlane.f32.xlu1 %v3650_v25 }
0x12e6   : > { %3863 = vrot.lane.b32.xlu1 %v9504_v29, %s10007_s10 }
0x1329   : > { %v3646_v27 = vpop.xlane.xlu1 %3645 }
0x132a   : > { %v3643_v26 = vpop.xlane.xlu0 %3642 }
0x132b   : > { %7658 = vrcp.f32 %v3643_v26 }
0x132c   : > { %7660 = vrcp.f32 %v3646_v27 }
0x132d   : > { %v3768_v34 = vpop.permute.xlu1 %3767 }
0x132e   : > { %v3773_v37 = vsel %vm1904_vm3, %v3768_v34, 0 }
0x1331   : > { %v3649_v28 = vpop.xlane.xlu0 %3648 }
0x1332   : > { %7662 = vrcp.f32 %v3649_v28 }
0x1335   : > { %v3666_v30 = vpop.permute.xlu0 %3665 }
0x1336   : > { %v3671_v31 = vsel %vm1904_vm3, %v3666_v30, 0 }
0x1337   : > { %6938 = vmatpush3.bf16.msra.mxu1 %v3671_v31 }
0x1338   : > { %v7659_v32 = vpop.eup %7658  ;;  %6949 = vmatprep.subr.bf16.mxu1 %v8685_v0 }
0x1339   : > { %v3654_v33 = vmul.f32 %v7659_v32, %v7653_v17  ;;  %v7661_v36 = vpop.eup %7660  ;;  %v3960_v45 = vpop.permute.xlu0 %3959  ;;  %v3335_v17 = vadd.f32 %v6465_v13, %v9541_v43  ;;  %v6479_v32 = vld [vmem:[#allocation31] ss:$0 sm:$0xff] }
0x133a   : > { %v3656_v29 = vmul.f32 %v7661_v36, %v7651_v16  ;;  %v3965_v48 = vsel %vm1904_vm3, %v3960_v45, 0  ;;  %v7600_v16 = vld [vmem:[%s10016_s28 + $0x8] sm:$0xff]  }
0x133b   : > { %v3661_v35 = vpack.c.bf16 %v3654_v33, %v3654_v33  ;;  %v3340_v21 = vadd.f32 %v3335_v17, %v9479_v8 }
0x133c   : > { %v3662_v38 = vpack.c.bf16 %v3656_v29, %v3656_v29 }
0x133d   : > { %6940 = vmatmul.mubr.msk.bf16.vlgmr.msra.gmra.mxu1 %vm1654_vm2, %v3661_v35  ;;  %v3341_v23 = vpack.c.bf16 %v3340_v21, %v3340_v21 }
0x133e   : > { %6950 = vmatpush3.bf16.msra.mxu1 %v3773_v37  ;;  %6951 = vmatprep.mubr.msk.bf16.mxu1 %vm8686_vm0, %v8685_v0 }
0x133f   : > { %6961 = vmatprep.subr.bf16.mxu1 %v8685_v0  ;;  %v7663_v39 = vpop.eup %7662 }
0x1340   : > { %v3658_v41 = vmul.f32 %v7663_v39, %v7655_v3 }
0x1342   : > { %v3663_v47 = vpack.c.bf16 %v3658_v41, %v3658_v41 }
0x1345   : > { %6952 = vmatmul.mubr.msk.bf16.vlgmr.msra.gmra.mxu1 %vm1654_vm2, %v3662_v38  ;;  %v3343_v38 = vunpack.c.l.bf16 %v9490_v15  ;;  %v6492_v15 = vld [vmem:[#allocation29] ss:$0 sm:$0xff] }
0x1346   : > { %6963 = vmatprep.mubr.msk.bf16.mxu1 %vm8686_vm0, %v8685_v0 }
0x135e   : > { %v3652_v40 = vpop.xlane.xlu1 %3651 }
0x135f   : > { %7664 = vrcp.f32 %v3652_v40 }
0x1362   : > { %v3864_v42 = vpop.permute.xlu1 %3863 }
0x1363   : > { %v3869_v44 = vsel %vm1904_vm3, %v3864_v42, 0 }
0x1364   : > { %6962 = vmatpush3.bf16.msra.mxu1 %v3869_v44 }
0x1365   : > { %6973 = vmatprep.subr.bf16.mxu1 %v8685_v0 }
0x1367   : > { %6964 = vmatmul.mubr.msk.bf16.vlgmr.msra.gmra.mxu1 %vm1654_vm2, %v3663_v47 }
0x1368   : > { %6974 = vmatpush3.bf16.msra.mxu1 %v3965_v48  ;;  %6975 = vmatprep.mubr.msk.bf16.mxu1 %vm8686_vm0, %v8685_v0 }
0x1369   : > { %6985 = vmatprep.subr.bf16.mxu1 %v8685_v0 }
0x136c   : > { %v7665_v49 = vpop.eup %7664 }
0x136d   : > { %v3660_v50 = vmul.f32 %v7665_v49, %v7657_v24 }
0x136f   : > { %v3664_v51 = vpack.c.bf16 %v3660_v50, %v3660_v50 }
0x1371   : > { %6976 = vmatmul.mubr.msk.bf16.vlgmr.msra.gmra.mxu1 %vm1654_vm2, %v3664_v51 }
0x1372   : > { %6989 = vmatprep.mubr.msk.bf16.mxu1 %vm8686_vm0, %v8685_v0 }
0x13fd   : > { %v3707_v56 = vpop.f32.mrf.mxu1 }
0x13fe   : > { %v3713_v57 = vpack.c.bf16 %v3707_v56, %v3707_v56 }
0x13ff   : > { %v6941_v58 = vpop.f32.mrf.mxu1 }
0x1400   : > { %6946 = vmatmul.mubr.msk.bf16.vlgmr.msra.gmra.mxu0 %vm1654_vm2, %v3713_v57 }
0x1401   : > { %v3710_v59 = vpop.f32.mrf.mxu1  ;;  %6956 = vmatpush3.bf16.msra.mxu0 %v3820_v54  ;;  %6957 = vmatprep.mubr.msk.bf16.mxu0 %vm8686_vm0, %v8685_v0 }
0x1402   : > { %6967 = vmatprep.subr.bf16.mxu0 %v8685_v0  ;;  %v7602_v59 = vld [vmem:[#allocation46 + $0x8] sm:$0xff]  }
0x1403   : > { %v6942_v60 = vpop.f32.mrf.mxu1  ;;  %6986 = vmatpush3.bf16.msra.mxu1 %v7602_v59 }
0x1404   : > { %v7603_v60 = vld [vmem:[#allocation46] sm:$0xff]   ;;  %6987 = vmatprep.subr.bf16.mxu1 %v8685_v0 }
0x1405   : > { %v3809_v62 = vpop.f32.mrf.mxu1 }
0x1406   : > { %v3815_v63 = vpack.c.bf16 %v3809_v62, %v3809_v62 }
0x1407   : > { %v6953_v2 = vpop.f32.mrf.mxu1  ;;  %6988 = vmatpush3.bf16.msra.mxu1 %v7603_v60 }
0x1408   : > { %6958 = vmatmul.mubr.msk.bf16.vlgmr.msra.gmra.mxu0 %vm1654_vm2, %v3815_v63  ;;  %7001 = vmatprep.subr.bf16.mxu1 %v8685_v0 }
0x1409   : > { %v3812_v46 = vpop.f32.mrf.mxu1  ;;  %6968 = vmatpush3.bf16.msra.mxu0 %v3916_v1  ;;  %6969 = vmatprep.mubr.msk.bf16.mxu0 %vm8686_vm0, %v8685_v0 }
0x140a   : > { %6979 = vmatprep.subr.bf16.mxu0 %v8685_v0 }
0x140b   : > { %v6954_v4 = vpop.f32.mrf.mxu1 }
0x140c   : > { %v6486_v4 = vld [vmem:[#allocation38] ss:$0 sm:$0xff] }
0x1427   : > { %v3905_v6 = vpop.f32.mrf.mxu1 }
0x1428   : > { %v3911_v7 = vpack.c.bf16 %v3905_v6, %v3905_v6  ;;  %v6487_v6 = vld [vmem:[#allocation37] ss:$0 sm:$0xff] }
0x1429   : > { %v6965_v10 = vpop.f32.mrf.mxu1 }
0x142a   : > { %6970 = vmatmul.mubr.msk.bf16.vlgmr.msra.gmra.mxu0 %vm1654_vm2, %v3911_v7 }
0x142b   : > { %v3908_v11 = vpop.f32.mrf.mxu1  ;;  %6980 = vmatpush3.bf16.msra.mxu0 %v4012_v9  ;;  %6981 = vmatprep.mubr.msk.bf16.mxu0 %vm8686_vm0, %v8685_v0 }
0x142c   : > { %6993 = vmatprep.subr.bf16.mxu0 %v8685_v0 }
0x142d   : > { %v6966_v12 = vpop.f32.mrf.mxu1 }
0x142e   : > { %v6488_v12 = vld [vmem:[#allocation34] ss:$0 sm:$0xff] }
0x1431   : > { %v4001_v14 = vpop.f32.mrf.mxu1 }
0x1432   : > { %v4007_v18 = vpack.c.bf16 %v4001_v14, %v4001_v14 }
0x1433   : > { %v6977_v19 = vpop.f32.mrf.mxu1 }
0x1434   : > { %6982 = vmatmul.mubr.msk.bf16.vlgmr.msra.gmra.mxu0 %vm1654_vm2, %v4007_v18 }
0x1435   : > { %v4004_v3 = vpop.f32.mrf.mxu1  ;;  %6994 = vmatpush3.bf16.msra.mxu0 %v7600_v16  ;;  %6997 = vmatprep.mubr.msk.bf16.mxu0 %vm8686_vm0, %v8685_v0 }
0x1436   : > { %6995 = vmatprep.subr.bf16.mxu0 %v8685_v0 }
0x1437   : > { %v6978_v22 = vpop.f32.mrf.mxu1 }
0x1439   : > { %6996 = vmatpush3.bf16.msra.mxu0 %v7601_v20 }
0x143a   : > { %7007 = vmatprep.subr.bf16.mxu0 %v8685_v0 }
0x143c   : > { %6998 = vmatmul.mubr.msk.bf16.vlgmr.msra.gmra.mxu0 %vm1606_vm1, %v3341_v23 }
0x143d   : > { %7009 = vmatprep.mubr.msk.bf16.mxu0 %vm8686_vm0, %v8685_v0 }
0x14c0   : > { %v3754_v43 = vpop.f32.mrf.mxu0 }
0x14c1   : > { %v3766_v35 = vadd.f32 %v6479_v32, %v3754_v43 }
0x14c2   : > { %v6947_v24 = vpop.f32.mrf.mxu0 }
0x14c4   : > { %v3757_v25 = vpop.f32.mrf.mxu0 }
0x14c6   : > { %v6948_v26 = vpop.f32.mrf.mxu0 }
0x14c8   : > { %v3856_v27 = vpop.f32.mrf.mxu0 }
0x14c9   : > { %v3862_v37 = vadd.f32 %v3856_v27, %v3766_v35 }
0x14ca   : > { %v6959_v28 = vpop.f32.mrf.mxu0 }
0x14cc   : > { %v3859_v30 = vpop.f32.mrf.mxu0 }
0x14ce   : > { %v6960_v8 = vpop.f32.mrf.mxu0 }
0x14ea   : > { %v3952_v31 = vpop.f32.mrf.mxu0 }
0x14eb   : > { %v3958_v29 = vadd.f32 %v3952_v31, %v3862_v37 }
0x14ec   : > { %v6971_v33 = vpop.f32.mrf.mxu0 }
0x14ee   : > { %v3955_v34 = vpop.f32.mrf.mxu0 }
0x14f0   : > { %v6972_v36 = vpop.f32.mrf.mxu0 }
0x14f4   : > { %v4048_v39 = vpop.f32.mrf.mxu0 }
0x14f5   : > { %v4054_v40 = vadd.f32 %v4048_v39, %v3958_v29 }
0x14f6   : > { %v6983_v41 = vpop.f32.mrf.mxu0 }
0x14f7   : > { %v4055_v42 = vadd.f32 %v4054_v40, %v3343_v38 }
0x14f8   : > { %v4051_v44 = vpop.f32.mrf.mxu0 }
0x14f9   : > { %v4056_v45 = vsel %vm1606_vm1, %v4055_v42, 0.0 }
0x14fa   : > { %4057 = vadd.xlane.f32.xlu1 %v4056_v45  ;;  %v6984_v47 = vpop.f32.mrf.mxu0 }
0x14fc   : > { %v4215_v48 = vpop.f32.mrf.mxu0 }
0x14fd   : > { %v4216_v54 = vadd.f32 %v6492_v15, %v4215_v48 }
0x14fe   : > { %v6999_v49 = vpop.f32.mrf.mxu0 }
0x14ff   : > { %v9611_v58 = vpack.c.bf16 %v4216_v54, %v4216_v54 }
0x1500   : > { %v4218_v50 = vpop.f32.mrf.mxu0 }
0x1501   : > { %v4227_v11 = vsel %vm1654_vm2, %v9611_v58, 0 }
0x1502   : > { %v7000_v51 = vpop.f32.mrf.mxu0 }
0x1583   : > { %v4058_v52 = vpop.xlane.xlu1 %4057 }
0x1584   : > { %v4059_v53 = vmul.f32 0.03125, %v4058_v52 }
0x1586   : > { %v4060_v55 = vsub.f32 %v4055_v42, %v4059_v53 }
0x1588   : > { %v4061_v56 = vmul.f32 %v4060_v55, %v4060_v55 }
0x158a   : > { %v4062_v57 = vsel %vm1606_vm1, %v4061_v56, 0.0 }
0x158b   : > { %4063 = vadd.xlane.f32.xlu0 %v4062_v57 }
0x15a1   : > { %4273 = vrot.lane.b32.xlu0 %v9611_v58, %s10011_s11 }
0x1614   : > { %v4064_v61 = vpop.xlane.xlu0 %4063 }
0x1615   : > { %v4065_v62 = vmul.f32 0.03125, %v4064_v61 }
0x1617   : > { %v4066_v63 = vadd.f32 1e-05, %v4065_v62 }
0x1618   : > { %v4274_v1 = vpop.permute.xlu0 %4273 }
0x1619   : > { %7666 = vrsqrt.f32 %v4066_v63  ;;  %v4279_v2 = vsel %vm1654_vm2, %v4274_v1, 0 }
0x161a   : > { %7008 = vmatpush3.bf16.xpose.msra.mxu0 %v4279_v2 }
0x161b   : > { %7019 = vmatprep.subr.bf16.mxu0 %v8685_v0 }
0x1626   : > { %v7667_v46 = vpop.eup %7666 }
0x1627   : > { %v4068_v5 = vmul.f32 %v7667_v46, %v4060_v55 }
0x1629   : > { %v4075_v7 = vmul.f32 %v6486_v4, %v4068_v5 }
0x162b   : > { %v4082_v9 = vadd.f32 %v6487_v6, %v4075_v7 }
0x162d   : > { %v4098_v10 = vpack.c.bf16 %v4082_v9, %v4082_v9 }
0x162f   : > { %6990 = vmatmul.mubr.msk.bf16.vlgmr.msra.gmra.mxu1 %vm1606_vm1, %v4098_v10 }
0x1630   : > { %7002 = vmatpush3.bf16.xpose.msra.mxu1 %v4227_v11  ;;  %7003 = vmatprep.mubr.msk.bf16.mxu1 %vm8686_vm0, %v8685_v0 }
0x1631   : > { %7013 = vmatprep.subr.bf16.mxu1 %v8685_v0 }
0x16ef   : > { %v4154_v13 = vpop.f32.mrf.mxu1 }
0x16f0   : > { %v4155_v14 = vadd.f32 %v6488_v12, %v4154_v13 }
0x16f1   : > { %v6991_v16 = vpop.f32.mrf.mxu1 }
0x16f2   : > { %v4221_v17 = vpack.c.bf16 %v4155_v14, %v4155_v14 }
0x16f3   : > { %v4157_v18 = vpop.f32.mrf.mxu1 }
0x16f4   : > { %4321 = vrot.lane.b32.xlu0 %v4221_v17, %s10013_s18  ;;  %4270 = vrot.lane.b32.xlu1 %v4221_v17, %s10011_s11 }
0x16f5   : > { %7004 = vmatmul.mubr.msk.bf16.vlgmr.msra.gmra.mxu1 %vm1654_vm2, %v4221_v17  ;;  %v6992_v19 = vpop.f32.mrf.mxu1 }
0x16f6   : > { %7015 = vmatprep.mubr.msk.bf16.mxu1 %vm8686_vm0, %v8685_v0 }
0x16f8   : > { %4371 = vrot.lane.b32.xlu0 %v4221_v17, %s10014_s3  ;;  %4323 = vrot.lane.b32.xlu1 %v9611_v58, %s10013_s18 }
0x16fc   : > { %4373 = vrot.lane.b32.xlu1 %v9611_v58, %s10014_s3 }
0x1766   : > { %v4271_v3 = vpop.permute.xlu1 %4270  ;;  %v4322_v43 = vpop.permute.xlu0 %4321 }
0x1767   : > { %7010 = vmatmul.mubr.msk.bf16.vlgmr.msra.gmra.mxu0 %vm1654_vm2, %v4271_v3 }
0x1768   : > { %7021 = vmatprep.mubr.msk.bf16.mxu0 %vm8686_vm0, %v8685_v0 }
0x176a   : > { %v4324_v20 = vpop.permute.xlu1 %4323  ;;  %v4372_v24 = vpop.permute.xlu0 %4371 }
0x176b   : > { %v4329_v21 = vsel %vm1654_vm2, %v4324_v20, 0 }
0x176c   : > { %7014 = vmatpush3.bf16.xpose.msra.mxu1 %v4329_v21 }
0x176d   : > { %7025 = vmatprep.subr.bf16.mxu1 %v8685_v0 }
0x176e   : > { %v4374_v22 = vpop.permute.xlu1 %4373 }
0x176f   : > { %v4379_v23 = vsel %vm1654_vm2, %v4374_v22, 0 }
0x1770   : > { %7020 = vmatpush3.bf16.xpose.msra.mxu0 %v4379_v23 }
0x1771   : > { %7031 = vmatprep.subr.bf16.mxu0 %v8685_v0 }
0x1773   : > { %7016 = vmatmul.mubr.msk.bf16.vlgmr.msra.gmra.mxu1 %vm1654_vm2, %v4322_v43 }
0x1774   : > { %7027 = vmatprep.mubr.msk.bf16.mxu1 %vm8686_vm0, %v8685_v0 }
0x1777   : > { %7022 = vmatmul.mubr.msk.bf16.vlgmr.msra.gmra.mxu0 %vm1654_vm2, %v4372_v24 }
0x1778   : > { %7033 = vmatprep.mubr.msk.bf16.mxu0 %vm8686_vm0, %v8685_v0 }
0x17b5   : > { %v4263_v25 = vpop.f32.mrf.mxu1 }
0x17b6   : > { %v4421_v26 = vsel %vm1654_vm2, %v4263_v25, -inf }
0x17b7   : > { %4422 = vmax.xlane.f32.xlu1 %v4421_v26  ;;  %v7005_v27 = vpop.f32.mrf.mxu1  ;;  %v4093_v26 = vld [vmem:[#allocation44] sm:$0xf] }
0x17b8   : > { %v4522_v27 = vsel %vm1904_vm3, %v4093_v26, 0  ;;  %v7609_v26 = vld [vmem:[#allocation25] sm:$0xff]  }
0x17b9   : > { %v4266_v28 = vpop.f32.mrf.mxu1  ;;  %7032 = vmatpush3.bf16.msra.mxu0 %v4522_v27  ;;  %v6513_v27 = vld [vmem:[#allocation28] ss:$0 sm:$0xff] }
0x17ba   : > { %7043 = vmatprep.subr.bf16.mxu0 %v8685_v0  ;;  %v4094_v28 = vld [vmem:[#allocation44 + $0x4] sm:$0xf] }
0x17bb   : > { %v7006_v30 = vpop.f32.mrf.mxu1 }
0x1827   : > { %v4315_v8 = vpop.f32.mrf.mxu0 }
0x1828   : > { %v4424_v31 = vsel %vm1654_vm2, %v4315_v8, -inf }
0x1829   : > { %4425 = vmax.xlane.f32.xlu0 %v4424_v31  ;;  %v7011_v32 = vpop.f32.mrf.mxu0  ;;  %v4624_v31 = vsel %vm1904_vm3, %v4094_v28, 0 }
0x182b   : > { %v4318_v33 = vpop.f32.mrf.mxu0 }
0x182d   : > { %v7012_v34 = vpop.f32.mrf.mxu0 }
0x1833   : > { %v4365_v35 = vpop.f32.mrf.mxu1 }
0x1834   : > { %v4427_v36 = vsel %vm1654_vm2, %v4365_v35, -inf }
0x1835   : > { %4428 = vmax.xlane.f32.xlu0 %v4427_v36  ;;  %v7017_v37 = vpop.f32.mrf.mxu1 }
0x1837   : > { %v4368_v29 = vpop.f32.mrf.mxu1  ;;  %v4415_v38 = vpop.f32.mrf.mxu0 }
0x1838   : > { %v4430_v39 = vsel %vm1654_vm2, %v4415_v38, -inf }
0x1839   : > { %v7023_v40 = vpop.f32.mrf.mxu0  ;;  %4431 = vmax.xlane.f32.xlu1 %v4430_v39  ;;  %v7018_v41 = vpop.f32.mrf.mxu1 }
0x183a   : > { %v4096_v41 = vld [vmem:[#allocation44 + $0xc] sm:$0xf] }
0x183b   : > { %v4418_v42 = vpop.f32.mrf.mxu0 }
0x183d   : > { %v7024_v44 = vpop.f32.mrf.mxu0 }
0x1840   : > { %v4423_v45 = vpop.xlane.xlu1 %4422 }
0x1841   : > { %v4433_v47 = vsub.f32 %v4263_v25, %v4423_v45  ;;  %v4816_v45 = vsel %vm1904_vm3, %v4096_v41, 0 }
0x1843   : > { %v4437_v48 = vmul.f32 1.442695, %v4433_v47 }
0x1845   : > { %7668 = vpow2.f32 %v4437_v48 }
0x1852   : > { %v7669_v49 = vpop.eup %7668 }
0x1853   : > { %v4445_v50 = vsel %vm1654_vm2, %v7669_v49, 0.0 }
0x1854   : > { %4446 = vadd.xlane.f32.xlu0 %v4445_v50 }
0x18b2   : > { %v4426_v51 = vpop.xlane.xlu0 %4425 }
0x18b3   : > { %v4434_v52 = vsub.f32 %v4315_v8, %v4426_v51 }
0x18b5   : > { %v4439_v53 = vmul.f32 1.442695, %v4434_v52 }
0x18b7   : > { %7670 = vpow2.f32 %v4439_v53 }
0x18be   : > { %v4429_v55 = vpop.xlane.xlu0 %4428 }
0x18bf   : > { %v4435_v56 = vsub.f32 %v4365_v35, %v4429_v55  ;;  %v4095_v35 = vld [vmem:[#allocation44 + $0x8] sm:$0xf] }
0x18c0   : > { %v4720_v29 = vsel %vm1904_vm3, %v4095_v35, 0  ;;  %v6517_v35 = vld [vmem:[#allocation19] ss:$0 sm:$0xff] }
0x18c1   : > { %v4441_v57 = vmul.f32 1.442695, %v4435_v56  ;;  %v7604_v56 = vld [vmem:[#allocation40 + $0x8] sm:$0xff]  }
0x18c2   : > { %v4432_v61 = vpop.xlane.xlu1 %4431 }
0x18c3   : > { %7672 = vpow2.f32 %v4441_v57  ;;  %v4436_v62 = vsub.f32 %v4415_v38, %v4432_v61  ;;  %v7605_v57 = vld [vmem:[#allocation40] sm:$0xff]  }
0x18c4   : > { %v7671_v15 = vpop.eup %7670 }
0x18c5   : > { %v4448_v54 = vsel %vm1654_vm2, %v7671_v15, 0.0  ;;  %v4443_v63 = vmul.f32 1.442695, %v4436_v62 }
0x18c6   : > { %4449 = vadd.xlane.f32.xlu1 %v4448_v54 }
0x18c7   : > { %7674 = vpow2.f32 %v4443_v63 }
0x18d0   : > { %v7673_v59 = vpop.eup %7672 }
0x18d1   : > { %v4451_v60 = vsel %vm1654_vm2, %v7673_v59, 0.0 }
0x18d2   : > { %4452 = vadd.xlane.f32.xlu0 %v4451_v60 }
0x18d4   : > { %v7675_v1 = vpop.eup %7674 }
0x18d5   : > { %v4454_v2 = vsel %vm1654_vm2, %v7675_v1, 0.0 }
0x18d7   : > { %4571 = vrot.lane.b32.xlu1 %v9611_v58, %s8690_s17 }
0x18dd   : > { %v4447_v46 = vpop.xlane.xlu0 %4446 }
0x18de   : > { %7676 = vrcp.f32 %v4447_v46  ;;  %v6502_v46 = vld [vmem:[#allocation32] ss:$0 sm:$0xff] }
0x18e8   : > { %4469 = vrot.lane.b32.xlu0 %v9611_v58, %s10017_s1 }
0x18eb   : > { %v7677_v5 = vpop.eup %7676 }
0x18ec   : > { %4763 = vrot.lane.b32.xlu0 %v9611_v58, %s10012_s4  ;;  %v4458_v7 = vmul.f32 %v7677_v5, %v7669_v49 }
0x18ee   : > { %v4465_v12 = vpack.c.bf16 %v4458_v7, %v4458_v7 }
0x18fb   : > { %4455 = vadd.xlane.f32.xlu1 %v4454_v2 }
0x190c   : > { %4667 = vrot.lane.b32.xlu1 %v9611_v58, %s10018_s5 }
0x194f   : > { %v4450_v4 = vpop.xlane.xlu1 %4449 }
0x1950   : > { %7678 = vrcp.f32 %v4450_v4 }
0x1953   : > { %v4572_v11 = vpop.permute.xlu1 %4571 }
0x1954   : > { %v4577_v14 = vsel %vm1904_vm3, %v4572_v11, 0 }
0x195b   : > { %v4453_v6 = vpop.xlane.xlu0 %4452 }
0x195c   : > { %7680 = vrcp.f32 %v4453_v6 }
0x195d   : > { %v7679_v13 = vpop.eup %7678 }
0x195e   : > { %v4460_v58 = vmul.f32 %v7679_v13, %v7671_v15 }
0x195f   : > { %v4470_v9 = vpop.permute.xlu0 %4469 }
0x1960   : > { %v4475_v10 = vsel %vm1904_vm3, %v4470_v9, 0  ;;  %v4466_v16 = vpack.c.bf16 %v4460_v58, %v4460_v58 }
0x1961   : > { %7026 = vmatpush3.bf16.msra.mxu1 %v4475_v10 }
0x1962   : > { %7037 = vmatprep.subr.bf16.mxu1 %v8685_v0 }
0x1963   : > { %v4764_v21 = vpop.permute.xlu0 %4763 }
0x1964   : > { %7028 = vmatmul.mubr.msk.bf16.vlgmr.msra.gmra.mxu1 %vm1654_vm2, %v4465_v12  ;;  %v4769_v23 = vsel %vm1904_vm3, %v4764_v21, 0 }
0x1965   : > { %7038 = vmatpush3.bf16.msra.mxu1 %v4577_v14  ;;  %7039 = vmatprep.mubr.msk.bf16.mxu1 %vm8686_vm0, %v8685_v0 }
0x1966   : > { %7049 = vmatprep.subr.bf16.mxu1 %v8685_v0 }
0x1969   : > { %v7681_v17 = vpop.eup %7680 }
0x196a   : > { %v4462_v19 = vmul.f32 %v7681_v17, %v7673_v59  ;;  %v7606_v17 = vld [vmem:[#allocation41 + $0x8] sm:$0xff]  }
0x196c   : > { %7040 = vmatmul.mubr.msk.bf16.vlgmr.msra.gmra.mxu1 %vm1654_vm2, %v4466_v16  ;;  %v4467_v22 = vpack.c.bf16 %v4462_v19, %v4462_v19  ;;  %v6509_v19 = vld [vmem:[#allocation26] ss:$0 sm:$0xff] }
0x196d   : > { %7051 = vmatprep.mubr.msk.bf16.mxu1 %vm8686_vm0, %v8685_v0 }
0x1984   : > { %v4456_v18 = vpop.xlane.xlu1 %4455 }
0x1985   : > { %7682 = vrcp.f32 %v4456_v18  ;;  %v7607_v18 = vld [vmem:[#allocation41] sm:$0xff]  }
0x1988   : > { %v4668_v3 = vpop.permute.xlu1 %4667 }
0x1989   : > { %v4673_v20 = vsel %vm1904_vm3, %v4668_v3, 0 }
0x198a   : > { %7050 = vmatpush3.bf16.msra.mxu1 %v4673_v20 }
0x198b   : > { %7061 = vmatprep.subr.bf16.mxu1 %v8685_v0 }
0x198d   : > { %7052 = vmatmul.mubr.msk.bf16.vlgmr.msra.gmra.mxu1 %vm1654_vm2, %v4467_v22 }
0x198e   : > { %7062 = vmatpush3.bf16.msra.mxu1 %v4769_v23  ;;  %7063 = vmatprep.mubr.msk.bf16.mxu1 %vm8686_vm0, %v8685_v0 }
0x198f   : > { %7073 = vmatprep.subr.bf16.mxu1 %v8685_v0 }
0x1992   : > { %v7683_v43 = vpop.eup %7682 }
0x1993   : > { %v4464_v24 = vmul.f32 %v7683_v43, %v7675_v1 }
0x1995   : > { %v4468_v25 = vpack.c.bf16 %v4464_v24, %v4464_v24 }
0x1997   : > { %7064 = vmatmul.mubr.msk.bf16.vlgmr.msra.gmra.mxu1 %vm1654_vm2, %v4468_v25  ;;  %v7608_v25 = vld [vmem:[#allocation25 + $0x8] sm:$0xff]  }
0x1998   : > { %7077 = vmatprep.mubr.msk.bf16.mxu1 %vm8686_vm0, %v8685_v0  ;;  %7074 = vmatpush3.bf16.msra.mxu1 %v7604_v56 }
0x1999   : > { %7075 = vmatprep.subr.bf16.mxu1 %v8685_v0 }
0x199c   : > { %7076 = vmatpush3.bf16.msra.mxu1 %v7605_v57 }
0x199d   : > { %7089 = vmatprep.subr.bf16.mxu1 %v8685_v0 }
0x1a24   : > { %v4511_v30 = vpop.f32.mrf.mxu1 }
0x1a25   : > { %v4517_v8 = vpack.c.bf16 %v4511_v30, %v4511_v30 }
0x1a26   : > { %v7029_v32 = vpop.f32.mrf.mxu1 }
0x1a27   : > { %7034 = vmatmul.mubr.msk.bf16.vlgmr.msra.gmra.mxu0 %vm1654_vm2, %v4517_v8 }
0x1a28   : > { %v4514_v33 = vpop.f32.mrf.mxu1  ;;  %7044 = vmatpush3.bf16.msra.mxu0 %v4624_v31  ;;  %7045 = vmatprep.mubr.msk.bf16.mxu0 %vm8686_vm0, %v8685_v0 }
0x1a29   : > { %7055 = vmatprep.subr.bf16.mxu0 %v8685_v0 }
0x1a2a   : > { %v7030_v34 = vpop.f32.mrf.mxu1 }
0x1a2c   : > { %v4613_v36 = vpop.f32.mrf.mxu1 }
0x1a2d   : > { %v4619_v37 = vpack.c.bf16 %v4613_v36, %v4613_v36 }
0x1a2e   : > { %v7041_v38 = vpop.f32.mrf.mxu1 }
0x1a2f   : > { %7046 = vmatmul.mubr.msk.bf16.vlgmr.msra.gmra.mxu0 %vm1654_vm2, %v4619_v37 }
0x1a30   : > { %v4616_v39 = vpop.f32.mrf.mxu1  ;;  %7056 = vmatpush3.bf16.msra.mxu0 %v4720_v29  ;;  %7057 = vmatprep.mubr.msk.bf16.mxu0 %vm8686_vm0, %v8685_v0 }
0x1a31   : > { %7067 = vmatprep.subr.bf16.mxu0 %v8685_v0 }
0x1a32   : > { %v7042_v40 = vpop.f32.mrf.mxu1 }
0x1a4d   : > { %v4709_v42 = vpop.f32.mrf.mxu1 }
0x1a4e   : > { %v4715_v44 = vpack.c.bf16 %v4709_v42, %v4709_v42 }
0x1a4f   : > { %v7053_v47 = vpop.f32.mrf.mxu1 }
0x1a50   : > { %7058 = vmatmul.mubr.msk.bf16.vlgmr.msra.gmra.mxu0 %vm1654_vm2, %v4715_v44 }
0x1a51   : > { %v4712_v48 = vpop.f32.mrf.mxu1  ;;  %7068 = vmatpush3.bf16.msra.mxu0 %v4816_v45  ;;  %7069 = vmatprep.mubr.msk.bf16.mxu0 %vm8686_vm0, %v8685_v0 }
0x1a52   : > { %7081 = vmatprep.subr.bf16.mxu0 %v8685_v0 }
0x1a53   : > { %v7054_v49 = vpop.f32.mrf.mxu1 }
0x1a57   : > { %v4805_v50 = vpop.f32.mrf.mxu1 }
0x1a58   : > { %v4811_v51 = vpack.c.bf16 %v4805_v50, %v4805_v50 }
0x1a59   : > { %v7065_v52 = vpop.f32.mrf.mxu1 }
0x1a5a   : > { %7070 = vmatmul.mubr.msk.bf16.vlgmr.msra.gmra.mxu0 %vm1654_vm2, %v4811_v51 }
0x1a5b   : > { %v4808_v53 = vpop.f32.mrf.mxu1  ;;  %7085 = vmatprep.mubr.msk.bf16.mxu0 %vm8686_vm0, %v8685_v0  ;;  %7082 = vmatpush3.bf16.msra.mxu0 %v7606_v17 }
0x1a5c   : > { %7083 = vmatprep.subr.bf16.mxu0 %v8685_v0 }
0x1a5d   : > { %v7066_v55 = vpop.f32.mrf.mxu1 }
0x1a5f   : > { %7084 = vmatpush3.bf16.msra.mxu0 %v7607_v18 }
0x1a60   : > { %7097 = vmatprep.subr.bf16.mxu0 %v8685_v0 }
0x1ae7   : > { %v4558_v15 = vpop.f32.mrf.mxu0 }
0x1ae8   : > { %v4570_v6 = vadd.f32 %v6502_v46, %v4558_v15 }
0x1ae9   : > { %v7035_v54 = vpop.f32.mrf.mxu0 }
0x1aeb   : > { %v4561_v59 = vpop.f32.mrf.mxu0 }
0x1aed   : > { %v7036_v60 = vpop.f32.mrf.mxu0 }
0x1aef   : > { %v4660_v61 = vpop.f32.mrf.mxu0 }
0x1af0   : > { %v4666_v9 = vadd.f32 %v4660_v61, %v4570_v6 }
0x1af1   : > { %v7047_v62 = vpop.f32.mrf.mxu0 }
0x1af3   : > { %v4663_v63 = vpop.f32.mrf.mxu0 }
0x1af5   : > { %v7048_v1 = vpop.f32.mrf.mxu0 }
0x1b10   : > { %v4756_v2 = vpop.f32.mrf.mxu0 }
0x1b11   : > { %v4762_v10 = vadd.f32 %v4756_v2, %v4666_v9 }
0x1b12   : > { %v7059_v4 = vpop.f32.mrf.mxu0 }
0x1b14   : > { %v4759_v5 = vpop.f32.mrf.mxu0 }
0x1b16   : > { %v7060_v7 = vpop.f32.mrf.mxu0 }
0x1b1a   : > { %v4852_v11 = vpop.f32.mrf.mxu0 }
0x1b1b   : > { %v4858_v12 = vadd.f32 %v4852_v11, %v4762_v10 }
0x1b1c   : > { %v7071_v13 = vpop.f32.mrf.mxu0 }
0x1b1d   : > { %v4869_v14 = vpack.c.bf16 %v4858_v12, %v4858_v12 }
0x1b1e   : > { %v4855_v58 = vpop.f32.mrf.mxu0 }
0x1b1f   : > { %7078 = vmatmul.mubr.msk.bf16.vlgmr.msra.gmra.mxu1 %vm1606_vm1, %v4869_v14 }
0x1b20   : > { %v7072_v16 = vpop.f32.mrf.mxu0  ;;  %7093 = vmatprep.mubr.msk.bf16.mxu1 %vm8686_vm0, %v8685_v0  ;;  %7090 = vmatpush3.bf16.msra.mxu1 %v7608_v25 }
0x1b21   : > { %7091 = vmatprep.subr.bf16.mxu1 %v8685_v0 }
0x1b24   : > { %7092 = vmatpush3.bf16.msra.mxu1 %v7609_v26 }
0x1b25   : > { %7103 = vmatprep.subr.bf16.mxu1 %v8685_v0 }
0x1bdf   : > { %v4925_v3 = vpop.f32.mrf.mxu1 }
0x1be0   : > { %v4926_v20 = vadd.f32 %v6509_v19, %v4925_v3 }
0x1be1   : > { %v7079_v21 = vpop.f32.mrf.mxu1 }
0x1be2   : > { %v4931_v22 = vmax.f32 %v4926_v20, 0.0 }
0x1be3   : > { %v4928_v23 = vpop.f32.mrf.mxu1 }
0x1be4   : > { %v4932_v43 = vpack.c.bf16 %v4931_v22, %v4931_v22 }
0x1be5   : > { %v7080_v24 = vpop.f32.mrf.mxu1 }
0x1be6   : > { %7086 = vmatmul.mubr.msk.bf16.vlgmr.msra.gmra.mxu0 %vm1606_vm1, %v4932_v43 }
0x1be7   : > { %7099 = vmatprep.mubr.msk.bf16.mxu0 %vm8686_vm0, %v8685_v0 }
0x1ca6   : > { %v4988_v28 = vpop.f32.mrf.mxu0 }
0x1ca7   : > { %v4989_v30 = vadd.f32 %v6513_v27, %v4988_v28 }
0x1ca8   : > { %v7087_v8 = vpop.f32.mrf.mxu0 }
0x1ca9   : > { %v9716_v31 = vadd.f32 %v4989_v30, %v4858_v12 }
0x1caa   : > { %v4991_v32 = vpop.f32.mrf.mxu0 }
0x1cab   : > { %v5007_v33 = vpack.c.bf16 %v9716_v31, %v9716_v31 }
0x1cac   : > { %v7088_v34 = vpop.f32.mrf.mxu0 }
0x1cad   : > { %7094 = vmatmul.mubr.msk.bf16.vlgmr.msra.gmra.mxu1 %vm1606_vm1, %v5007_v33 }
0x1cae   : > { %7105 = vmatprep.mubr.msk.bf16.mxu1 %vm8686_vm0, %v8685_v0 }
0x1d6d   : > { %v5063_v36 = vpop.f32.mrf.mxu1 }
0x1d6e   : > { %v5064_v37 = vadd.f32 %v6517_v35, %v5063_v36 }
0x1d6f   : > { %v7095_v29 = vpop.f32.mrf.mxu1 }
0x1d70   : > { %v9723_v38 = vpack.c.bf16 %v5064_v37, %v5064_v37 }
0x1d71   : > { %v5066_v39 = vpop.f32.mrf.mxu1 }
0x1d72   : > { %5121 = vrot.lane.b32.xlu0 %v9723_v38, %s8690_s17  ;;  %5071 = vrot.lane.b32.xlu1 %v9723_v38, %s10017_s1  ;;  %s10020_s1 = sld [smem:[#allocation82_spill]]  ;;  %s6546_s17 = sshll.u32 %s8920_s22, 7 }
0x1d73   : > { %v7096_v40 = vpop.f32.mrf.mxu1 }
0x1d76   : > { %5171 = vrot.lane.b32.xlu0 %v9723_v38, %s10018_s5  ;;  %5119 = vrot.lane.b32.xlu1 %v9723_v38, %s10011_s11  ;;  %s10019_s5 = sld [smem:[#allocation81_spill]] }
0x1d7a   : > { %5221 = vrot.lane.b32.xlu0 %v9723_v38, %s10012_s4  ;;  %5169 = vrot.lane.b32.xlu1 %v9723_v38, %s10013_s18  ;;  %s8698_s18 = smov [#allocation49]  }
0x1d7e   : > { %5219 = vrot.lane.b32.xlu1 %v9723_v38, %s10014_s3  ;;  %s8491_s3 = sshll.u32 %s8698_s18, 4  ;;  %s8492_s3 = int_to_ptr.vmem [resolvable:$false] %s8491_s3 }
0x1de4   : > { %v5122_v41 = vpop.permute.xlu0 %5121  ;;  %v5072_v42 = vpop.permute.xlu1 %5071 }
0x1de5   : > { %v5127_v44 = vsel %vm1654_vm2, %v5122_v41, 0  ;;  %v5077_v45 = vsel %vm1654_vm2, %v5072_v42, 0 }
0x1de6   : > { %7098 = vmatpush3.bf16.xpose.msra.mxu0 %v5077_v45  ;;  %7104 = vmatpush3.bf16.xpose.msra.mxu1 %v5127_v44 }
0x1de7   : > { %7109 = vmatprep.subr.bf16.mxu0 %v8685_v0  ;;  %7115 = vmatprep.subr.bf16.mxu1 %v8685_v0 }
0x1de8   : > { %v5172_v47 = vpop.permute.xlu0 %5171  ;;  %v5120_v48 = vpop.permute.xlu1 %5119 }
0x1de9   : > { %v5177_v50 = vsel %vm1654_vm2, %v5172_v47, 0 }
0x1dec   : > { %v5222_v49 = vpop.permute.xlu0 %5221  ;;  %v5170_v52 = vpop.permute.xlu1 %5169 }
0x1ded   : > { %v5227_v51 = vsel %vm1654_vm2, %v5222_v49, 0  ;;  %7100 = vmatmul.mubr.msk.bf16.vlgmr.msra.gmra.mxu0 %vm1654_vm2, %v9723_v38  ;;  %7106 = vmatmul.mubr.msk.bf16.vlgmr.msra.gmra.mxu1 %vm1654_vm2, %v5120_v48 }
0x1dee   : > { %7110 = vmatpush3.bf16.xpose.msra.mxu0 %v5177_v50  ;;  %7116 = vmatpush3.bf16.xpose.msra.mxu1 %v5227_v51 }
0x1def   : > { %7111 = vmatprep.mubr.msk.bf16.mxu0 %vm8686_vm0, %v8685_v0  ;;  %7117 = vmatprep.mubr.msk.bf16.mxu1 %vm8686_vm0, %v8685_v0 }
0x1df0   : > { %7121 = vmatprep.subr.bf16.mxu0 %v8685_v0  ;;  %7127 = vmatprep.subr.bf16.mxu1 %v8685_v0  ;;  %v5220_v53 = vpop.permute.xlu1 %5219 }
0x1df5   : > { %7112 = vmatmul.mubr.msk.bf16.vlgmr.msra.gmra.mxu0 %vm1654_vm2, %v5170_v52  ;;  %7118 = vmatmul.mubr.msk.bf16.vlgmr.msra.gmra.mxu1 %vm1654_vm2, %v5220_v53 }
0x1df6   : > { %7123 = vmatprep.mubr.msk.bf16.mxu0 %vm8686_vm0, %v8685_v0  ;;  %7129 = vmatprep.mubr.msk.bf16.mxu1 %vm8686_vm0, %v8685_v0 }
0x1ead   : > { %v5113_v55 = vpop.f32.mrf.mxu0  ;;  %v5163_v56 = vpop.f32.mrf.mxu1 }
0x1eae   : > { %v5269_v57 = vsel %vm1654_vm2, %v5113_v55, -inf  ;;  %v5272_v15 = vsel %vm1654_vm2, %v5163_v56, -inf }
0x1eaf   : > { %5270 = vmax.xlane.f32.xlu0 %v5269_v57  ;;  %v7101_v54 = vpop.f32.mrf.mxu0  ;;  %5273 = vmax.xlane.f32.xlu1 %v5272_v15  ;;  %v7107_v59 = vpop.f32.mrf.mxu1  ;;  %v5000_v57 = vld [vmem:[#allocation23] sm:$0xf] }
0x1eb0   : > { %v5370_v15 = vsel %vm1904_vm3, %v5000_v57, 0  ;;  %v5001_v54 = vld [vmem:[#allocation23 + $0x4] sm:$0xf] }
0x1eb1   : > { %v5116_v60 = vpop.f32.mrf.mxu0  ;;  %v5166_v61 = vpop.f32.mrf.mxu1  ;;  %7128 = vmatpush3.bf16.msra.mxu1 %v5370_v15 }
0x1eb2   : > { %7139 = vmatprep.subr.bf16.mxu1 %v8685_v0  ;;  %v5472_v61 = vsel %vm1904_vm3, %v5001_v54, 0  ;;  %v6534_v54 = vld [vmem:[#allocation22] ss:$0 sm:$0xff] }
0x1eb3   : > { %v7102_v62 = vpop.f32.mrf.mxu0  ;;  %v7108_v63 = vpop.f32.mrf.mxu1 }
0x1eb5   : > { %v5213_v1 = vpop.f32.mrf.mxu0  ;;  %v5263_v2 = vpop.f32.mrf.mxu1 }
0x1eb6   : > { %v5275_v46 = vsel %vm1654_vm2, %v5213_v1, -inf  ;;  %v5278_v9 = vsel %vm1654_vm2, %v5263_v2, -inf }
0x1eb7   : > { %5276 = vmax.xlane.f32.xlu0 %v5275_v46  ;;  %v7113_v4 = vpop.f32.mrf.mxu0  ;;  %v7119_v5 = vpop.f32.mrf.mxu1 }
0x1eb9   : > { %v5216_v6 = vpop.f32.mrf.mxu0  ;;  %v5266_v7 = vpop.f32.mrf.mxu1 }
0x1ebb   : > { %v7114_v10 = vpop.f32.mrf.mxu0  ;;  %5279 = vmax.xlane.f32.xlu0 %v5278_v9  ;;  %v7120_v11 = vpop.f32.mrf.mxu1 }
0x1ebc   : > { %v5003_v10 = vld [vmem:[#allocation23 + $0xc] sm:$0xf] }
0x1f38   : > { %v5271_v12 = vpop.xlane.xlu0 %5270  ;;  %v5274_v13 = vpop.xlane.xlu1 %5273 }
0x1f39   : > { %v5281_v14 = vsub.f32 %v5113_v55, %v5271_v12  ;;  %v5282_v58 = vsub.f32 %v5163_v56, %v5274_v13  ;;  %v5664_v13 = vsel %vm1904_vm3, %v5003_v10, 0  ;;  %v6536_v10 = vld [vmem:[#allocation17] ss:$0 sm:$0xff] }
0x1f3b   : > { %v5285_v16 = vmul.f32 1.442695, %v5281_v14  ;;  %v5287_v17 = vmul.f32 1.442695, %v5282_v58 }
0x1f3d   : > { %7684 = vpow2.f32 %v5285_v16 }
0x1f3e   : > { %7686 = vpow2.f32 %v5287_v17 }
0x1f40   : > { %v5277_v18 = vpop.xlane.xlu0 %5276 }
0x1f41   : > { %v5283_v26 = vsub.f32 %v5213_v1, %v5277_v18 }
0x1f43   : > { %v5289_v27 = vmul.f32 1.442695, %v5283_v26 }
0x1f44   : > { %v5280_v19 = vpop.xlane.xlu0 %5279 }
0x1f45   : > { %v5284_v3 = vsub.f32 %v5263_v2, %v5280_v19  ;;  %v5002_v2 = vld [vmem:[#allocation23 + $0x8] sm:$0xf] }
0x1f46   : > { %v5568_v5 = vsel %vm1904_vm3, %v5002_v2, 0 }
0x1f47   : > { %v5291_v20 = vmul.f32 1.442695, %v5284_v3 }
0x1f49   : > { %7688 = vpow2.f32 %v5291_v20 }
0x1f4a   : > { %v7685_v21 = vpop.eup %7684  ;;  %7690 = vpow2.f32 %v5289_v27 }
0x1f4b   : > { %v7687_v22 = vpop.eup %7686  ;;  %v5293_v23 = vsel %vm1654_vm2, %v7685_v21, 0.0 }
0x1f4c   : > { %5294 = vadd.xlane.f32.xlu1 %v5293_v23  ;;  %v5296_v43 = vsel %vm1654_vm2, %v7687_v22, 0.0 }
0x1f4d   : > { %5297 = vadd.xlane.f32.xlu0 %v5296_v43 }
0x1f56   : > { %v7689_v24 = vpop.eup %7688 }
0x1f57   : > { %v5302_v25 = vsel %vm1654_vm2, %v7689_v24, 0.0  ;;  %v7691_v28 = vpop.eup %7690 }
0x1f58   : > { %5303 = vadd.xlane.f32.xlu0 %v5302_v25  ;;  %v5299_v30 = vsel %vm1654_vm2, %v7691_v28, 0.0 }
0x1f5d   : > { %5317 = vrot.lane.b32.xlu1 %v9723_v38, %s10015_s2 }
0x1f6e   : > { %5419 = vrot.lane.b32.xlu0 %v9723_v38, %s10006_s0  ;;  %s5937_s0 = scalar_lea.hbm %s8897_s29, %s6546_s17 }
0x1f81   : > { %5300 = vadd.xlane.f32.xlu1 %v5299_v30 }
0x1f92   : > { %5515 = vrot.lane.b32.xlu1 %v9723_v38, %s10007_s10 }
0x1f96   : > { %5611 = vrot.lane.b32.xlu1 %v9723_v38, %s10008_s25 }
0x1fd5   : > { %v5295_v8 = vpop.xlane.xlu1 %5294 }
0x1fd6   : > { %7692 = vrcp.f32 %v5295_v8  ;;  %v5298_v32 = vpop.xlane.xlu0 %5297 }
0x1fd7   : > { %7694 = vrcp.f32 %v5298_v32 }
0x1fd9   : > { %v5318_v33 = vpop.permute.xlu1 %5317 }
0x1fda   : > { %v5323_v34 = vsel %vm1904_vm3, %v5318_v33, 0 }
0x1fdb   : > { %7122 = vmatpush3.bf16.msra.mxu0 %v5323_v34 }
0x1fdc   : > { %7133 = vmatprep.subr.bf16.mxu0 %v8685_v0 }
0x1fe1   : > { %v5304_v35 = vpop.xlane.xlu0 %5303 }
0x1fe3   : > { %v7693_v36 = vpop.eup %7692 }
0x1fe4   : > { %v5306_v37 = vmul.f32 %v7693_v36, %v7685_v21  ;;  %v7695_v41 = vpop.eup %7694 }
0x1fe5   : > { %v5420_v29 = vpop.permute.xlu0 %5419  ;;  %v5308_v38 = vmul.f32 %v7695_v41, %v7687_v22 }
0x1fe6   : > { %v5313_v39 = vpack.c.bf16 %v5306_v37, %v5306_v37  ;;  %v5425_v40 = vsel %vm1904_vm3, %v5420_v29, 0 }
0x1fe7   : > { %v5314_v42 = vpack.c.bf16 %v5308_v38, %v5308_v38 }
0x1fe8   : > { %7124 = vmatmul.mubr.msk.bf16.vlgmr.msra.gmra.mxu0 %vm1654_vm2, %v5313_v39 }
0x1fe9   : > { %7134 = vmatpush3.bf16.msra.mxu0 %v5425_v40  ;;  %7135 = vmatprep.mubr.msk.bf16.mxu0 %vm8686_vm0, %v8685_v0 }
0x1fea   : > { %7145 = vmatprep.subr.bf16.mxu0 %v8685_v0 }
0x1ff0   : > { %7136 = vmatmul.mubr.msk.bf16.vlgmr.msra.gmra.mxu0 %vm1654_vm2, %v5314_v42 }
0x1ff1   : > { %7147 = vmatprep.mubr.msk.bf16.mxu0 %vm8686_vm0, %v8685_v0 }
0x200a   : > { %v5301_v44 = vpop.xlane.xlu1 %5300 }
0x200b   : > { %7696 = vrcp.f32 %v5301_v44 }
0x200c   : > { %7698 = vrcp.f32 %v5304_v35 }
0x200e   : > { %v5516_v45 = vpop.permute.xlu1 %5515 }
0x200f   : > { %v5521_v47 = vsel %vm1904_vm3, %v5516_v45, 0 }
0x2010   : > { %7146 = vmatpush3.bf16.msra.mxu0 %v5521_v47 }
0x2011   : > { %7157 = vmatprep.subr.bf16.mxu0 %v8685_v0 }
0x2012   : > { %v5612_v50 = vpop.permute.xlu1 %5611 }
0x2013   : > { %v5617_v53 = vsel %vm1904_vm3, %v5612_v50, 0  ;;  %v7610_v50 = vld [vmem:[%s10019_s5 + $0x8] sm:$0xff]  }
0x2018   : > { %v7697_v48 = vpop.eup %7696 }
0x2019   : > { %v5310_v49 = vmul.f32 %v7697_v48, %v7691_v28  ;;  %v7699_v52 = vpop.eup %7698  ;;  %v6527_v28 = vld [vmem:[#allocation16] ss:$0 sm:$0xff] }
0x201a   : > { %v5312_v55 = vmul.f32 %v7699_v52, %v7689_v24  ;;  %v7612_v52 = vld [vmem:[%s10020_s1 + $0x8] sm:$0xff]  }
0x201b   : > { %v5315_v51 = vpack.c.bf16 %v5310_v49, %v5310_v49 }
0x201c   : > { %v5316_v56 = vpack.c.bf16 %v5312_v55, %v5312_v55 }
0x201d   : > { %7148 = vmatmul.mubr.msk.bf16.vlgmr.msra.gmra.mxu0 %vm1654_vm2, %v5315_v51  ;;  %v7706_v51 = vld [vmem:[%s9241_s16] sm:$0xf]  ;;  %s1562_s16 = sand.u32 1, %s8603_s15  }
0x201e   : > { %7158 = vmatpush3.bf16.msra.mxu0 %v5617_v53  ;;  %7159 = vmatprep.mubr.msk.bf16.mxu0 %vm8686_vm0, %v8685_v0  ;;  %v7613_v53 = vld [vmem:[%s10020_s1] sm:$0xff]   ;;  %s6400_s2 = sshll.u32 %s1562_s16, 3  ;;  %s5926_s11 = scalar_lea.sflag [#allocation4], %s1562_s16 }
0x201f   : > { %7169 = vmatprep.subr.bf16.mxu0 %v8685_v0  ;;  %s1564_s25 = scalar_lea.vmem [#allocation49], %s6400_s2  ;;  %s8493_s1 = scalar_lea.vmem %s8492_s3, 256 }
0x2020   : > { %s5939_s10 = sshll.u32 %s1564_s25, 4  ;;  %s5940_s10 = int_to_ptr.vmem [resolvable:$true] %s5939_s10 }
0x2021   : > { %s8487_s4 = scalar_lea.vmem %s5940_s10, 128  ;;  %p8494_p4 = scmp.lt.s32.totalorder %s5940_s10, %s8492_s3 }
0x2022   : > { %p8488_p12 = scmp.ne.s32.totalorder %s5940_s10, %s8487_s4  ;;  %p8495_p7 = scmp.lt.s32.totalorder %s8493_s1, %s8487_s4 }
0x2024   : > { %p8489_p5 = pnand %p8488_p12, %p10021_p3  ;;  %p8496_p8 = por %p8495_p7, %p8494_p4 }
0x2025   : > { %7160 = vmatmul.mubr.msk.bf16.vlgmr.msra.gmra.mxu0 %vm1654_vm2, %v5316_v56 }
0x2026   : > { %7173 = vmatprep.mubr.msk.bf16.mxu0 %vm8686_vm0, %v8685_v0  ;;  %7170 = vmatpush3.bf16.msra.mxu0 %v7612_v52  ;;  %p8490_p2 = pneg %p8489_p5 }
0x2027   : > { %7171 = vmatprep.subr.bf16.mxu0 %v8685_v0 }
0x2028   : > { %p8497_p11 = pnand %p8496_p8, %p8490_p2 }
0x202a   : > { %7172 = vmatpush3.bf16.msra.mxu0 %v7613_v53 }
0x202b   : > { %7185 = vmatprep.subr.bf16.mxu0 %v8685_v0 }
0x20a8   : > { %v5359_v59 = vpop.f32.mrf.mxu0 }
0x20a9   : > { %v5365_v60 = vpack.c.bf16 %v5359_v59, %v5359_v59 }
0x20aa   : > { %v7125_v62 = vpop.f32.mrf.mxu0 }
0x20ab   : > { %7130 = vmatmul.mubr.msk.bf16.vlgmr.msra.gmra.mxu1 %vm1654_vm2, %v5365_v60  ;;  %v6535_v60 = vld [vmem:[#allocation20] ss:$0 sm:$0xff] }
0x20ac   : > { %v5362_v63 = vpop.f32.mrf.mxu0  ;;  %7140 = vmatpush3.bf16.msra.mxu1 %v5472_v61  ;;  %7141 = vmatprep.mubr.msk.bf16.mxu1 %vm8686_vm0, %v8685_v0 }
0x20ad   : > { %7151 = vmatprep.subr.bf16.mxu1 %v8685_v0 }
0x20ae   : > { %v7126_v1 = vpop.f32.mrf.mxu0 }
0x20af   : > { %v6540_v1 = vld [vmem:[#allocation14] ss:$0 sm:$0xff] }
0x20b0   : > { %v5461_v46 = vpop.f32.mrf.mxu0 }
0x20b1   : > { %v5467_v4 = vpack.c.bf16 %v5461_v46, %v5461_v46 }
0x20b2   : > { %v7137_v6 = vpop.f32.mrf.mxu0 }
0x20b3   : > { %7142 = vmatmul.mubr.msk.bf16.vlgmr.msra.gmra.mxu1 %vm1654_vm2, %v5467_v4 }
0x20b4   : > { %v5464_v7 = vpop.f32.mrf.mxu0  ;;  %7152 = vmatpush3.bf16.msra.mxu1 %v5568_v5  ;;  %7153 = vmatprep.mubr.msk.bf16.mxu1 %vm8686_vm0, %v8685_v0 }
0x20b5   : > { %7163 = vmatprep.subr.bf16.mxu1 %v8685_v0 }
0x20b6   : > { %v7138_v9 = vpop.f32.mrf.mxu0 }
0x20dd   : > { %v5557_v11 = vpop.f32.mrf.mxu0 }
0x20de   : > { %v5563_v12 = vpack.c.bf16 %v5557_v11, %v5557_v11 }
0x20df   : > { %v7149_v14 = vpop.f32.mrf.mxu0 }
0x20e0   : > { %7154 = vmatmul.mubr.msk.bf16.vlgmr.msra.gmra.mxu1 %vm1654_vm2, %v5563_v12 }
0x20e1   : > { %v5560_v58 = vpop.f32.mrf.mxu0  ;;  %7164 = vmatpush3.bf16.msra.mxu1 %v5664_v13  ;;  %7165 = vmatprep.mubr.msk.bf16.mxu1 %vm8686_vm0, %v8685_v0 }
0x20e2   : > { %7177 = vmatprep.subr.bf16.mxu1 %v8685_v0 }
0x20e3   : > { %v7150_v16 = vpop.f32.mrf.mxu0 }
0x20e5   : > { %v5653_v17 = vpop.f32.mrf.mxu0 }
0x20e6   : > { %v5659_v18 = vpack.c.bf16 %v5653_v17, %v5653_v17 }
0x20e7   : > { %v7161_v19 = vpop.f32.mrf.mxu0 }
0x20e8   : > { %7166 = vmatmul.mubr.msk.bf16.vlgmr.msra.gmra.mxu1 %vm1654_vm2, %v5659_v18 }
0x20e9   : > { %v5656_v3 = vpop.f32.mrf.mxu0  ;;  %7181 = vmatprep.mubr.msk.bf16.mxu1 %vm8686_vm0, %v8685_v0  ;;  %7178 = vmatpush3.bf16.msra.mxu1 %v7610_v50 }
0x20ea   : > { %7179 = vmatprep.subr.bf16.mxu1 %v8685_v0 }
0x20eb   : > { %v7162_v20 = vpop.f32.mrf.mxu0 }
0x216b   : > { %v5406_v21 = vpop.f32.mrf.mxu1 }
0x216c   : > { %v5418_v32 = vadd.f32 %v6527_v28, %v5406_v21 }
0x216d   : > { %v7131_v22 = vpop.f32.mrf.mxu1 }
0x216f   : > { %v5409_v23 = vpop.f32.mrf.mxu1 }
0x2171   : > { %v7132_v43 = vpop.f32.mrf.mxu1 }
0x2173   : > { %v5508_v24 = vpop.f32.mrf.mxu1 }
0x2174   : > { %v5514_v34 = vadd.f32 %v5508_v24, %v5418_v32 }
0x2175   : > { %v7143_v25 = vpop.f32.mrf.mxu1 }
0x2177   : > { %v5511_v26 = vpop.f32.mrf.mxu1 }
0x2179   : > { %v7144_v27 = vpop.f32.mrf.mxu1 }
0x21a0   : > { %v5604_v30 = vpop.f32.mrf.mxu1 }
0x21a1   : > { %v5610_v36 = vadd.f32 %v5604_v30, %v5514_v34 }
0x21a2   : > { %v7155_v8 = vpop.f32.mrf.mxu1 }
0x21a4   : > { %v5607_v33 = vpop.f32.mrf.mxu1 }
0x21a6   : > { %v7156_v35 = vpop.f32.mrf.mxu1 }
0x21a8   : > { %v5700_v37 = vpop.f32.mrf.mxu1 }
0x21a9   : > { %v5706_v29 = vadd.f32 %v5700_v37, %v5610_v36 }
0x21aa   : > { %v7167_v39 = vpop.f32.mrf.mxu1 }
0x21ab   : > { %v5707_v40 = vadd.f32 %v5706_v29, %v9716_v31  ;;  %v7611_v31 = vld [vmem:[%s10019_s5] sm:$0xff]  }
0x21ac   : > { %v5703_v41 = vpop.f32.mrf.mxu1  ;;  %7180 = vmatpush3.bf16.msra.mxu1 %v7611_v31 }
0x21ad   : > { %v5708_v38 = vsel %vm1606_vm1, %v5707_v40, 0.0 }
0x21ae   : > { %5709 = vadd.xlane.f32.xlu0 %v5708_v38  ;;  %v7168_v42 = vpop.f32.mrf.mxu1 }
0x21af   : > { %7182 = vmatmul.mubr.msk.bf16.vlgmr.msra.gmra.mxu1 %vm1606_vm1, %v7706_v51 }
0x2237   : > { %v5710_v44 = vpop.xlane.xlu0 %5709 }
0x2238   : > { %v5711_v45 = vmul.f32 0.03125, %v5710_v44 }
0x223a   : > { %v5712_v47 = vsub.f32 %v5707_v40, %v5711_v45 }
0x223c   : > { %v5713_v48 = vmul.f32 %v5712_v47, %v5712_v47 }
0x223e   : > { %v5714_v49 = vsel %vm1606_vm1, %v5713_v48, 0.0 }
0x223f   : > { %5715 = vadd.xlane.f32.xlu1 %v5714_v49 }
0x226f   : > { %v5859_v2 = vpop.f32.mrf.mxu1 }
0x2270   : > { %v5860_v46 = vadd.f32 %v6540_v1, %v5859_v2 }
0x2271   : > { %v7183_v4 = vpop.f32.mrf.mxu1 }
0x2272   : > { %v5866_v5 = vpack.c.bf16 %v5860_v46, %v5860_v46 }
0x2273   : > { %v5862_v6 = vpop.f32.mrf.mxu1 }
0x2274   : > { %v5871_v7 = vsel %vm1654_vm2, %v5866_v5, 0 }
0x2275   : > { %v7184_v9 = vpop.f32.mrf.mxu1 }
0x22c8   : > { %v5716_v55 = vpop.xlane.xlu1 %5715 }
0x22c9   : > { %v5717_v56 = vmul.f32 0.03125, %v5716_v55 }
0x22cb   : > { %v5718_v57 = vadd.f32 1e-05, %v5717_v56 }
0x22cd   : > { %7700 = vrsqrt.f32 %v5718_v57 }
0x22da   : > { %v7701_v15 = vpop.eup %7700 }
0x22db   : > { %v5720_v59 = vmul.f32 %v7701_v15, %v5712_v47 }
0x22dd   : > { %v5727_v61 = vmul.f32 %v6534_v54, %v5720_v59 }
0x22df   : > { %v5734_v62 = vadd.f32 %v6535_v60, %v5727_v61 }
0x22e1   : > { %v5745_v63 = vpack.c.bf16 %v5734_v62, %v5734_v62 }
0x22e3   : > { %7174 = vmatmul.mubr.msk.bf16.vlgmr.msra.gmra.mxu0 %vm1606_vm1, %v5745_v63 }
0x22e4   : > { %7187 = vmatprep.mubr.msk.bf16.mxu0 %vm8686_vm0, %v8685_v0  ;;  %7186 = vmatpush3.bf16.xpose.msra.mxu0 %v5871_v7 }
0x23a3   : > { %v5801_v11 = vpop.f32.mrf.mxu0 }
0x23a4   : > { %v5802_v12 = vadd.f32 %v6536_v10, %v5801_v11 }
0x23a5   : > { %v7175_v13 = vpop.f32.mrf.mxu0 }
0x23a6   : > { %v5865_v14 = vpack.c.bf16 %v5802_v12, %v5802_v12 }
0x23a7   : > { %v5804_v58 = vpop.f32.mrf.mxu0 }
0x23a8   : > { %7188 = vmatmul.mubr.msk.bf16.vlgmr.msra.gmra.mxu0 %vm1654_vm2, %v5865_v14 }
0x23a9   : > { %v7176_v16 = vpop.f32.mrf.mxu0 }
0x2468   : > { %v5907_v0 = vpop.f32.mrf.mxu0 }
0x2469   : > { %v5913_v17 = vsel %vm1654_vm2, %v5907_v0, -inf }
0x246a   : > { %5914 = vmax.xlane.f32.xlu0 %v5913_v17  ;;  %v7189_v18 = vpop.f32.mrf.mxu0 }
0x246c   : > { %v5910_v19 = vpop.f32.mrf.mxu0 }
0x246e   : > { %v7190_v3 = vpop.f32.mrf.mxu0 }
0x24f3   : > { %v5915_v20 = vpop.xlane.xlu0 %5914 }
0x24f4   : > { %v5916_v21 = vsub.f32 %v5907_v0, %v5915_v20 }
0x24f6   : > { %v5917_v22 = vmul.f32 1.442695, %v5916_v21 }
0x24f8   : > { %7702 = vpow2.f32 %v5917_v22 }
0x2505   : > { %v7703_v23 = vpop.eup %7702 }
0x2506   : > { %v5919_v43 = vsel %vm1654_vm2, %v7703_v23, 0.0 }
0x2507   : > { %5920 = vadd.xlane.f32.xlu0 %v5919_v43 }
0x2590   : > { %v5921_v24 = vpop.xlane.xlu0 %5920 }
0x2591   : > { %7704 = vrcp.f32 %v5921_v24 }
0x259e   : > { %v7705_v25 = vpop.eup %7704 }
0x259f   : > { %v5923_v26 = vmul.f32 %v7705_v25, %v7703_v23 }
0x25a1   : > { %5924 = vst.msk [vmem:[%s1564_s25] sm:$0xff] %vm1654_vm2, %v5923_v26 }
0x25a2   : > { %8500 = shalt.err (!%p8497_p11)
}
0x25a3   : > { %s8501_s22 = scalar_lea.hbm %s5937_s0, 128  ;;  %s8505_s16 = scalar_lea.hbm %s8897_s29, 256 }
0x25a4   : > { %p8502_p10 = scmp.ne.s32.totalorder %s5937_s0, %s8501_s22  ;;  %p8506_p6 = scmp.lt.s32.totalorder %s5937_s0, %s8897_s29 }
0x25a5   : > { %p8507_p9 = scmp.lt.s32.totalorder %s8505_s16, %s8501_s22 }
0x25a6   : > { %p8503_p0 = pnand %p8502_p10, %p10021_p3 }
0x25a7   : > { %p8508_p1 = por %p8507_p9, %p8506_p6 }
0x25a8   : > { %p8504_p13 = pneg %p8503_p0 }
0x25aa   : > { %p8509_p12 = pnand %p8508_p1, %p8504_p13 }
0x25ac   : > { %8512 = shalt.err (!%p8509_p12)
}
0x25ad   : > { %7311 = dma.vmem_to_hbm [thread:$0]  (%p10021_p3), %s5940_s10, 128, %s5937_s0, %s5926_s11  }
0x25ae PF: > { %s10022_s1 = sld [smem:[#allocation95_spill]] }
0x25af   : > { %s10023_s2 = sld [smem:[#allocation93_spill]] }
0x25b0   : > { %s10024_s17 = sld [smem:[#allocation98_spill]] }
0x25b4   : > { %p7468_p5 = scmp.ge.s32.totalorder %s10022_s1, 2 }
0x25b5   : > { %s5951_s25 = sand.u32 1, %s10023_s2  }
0x25b6   : > { %p10025_p2 = scmp.ne.s32.totalorder %s10024_s17, 0  ;;  %s5952_s4 = scalar_lea.sflag [#allocation4], %s5951_s25 }
0x25b8   : > { %p7405_p4 = pnand %p7468_p5, %p10025_p2 }
0x25ba   : > { %p7406_p7 = pneg %p7405_p4 }
0x25bc   : > { %8594 = dma.done.wait (%p7406_p7), %s5952_s4, 128  }
0x25bd   : > { %8596 = vsyncadd (%p7406_p7), %s5952_s4, 4294967168  ;;  %s10026_s18 = sld [smem:[#allocation96_spill]]  ;;  %s10029_s0 = smov %s8603_s15 }
0x25be   : > { %s10027_s3 = sld [smem:[#allocation94_spill]] }
0x25bf   : > { %s10028_s16 = sld [smem:[#allocation97_spill]] }
0x25c3   : > { %p103_p8 = scmp.ge.s32.totalorder %s10026_s18, 4  }
0x25c4   : > { %s10030_s15 = smov %s10027_s3 }
0x25c5   :  { %105 = sbr.rel (!%p103_p8) target bundleno = 86 (0x56), region = 379 }
0x25ca   :  { %5957 = vsyncpa [#allocation3], 1 }
0x25cb   :  { %5959 = vsyncpa [#allocation3 + $0x1], 1 }
0x25cc   :  { %5960 = vsyncpa [#allocation6], 1 }
0x25cd   :  { %5961 = vsyncpa [#allocation9], 1 }
0x25ce   :  { %5962 = vsyncpa [#allocation12], 1 }
0x25cf   :  { %5963 = vsyncpa [#allocation15], 1 }
0x25d0   :  { %5964 = vsyncpa [#allocation18], 1 }
0x25d1   :  { %5965 = vsyncpa [#allocation21], 1 }
0x25d2   :  { %5966 = vsyncpa [#allocation24], 1 }
0x25d3   :  { %5967 = vsyncpa [#allocation27], 1 }
0x25d4   :  { %5968 = vsyncpa [#allocation30], 1 }
0x25d5   :  { %5969 = vsyncpa [#allocation33], 1 }
0x25d6   :  { %5970 = vsyncpa [#allocation36], 1 }
0x25d7   :  { %5971 = vsyncpa [#allocation39], 1 }
0x25d8   :  { %5972 = vsyncpa [#allocation42], 1 }
0x25d9   :  { %5973 = vsyncpa [#allocation45], 1 }
0x25da   :  { %5974 = vsyncpa [#allocation48], 1 }
0x25db   :  { %5975 = vsyncpa [#allocation4], 1 }
0x25dc   :  { %5977 = vsyncpa [#allocation4 + $0x1], 1 }

</bundles_post_ra>
